<compile_context>
chip_gen: v7x
topology: tpu7x:2x2x1
jax: 0.10.0
libtpu: 0.0.40
codegen_flags: <defaults>
</compile_context>

<pallas_src>
import math
from functools import partial

import jax
import jax.numpy as jnp
from jax import lax
from jax.experimental import pallas as pl
from jax.experimental.pallas import tpu as pltpu


def _layer_norm(v, a, b, eps=1e-6):
    """Annotated-Transformer LayerNorm: a*(x-mean)/(std_unbiased+eps)+b.

    Two-pass variance in f32 + exact reciprocal (matches the PyTorch layer)."""
    d = v.shape[-1]
    mean = jnp.mean(v, axis=-1, keepdims=True)
    c = v - mean
    var = jnp.sum(c * c, axis=-1, keepdims=True) * (1.0 / (d - 1.0))
    std = jnp.sqrt(var)
    return a * c * pl.reciprocal(std + eps, approx=False) + b


def encoder_layer_kernel(x_ref, mask_ref,
                         ln1_a, ln1_b, wq, bq, wk, bk, wv, bv, wo, bo,
                         ln2_a, ln2_b, w1, b1, w2, b2,
                         out_ref, k_scr, v_scr,
                         *, num_heads, q_tile, ff_chunk):
    f32 = jnp.float32
    bf16 = jnp.bfloat16

    qi = pl.program_id(1)
    _, S, D = x_ref.shape
    H = num_heads
    dk = D // H
    TQ = q_tile
    scale = 1.0 / math.sqrt(dk)

    # ---- per-batch prologue: full-seq LayerNorm + K/V projections, run once
    # per batch (qi axis is "arbitrary", so the scratch persists across tiles).
    @pl.when(qi == 0)
    def _():
        x_full = x_ref[0].astype(f32)                                   # [S, D]
        ln_kv = _layer_norm(x_full, ln1_a[...], ln1_b[...]).astype(bf16)
        k = jnp.dot(ln_kv, wk[...], preferred_element_type=f32) + bk[...]
        v = jnp.dot(ln_kv, wv[...], preferred_element_type=f32) + bv[...]
        k_scr[...] = k.reshape(S, H, dk).swapaxes(0, 1).astype(bf16)    # [H,S,dk]
        v_scr[...] = v.reshape(S, H, dk).swapaxes(0, 1).astype(bf16)    # [H,S,dk]

    # ---------------- sublayer 0: pre-norm -> MHA -> residual ----------------
    q0 = pl.multiple_of(qi * TQ, TQ)
    x_q = x_ref[0, pl.ds(q0, TQ), :].astype(f32)                        # [TQ, D]
    ln_q = _layer_norm(x_q, ln1_a[...], ln1_b[...]).astype(bf16)

    # projections: bf16 operands, f32 accumulate; 1/sqrt(dk) folded into q once
    q = (jnp.dot(ln_q, wq[...], preferred_element_type=f32) + bq[...]) * scale
    q3 = q.reshape(TQ, H, dk).swapaxes(0, 1).astype(bf16)               # [H,TQ,dk]

    bias = jnp.where(mask_ref[0].astype(f32) == 0.0, -1e9, 0.0)         # [1, S]

    scores = jnp.einsum('hqd,hkd->hqk', q3, k_scr[...],
                        preferred_element_type=f32)                     # [H,TQ,S]
    scores = scores + bias[None]
    scores = scores - jnp.max(scores, axis=-1, keepdims=True)
    p = jnp.exp(scores)
    p = p * pl.reciprocal(jnp.sum(p, axis=-1, keepdims=True), approx=True)

    o3 = jnp.einsum('hqk,hkd->hqd', p.astype(bf16), v_scr[...],
                    preferred_element_type=f32)                         # [H,TQ,dk]

    # fused output projection: relayout heads to [TQ, H*dk], one K=D matmul
    o2 = o3.astype(bf16).swapaxes(0, 1).reshape(TQ, D)                  # [TQ, D]
    attn = jnp.dot(o2, wo[...], preferred_element_type=f32) + bo[...]
    x1 = x_q + attn                              # dropout is identity in eval

    # ---------------- sublayer 1: pre-norm -> FFN (ReLU) -> residual ---------
    ln2 = _layer_norm(x1, ln2_a[...], ln2_b[...]).astype(bf16)          # [TQ, D]
    d_ff = w1.shape[1]
    n_chunks = d_ff // ff_chunk                   # wrapper guarantees exact

    if n_chunks == 1:
        h1 = jnp.maximum(
            jnp.dot(ln2, w1[...], preferred_element_type=f32) + b1[...], 0.0)
        ff = jnp.dot(h1.astype(bf16), w2[...], preferred_element_type=f32)
    elif n_chunks <= 4:
        ff = jnp.zeros((TQ, D), f32)              # short static unroll
        for c in range(n_chunks):
            c0, c1 = c * ff_chunk, (c + 1) * ff_chunk
            h1 = jnp.maximum(
                jnp.dot(ln2, w1[:, c0:c1], preferred_element_type=f32)
                + b1[:, c0:c1], 0.0)
            ff = ff + jnp.dot(h1.astype(bf16), w2[c0:c1, :],
                              preferred_element_type=f32)
    else:
        def ffn_body(c, acc):                     # visible loop: one chunk live
            c0 = pl.multiple_of(c * ff_chunk, ff_chunk)
            h1 = jnp.maximum(
                jnp.dot(ln2, w1[:, pl.ds(c0, ff_chunk)],
                        preferred_element_type=f32)
                + b1[:, pl.ds(c0, ff_chunk)], 0.0)
            return acc + jnp.dot(h1.astype(bf16), w2[pl.ds(c0, ff_chunk), :],
                                 preferred_element_type=f32)
        ff = lax.fori_loop(0, n_chunks, ffn_body, jnp.zeros((TQ, D), f32),
                           unroll=True)

    out_ref[0] = (x1 + ff + b2[...]).astype(out_ref.dtype)


def _tpu_vmem_bytes():
    try:
        return int(pltpu.get_tpu_info().vmem_capacity_bytes)
    except Exception:
        return 64 * 1024 * 1024          # conservative (v7x per-core) fallback


def encoder_layer(x, mask, params, num_heads, *,
                  q_tile=None, ff_chunk=512, single_buffer_weights=True):
    B, S, D = x.shape
    assert D % num_heads == 0
    dk = D // num_heads
    d_ff = params["w1"].shape[1]
    bf16 = jnp.bfloat16

    # per-generation sizing: leave headroom for compiler scratch / semaphores,
    # use bigger query tiles where VMEM allows (v5e/v6e 128 MiB vs v7x 64 MiB).
    vmem_cap = _tpu_vmem_bytes()
    vmem_limit = min((vmem_cap * 3) // 4, 112 * 1024 * 1024)
    if q_tile is None:
        q_tile = 256 if vmem_cap >= 100 * 1024 * 1024 else 128

    # query tile: q_tile if it divides S, else whole sequence.
    # TODO(synk): pad S / use masked stores instead of the whole-seq fallback.
    TQ = q_tile if (S > q_tile and S % q_tile == 0) else S
    n_q = S // TQ

    ff_chunk = min(ff_chunk, d_ff)
    if d_ff % ff_chunk != 0:
        ff_chunk = d_ff

    # weights cast to bf16 once here (MXU operands); biases / LN params stay f32
    weights = [
        params["ln1_a"], params["ln1_b"],
        params["wq"].astype(bf16), params["bq"],
        params["wk"].astype(bf16), params["bk"],
        params["wv"].astype(bf16), params["bv"],
        params["wo"].astype(bf16), params["bo"],
        params["ln2_a"], params["ln2_b"],
        params["w1"].astype(bf16), params["b1"],
        params["w2"].astype(bf16), params["b2"],
    ]

    kernel = partial(encoder_layer_kernel, num_heads=num_heads, q_tile=TQ,
                     ff_chunk=ff_chunk)

    def build(single_buffer):
        def w_spec(a):
            nd = a.ndim
            idx = lambda b, qi, _nd=nd: (0,) * _nd
            if single_buffer:
                # grid-constant weights: double-buffering buys nothing
                return pl.BlockSpec(a.shape, idx, pipeline_mode=pl.Buffered(1))
            return pl.BlockSpec(a.shape, idx)

        return pl.pallas_call(
            kernel,
            out_shape=jax.ShapeDtypeStruct((B, S, D), x.dtype),
            grid=(B, n_q),
            in_specs=[pl.BlockSpec((1, S, D), lambda b, qi: (b, 0, 0)),   # x (full seq)
                      pl.BlockSpec((1, 1, S), lambda b, qi: (b, 0, 0))]   # key mask
                     + [w_spec(w) for w in weights],
            out_specs=pl.BlockSpec((1, TQ, D), lambda b, qi: (b, qi, 0)),
            scratch_shapes=[pltpu.VMEM((num_heads, S, dk), bf16),   # K  [H,S,dk]
                            pltpu.VMEM((num_heads, S, dk), bf16)],  # V  [H,S,dk]
            compiler_params=pltpu.CompilerParams(
                # B parallel (megacore); qi arbitrary so K/V scratch persists
                dimension_semantics=("parallel", "arbitrary"),
                vmem_limit_bytes=int(vmem_limit)),
        )

    if single_buffer_weights:
        try:
            return build(True)(x, mask, *weights)
        except Exception:
            pass  # pl.Buffered(1) unsupported on this jax/libtpu -> fall back
    return build(False)(x, mask, *weights)


def reference(x, mask, p, num_heads):
    """Pure-JAX f32 reference mirroring the PyTorch EncoderLayer (eval mode)."""
    B, S, D = x.shape
    dk = D // num_heads

    def ln(v, a, b, eps=1e-6):
        d = v.shape[-1]
        mean = jnp.mean(v, -1, keepdims=True)
        std = jnp.sqrt(jnp.sum((v - mean) ** 2, -1, keepdims=True) / (d - 1))
        return a * (v - mean) / (std + eps) + b

    ln1 = ln(x, p["ln1_a"][0], p["ln1_b"][0])
    q = ln1 @ p["wq"] + p["bq"][0]
    k = ln1 @ p["wk"] + p["bk"][0]
    v = ln1 @ p["wv"] + p["bv"][0]
    q = q.reshape(B, S, num_heads, dk).transpose(0, 2, 1, 3)
    k = k.reshape(B, S, num_heads, dk).transpose(0, 2, 1, 3)
    v = v.reshape(B, S, num_heads, dk).transpose(0, 2, 1, 3)
    scores = jnp.einsum("bhqd,bhkd->bhqk", q, k) / math.sqrt(dk)
    scores = jnp.where(mask[:, :, None, :] == 0.0, -1e9, scores)
    p_attn = jax.nn.softmax(scores, axis=-1)
    o = jnp.einsum("bhqk,bhkd->bhqd", p_attn, v).transpose(0, 2, 1, 3).reshape(B, S, D)
    attn = o @ p["wo"] + p["bo"][0]
    x1 = x + attn
    ln2v = ln(x1, p["ln2_a"][0], p["ln2_b"][0])
    ff = jnp.maximum(ln2v @ p["w1"] + p["b1"][0], 0.0) @ p["w2"] + p["b2"][0]
    return x1 + ff


def init_params(key, D, d_ff):
    ks = jax.random.split(key, 12)
    s = 0.05
    f32 = jnp.float32
    return {
        "ln1_a": jnp.ones((1, D), f32),
        "ln1_b": jnp.zeros((1, D), f32),
        "wq": jax.random.normal(ks[0], (D, D), f32) * s,
        "bq": jax.random.normal(ks[1], (1, D), f32) * s,
        "wk": jax.random.normal(ks[2], (D, D), f32) * s,
        "bk": jax.random.normal(ks[3], (1, D), f32) * s,
        "wv": jax.random.normal(ks[4], (D, D), f32) * s,
        "bv": jax.random.normal(ks[5], (1, D), f32) * s,
        "wo": jax.random.normal(ks[6], (D, D), f32) * s,
        "bo": jax.random.normal(ks[7], (1, D), f32) * s,
        "ln2_a": jnp.ones((1, D), f32),
        "ln2_b": jnp.zeros((1, D), f32),
        "w1": jax.random.normal(ks[8], (D, d_ff), f32) * s,
        "b1": jax.random.normal(ks[9], (1, d_ff), f32) * s,
        "w2": jax.random.normal(ks[10], (d_ff, D), f32) * s,
        "b2": jax.random.normal(ks[11], (1, D), f32) * s,
    }


if __name__ == "__main__":
    # Small demo shapes. NOTE: for real model sizes use D, d_ff multiples of 128
    # and S a multiple of the query tile so stores are lane-dense.
    B, S, D, H, d_ff = 2, 8, 32, 4, 64

    key = jax.random.PRNGKey(0)
    kx, kp = jax.random.split(key)
    x = jax.random.normal(kx, (B, S, D), jnp.float32)
    mask = jnp.ones((B, 1, S), jnp.float32)
    mask = mask.at[1, 0, 6:].set(0.0)  # mask last two key positions of batch 1
    params = init_params(kp, D, d_ff)

    out = jax.block_until_ready(encoder_layer(x, mask, params, num_heads=H))
    ref = jax.block_until_ready(reference(x, mask, params, H))

    assert out.shape == (B, S, D) and out.dtype == jnp.float32
    # bf16 matmul operands + approx softmax reciprocal vs f32 reference
    assert jnp.allclose(out, ref, rtol=2e-2, atol=2e-2), float(jnp.max(jnp.abs(out - ref)))
    print("KERNEL_OK")
</pallas_src>

<mosaic_0001>
module attributes {stable_mosaic.version = 11 : i64} {
  func.func @encoder_layer_kernel(%arg0: i32, %arg1: i32, %arg2: memref<1x8x32xf32, #tpu.memory_space<vmem>>, %arg3: memref<1x1x8xf32, #tpu.memory_space<vmem>>, %arg4: memref<1x32xf32, #tpu.memory_space<vmem>>, %arg5: memref<1x32xf32, #tpu.memory_space<vmem>>, %arg6: memref<32x32xbf16, #tpu.memory_space<vmem>>, %arg7: memref<1x32xf32, #tpu.memory_space<vmem>>, %arg8: memref<32x32xbf16, #tpu.memory_space<vmem>>, %arg9: memref<1x32xf32, #tpu.memory_space<vmem>>, %arg10: memref<32x32xbf16, #tpu.memory_space<vmem>>, %arg11: memref<1x32xf32, #tpu.memory_space<vmem>>, %arg12: memref<32x32xbf16, #tpu.memory_space<vmem>>, %arg13: memref<1x32xf32, #tpu.memory_space<vmem>>, %arg14: memref<1x32xf32, #tpu.memory_space<vmem>>, %arg15: memref<1x32xf32, #tpu.memory_space<vmem>>, %arg16: memref<32x64xbf16, #tpu.memory_space<vmem>>, %arg17: memref<1x64xf32, #tpu.memory_space<vmem>>, %arg18: memref<64x32xbf16, #tpu.memory_space<vmem>>, %arg19: memref<1x32xf32, #tpu.memory_space<vmem>>, %arg20: memref<1x8x32xf32, #tpu.memory_space<vmem>>, %arg21: memref<4x8x8xbf16, #tpu.memory_space<vmem>>, %arg22: memref<4x8x8xbf16, #tpu.memory_space<vmem>>) attributes {dimension_semantics = [#tpu.dimension_semantics<parallel>, #tpu.dimension_semantics<arbitrary>], iteration_bounds = array<i64: 2, 1>, scalar_prefetch = 0 : i64, scratch_operands = 2 : i64, tpu.core_type = #tpu.core_type<tc>, window_params = [{transform_indices = @transform_0, window_bounds = array<i64: 1, 8, 32>}, {transform_indices = @transform_1, window_bounds = array<i64: 1, 1, 8>}, {pipeline_mode = #tpu.pipeline_mode<synchronous>, transform_indices = @transform_2, window_bounds = array<i64: 1, 32>}, {pipeline_mode = #tpu.pipeline_mode<synchronous>, transform_indices = @transform_3, window_bounds = array<i64: 1, 32>}, {pipeline_mode = #tpu.pipeline_mode<synchronous>, transform_indices = @transform_4, window_bounds = array<i64: 32, 32>}, {pipeline_mode = #tpu.pipeline_mode<synchronous>, transform_indices = @transform_5, window_bounds = array<i64: 1, 32>}, {pipeline_mode = #tpu.pipeline_mode<synchronous>, transform_indices = @transform_6, window_bounds = array<i64: 32, 32>}, {pipeline_mode = #tpu.pipeline_mode<synchronous>, transform_indices = @transform_7, window_bounds = array<i64: 1, 32>}, {pipeline_mode = #tpu.pipeline_mode<synchronous>, transform_indices = @transform_8, window_bounds = array<i64: 32, 32>}, {pipeline_mode = #tpu.pipeline_mode<synchronous>, transform_indices = @transform_9, window_bounds = array<i64: 1, 32>}, {pipeline_mode = #tpu.pipeline_mode<synchronous>, transform_indices = @transform_10, window_bounds = array<i64: 32, 32>}, {pipeline_mode = #tpu.pipeline_mode<synchronous>, transform_indices = @transform_11, window_bounds = array<i64: 1, 32>}, {pipeline_mode = #tpu.pipeline_mode<synchronous>, transform_indices = @transform_12, window_bounds = array<i64: 1, 32>}, {pipeline_mode = #tpu.pipeline_mode<synchronous>, transform_indices = @transform_13, window_bounds = array<i64: 1, 32>}, {pipeline_mode = #tpu.pipeline_mode<synchronous>, transform_indices = @transform_14, window_bounds = array<i64: 32, 64>}, {pipeline_mode = #tpu.pipeline_mode<synchronous>, transform_indices = @transform_15, window_bounds = array<i64: 1, 64>}, {pipeline_mode = #tpu.pipeline_mode<synchronous>, transform_indices = @transform_16, window_bounds = array<i64: 64, 32>}, {pipeline_mode = #tpu.pipeline_mode<synchronous>, transform_indices = @transform_17, window_bounds = array<i64: 1, 32>}, {transform_indices = @transform_18, window_bounds = array<i64: 1, 8, 32>}]} {
    %c0_i32 = arith.constant 0 : i32
    %0 = arith.cmpi eq, %arg1, %c0_i32 : i32
    %1 = arith.extui %0 : i1 to i32
    %c0_i32_0 = arith.constant 0 : i32
    %2 = arith.cmpi ne, %1, %c0_i32_0 : i32
    scf.if %2 {
      %c0_60 = arith.constant 0 : index
      %c0_61 = arith.constant 0 : index
      %c0_62 = arith.constant 0 : index
      %117 = vector.load %arg2[%c0_60, %c0_61, %c0_62] : memref<1x8x32xf32, #tpu.memory_space<vmem>>, vector<1x8x32xf32>
      %118 = vector.shape_cast %117 : vector<1x8x32xf32> to vector<8x32xf32>
      %c0_63 = arith.constant 0 : index
      %c0_64 = arith.constant 0 : index
      %119 = vector.load %arg4[%c0_63, %c0_64] : memref<1x32xf32, #tpu.memory_space<vmem>>, vector<1x32xf32>
      %c0_65 = arith.constant 0 : index
      %c0_66 = arith.constant 0 : index
      %120 = vector.load %arg5[%c0_65, %c0_66] : memref<1x32xf32, #tpu.memory_space<vmem>>, vector<1x32xf32>
      %cst_67 = arith.constant dense<0.000000e+00> : vector<8xf32>
      %121 = vector.multi_reduction <add>, %118, %cst_67 [1] : vector<8x32xf32> to vector<8xf32>
      %122 = vector.shape_cast %121 : vector<8xf32> to vector<8x1xf32>
      %cst_68 = arith.constant 3.200000e+01 : f32
      %123 = vector.broadcast %cst_68 : f32 to vector<8x1xf32>
      %124 = arith.divf %122, %123 : vector<8x1xf32>
      %125 = vector.broadcast %124 : vector<8x1xf32> to vector<8x32xf32>
      %126 = arith.subf %118, %125 : vector<8x32xf32>
      %127 = arith.mulf %126, %126 : vector<8x32xf32>
      %cst_69 = arith.constant dense<0.000000e+00> : vector<8xf32>
      %128 = vector.multi_reduction <add>, %127, %cst_69 [1] : vector<8x32xf32> to vector<8xf32>
      %129 = vector.shape_cast %128 : vector<8xf32> to vector<8x1xf32>
      %cst_70 = arith.constant 0.0322580636 : f32
      %130 = vector.broadcast %cst_70 : f32 to vector<8x1xf32>
      %131 = arith.mulf %129, %130 : vector<8x1xf32>
      %132 = math.sqrt %131 : vector<8x1xf32>
      %133 = vector.broadcast %119 : vector<1x32xf32> to vector<8x32xf32>
      %134 = arith.mulf %133, %126 : vector<8x32xf32>
      %cst_71 = arith.constant 9.99999997E-7 : f32
      %135 = vector.broadcast %cst_71 : f32 to vector<8x1xf32>
      %136 = arith.addf %132, %135 : vector<8x1xf32>
      %137 = tpu.reciprocal %136 : vector<8x1xf32> -> vector<8x1xf32>
      %138 = vector.broadcast %137 : vector<8x1xf32> to vector<8x32xf32>
      %139 = arith.mulf %134, %138 : vector<8x32xf32>
      %140 = vector.broadcast %120 : vector<1x32xf32> to vector<8x32xf32>
      %141 = arith.addf %139, %140 : vector<8x32xf32>
      %142 = arith.truncf %141 : vector<8x32xf32> to vector<8x32xbf16>
      %c0_72 = arith.constant 0 : index
      %c0_73 = arith.constant 0 : index
      %143 = vector.load %arg8[%c0_72, %c0_73] : memref<32x32xbf16, #tpu.memory_space<vmem>>, vector<32x32xbf16>
      %cst_74 = arith.constant dense<0.000000e+00> : vector<8x32xf32>
      %144 = tpu.matmul %142, %143, %cst_74 {dimension_numbers = #tpu.dot_dimension_numbers<[1], [0], [0], [1], [0, 0, 1, 1], [], []>} : vector<8x32xbf16>, vector<32x32xbf16>, vector<8x32xf32> -> vector<8x32xf32>
      %c0_75 = arith.constant 0 : index
      %c0_76 = arith.constant 0 : index
      %145 = vector.load %arg9[%c0_75, %c0_76] : memref<1x32xf32, #tpu.memory_space<vmem>>, vector<1x32xf32>
      %146 = vector.broadcast %145 : vector<1x32xf32> to vector<8x32xf32>
      %147 = arith.addf %144, %146 : vector<8x32xf32>
      %c0_77 = arith.constant 0 : index
      %c0_78 = arith.constant 0 : index
      %148 = vector.load %arg10[%c0_77, %c0_78] : memref<32x32xbf16, #tpu.memory_space<vmem>>, vector<32x32xbf16>
      %cst_79 = arith.constant dense<0.000000e+00> : vector<8x32xf32>
      %149 = tpu.matmul %142, %148, %cst_79 {dimension_numbers = #tpu.dot_dimension_numbers<[1], [0], [0], [1], [0, 0, 1, 1], [], []>} : vector<8x32xbf16>, vector<32x32xbf16>, vector<8x32xf32> -> vector<8x32xf32>
      %c0_80 = arith.constant 0 : index
      %c0_81 = arith.constant 0 : index
      %150 = vector.load %arg11[%c0_80, %c0_81] : memref<1x32xf32, #tpu.memory_space<vmem>>, vector<1x32xf32>
      %151 = vector.broadcast %150 : vector<1x32xf32> to vector<8x32xf32>
      %152 = arith.addf %149, %151 : vector<8x32xf32>
      %153 = vector.shape_cast %147 : vector<8x32xf32> to vector<8x4x8xf32>
      %154 = tpu.transpose %153, [1, 0, 2] : vector<8x4x8xf32> -> vector<4x8x8xf32>
      %155 = arith.truncf %154 : vector<4x8x8xf32> to vector<4x8x8xbf16>
      %c0_82 = arith.constant 0 : index
      %c0_83 = arith.constant 0 : index
      %c0_84 = arith.constant 0 : index
      %156 = vector.load %arg21[%c0_82, %c0_83, %c0_84] : memref<4x8x8xbf16, #tpu.memory_space<vmem>>, vector<4x8x8xbf16>
      tpu.vector_store %arg21[%c0_82, %c0_83, %c0_84], %155 {strides = array<i32>} : memref<4x8x8xbf16, #tpu.memory_space<vmem>>, vector<4x8x8xbf16>,
      %157 = vector.shape_cast %152 : vector<8x32xf32> to vector<8x4x8xf32>
      %158 = tpu.transpose %157, [1, 0, 2] : vector<8x4x8xf32> -> vector<4x8x8xf32>
      %159 = arith.truncf %158 : vector<4x8x8xf32> to vector<4x8x8xbf16>
      %c0_85 = arith.constant 0 : index
      %c0_86 = arith.constant 0 : index
      %c0_87 = arith.constant 0 : index
      %160 = vector.load %arg22[%c0_85, %c0_86, %c0_87] : memref<4x8x8xbf16, #tpu.memory_space<vmem>>, vector<4x8x8xbf16>
      tpu.vector_store %arg22[%c0_85, %c0_86, %c0_87], %159 {strides = array<i32>} : memref<4x8x8xbf16, #tpu.memory_space<vmem>>, vector<4x8x8xbf16>,
    } else {
    }
    %c8_i32 = arith.constant 8 : i32
    %3 = arith.muli %arg1, %c8_i32 : i32
    %4 = tpu.assume_multiple %3, 8 : i32
    %c0 = arith.constant 0 : index
    %5 = arith.index_cast %4 : i32 to index
    %c0_1 = arith.constant 0 : index
    %6 = vector.load %arg2[%c0, %5, %c0_1] : memref<1x8x32xf32, #tpu.memory_space<vmem>>, vector<1x8x32xf32>
    %7 = vector.shape_cast %6 : vector<1x8x32xf32> to vector<8x32xf32>
    %c0_2 = arith.constant 0 : index
    %c0_3 = arith.constant 0 : index
    %8 = vector.load %arg4[%c0_2, %c0_3] : memref<1x32xf32, #tpu.memory_space<vmem>>, vector<1x32xf32>
    %c0_4 = arith.constant 0 : index
    %c0_5 = arith.constant 0 : index
    %9 = vector.load %arg5[%c0_4, %c0_5] : memref<1x32xf32, #tpu.memory_space<vmem>>, vector<1x32xf32>
    %cst = arith.constant dense<0.000000e+00> : vector<8xf32>
    %10 = vector.multi_reduction <add>, %7, %cst [1] : vector<8x32xf32> to vector<8xf32>
    %11 = vector.shape_cast %10 : vector<8xf32> to vector<8x1xf32>
    %cst_6 = arith.constant 3.200000e+01 : f32
    %12 = vector.broadcast %cst_6 : f32 to vector<8x1xf32>
    %13 = arith.divf %11, %12 : vector<8x1xf32>
    %14 = vector.broadcast %13 : vector<8x1xf32> to vector<8x32xf32>
    %15 = arith.subf %7, %14 : vector<8x32xf32>
    %16 = arith.mulf %15, %15 : vector<8x32xf32>
    %cst_7 = arith.constant dense<0.000000e+00> : vector<8xf32>
    %17 = vector.multi_reduction <add>, %16, %cst_7 [1] : vector<8x32xf32> to vector<8xf32>
    %18 = vector.shape_cast %17 : vector<8xf32> to vector<8x1xf32>
    %cst_8 = arith.constant 0.0322580636 : f32
    %19 = vector.broadcast %cst_8 : f32 to vector<8x1xf32>
    %20 = arith.mulf %18, %19 : vector<8x1xf32>
    %21 = math.sqrt %20 : vector<8x1xf32>
    %22 = vector.broadcast %8 : vector<1x32xf32> to vector<8x32xf32>
    %23 = arith.mulf %22, %15 : vector<8x32xf32>
    %cst_9 = arith.constant 9.99999997E-7 : f32
    %24 = vector.broadcast %cst_9 : f32 to vector<8x1xf32>
    %25 = arith.addf %21, %24 : vector<8x1xf32>
    %26 = tpu.reciprocal %25 : vector<8x1xf32> -> vector<8x1xf32>
    %27 = vector.broadcast %26 : vector<8x1xf32> to vector<8x32xf32>
    %28 = arith.mulf %23, %27 : vector<8x32xf32>
    %29 = vector.broadcast %9 : vector<1x32xf32> to vector<8x32xf32>
    %30 = arith.addf %28, %29 : vector<8x32xf32>
    %31 = arith.truncf %30 : vector<8x32xf32> to vector<8x32xbf16>
    %c0_10 = arith.constant 0 : index
    %c0_11 = arith.constant 0 : index
    %32 = vector.load %arg6[%c0_10, %c0_11] : memref<32x32xbf16, #tpu.memory_space<vmem>>, vector<32x32xbf16>
    %cst_12 = arith.constant dense<0.000000e+00> : vector<8x32xf32>
    %33 = tpu.matmul %31, %32, %cst_12 {dimension_numbers = #tpu.dot_dimension_numbers<[1], [0], [0], [1], [0, 0, 1, 1], [], []>} : vector<8x32xbf16>, vector<32x32xbf16>, vector<8x32xf32> -> vector<8x32xf32>
    %c0_13 = arith.constant 0 : index
    %c0_14 = arith.constant 0 : index
    %34 = vector.load %arg7[%c0_13, %c0_14] : memref<1x32xf32, #tpu.memory_space<vmem>>, vector<1x32xf32>
    %35 = vector.broadcast %34 : vector<1x32xf32> to vector<8x32xf32>
    %36 = arith.addf %33, %35 : vector<8x32xf32>
    %cst_15 = arith.constant 0.353553385 : f32
    %37 = vector.broadcast %cst_15 : f32 to vector<8x32xf32>
    %38 = arith.mulf %36, %37 : vector<8x32xf32>
    %39 = vector.shape_cast %38 : vector<8x32xf32> to vector<8x4x8xf32>
    %40 = tpu.transpose %39, [1, 0, 2] : vector<8x4x8xf32> -> vector<4x8x8xf32>
    %41 = arith.truncf %40 : vector<4x8x8xf32> to vector<4x8x8xbf16>
    %c0_16 = arith.constant 0 : index
    %c0_17 = arith.constant 0 : index
    %c0_18 = arith.constant 0 : index
    %42 = vector.load %arg3[%c0_16, %c0_17, %c0_18] : memref<1x1x8xf32, #tpu.memory_space<vmem>>, vector<1x1x8xf32>
    %43 = vector.shape_cast %42 : vector<1x1x8xf32> to vector<1x8xf32>
    %cst_19 = arith.constant 0.000000e+00 : f32
    %44 = vector.broadcast %cst_19 : f32 to vector<1x8xf32>
    %45 = arith.cmpf oeq, %43, %44 : vector<1x8xf32>
    %cst_20 = arith.constant -1.000000e+09 : f32
    %cst_21 = arith.constant 0.000000e+00 : f32
    %46 = vector.broadcast %cst_20 : f32 to vector<1x8xf32>
    %47 = vector.broadcast %cst_21 : f32 to vector<1x8xf32>
    %48 = arith.select %45, %46, %47 : vector<1x8xi1>, vector<1x8xf32>
    %c0_22 = arith.constant 0 : index
    %c0_23 = arith.constant 0 : index
    %c0_24 = arith.constant 0 : index
    %49 = vector.load %arg21[%c0_22, %c0_23, %c0_24] : memref<4x8x8xbf16, #tpu.memory_space<vmem>>, vector<4x8x8xbf16>
    "tpu.trace_start"() <{level = 10 : i32, message = "hqd,hkd->hqk"}> : () -> ()
    %cst_25 = arith.constant dense<0.000000e+00> : vector<4x8x8xf32>
    %50 = tpu.matmul %41, %49, %cst_25 {dimension_numbers = #tpu.dot_dimension_numbers<[2], [2], [1], [1], [0, 0, 0, 1, 1, 1], [0], [0]>} : vector<4x8x8xbf16>, vector<4x8x8xbf16>, vector<4x8x8xf32> -> vector<4x8x8xf32>
    "tpu.trace_stop"() : () -> ()
    %51 = vector.shape_cast %48 : vector<1x8xf32> to vector<1x1x8xf32>
    %52 = vector.broadcast %51 : vector<1x1x8xf32> to vector<4x8x8xf32>
    %53 = arith.addf %50, %52 : vector<4x8x8xf32>
    %cst_26 = arith.constant dense<0xFF800000> : vector<4x8xf32>
    %54 = vector.multi_reduction <maximumf>, %53, %cst_26 [2] : vector<4x8x8xf32> to vector<4x8xf32>
    %55 = vector.shape_cast %54 : vector<4x8xf32> to vector<4x8x1xf32>
    %56 = vector.broadcast %55 : vector<4x8x1xf32> to vector<4x8x8xf32>
    %57 = arith.subf %53, %56 : vector<4x8x8xf32>
    %58 = math.exp %57 : vector<4x8x8xf32>
    %cst_27 = arith.constant dense<0.000000e+00> : vector<4x8xf32>
    %59 = vector.multi_reduction <add>, %58, %cst_27 [2] : vector<4x8x8xf32> to vector<4x8xf32>
    %60 = vector.shape_cast %59 : vector<4x8xf32> to vector<4x8x1xf32>
    %61 = tpu.reciprocal %60 {approx = true} : vector<4x8x1xf32> -> vector<4x8x1xf32>
    %62 = vector.broadcast %61 : vector<4x8x1xf32> to vector<4x8x8xf32>
    %63 = arith.mulf %58, %62 : vector<4x8x8xf32>
    %64 = arith.truncf %63 : vector<4x8x8xf32> to vector<4x8x8xbf16>
    %c0_28 = arith.constant 0 : index
    %c0_29 = arith.constant 0 : index
    %c0_30 = arith.constant 0 : index
    %65 = vector.load %arg22[%c0_28, %c0_29, %c0_30] : memref<4x8x8xbf16, #tpu.memory_space<vmem>>, vector<4x8x8xbf16>
    "tpu.trace_start"() <{level = 10 : i32, message = "hqk,hkd->hqd"}> : () -> ()
    %cst_31 = arith.constant dense<0.000000e+00> : vector<4x8x8xf32>
    %66 = tpu.matmul %64, %65, %cst_31 {dimension_numbers = #tpu.dot_dimension_numbers<[2], [1], [1], [2], [0, 0, 0, 1, 1, 2], [0], [0]>} : vector<4x8x8xbf16>, vector<4x8x8xbf16>, vector<4x8x8xf32> -> vector<4x8x8xf32>
    "tpu.trace_stop"() : () -> ()
    %67 = arith.truncf %66 : vector<4x8x8xf32> to vector<4x8x8xbf16>
    %68 = tpu.transpose %67, [1, 0, 2] : vector<4x8x8xbf16> -> vector<8x4x8xbf16>
    %69 = vector.shape_cast %68 : vector<8x4x8xbf16> to vector<8x32xbf16>
    %c0_32 = arith.constant 0 : index
    %c0_33 = arith.constant 0 : index
    %70 = vector.load %arg12[%c0_32, %c0_33] : memref<32x32xbf16, #tpu.memory_space<vmem>>, vector<32x32xbf16>
    %cst_34 = arith.constant dense<0.000000e+00> : vector<8x32xf32>
    %71 = tpu.matmul %69, %70, %cst_34 {dimension_numbers = #tpu.dot_dimension_numbers<[1], [0], [0], [1], [0, 0, 1, 1], [], []>} : vector<8x32xbf16>, vector<32x32xbf16>, vector<8x32xf32> -> vector<8x32xf32>
    %c0_35 = arith.constant 0 : index
    %c0_36 = arith.constant 0 : index
    %72 = vector.load %arg13[%c0_35, %c0_36] : memref<1x32xf32, #tpu.memory_space<vmem>>, vector<1x32xf32>
    %73 = vector.broadcast %72 : vector<1x32xf32> to vector<8x32xf32>
    %74 = arith.addf %71, %73 : vector<8x32xf32>
    %75 = arith.addf %7, %74 : vector<8x32xf32>
    %c0_37 = arith.constant 0 : index
    %c0_38 = arith.constant 0 : index
    %76 = vector.load %arg14[%c0_37, %c0_38] : memref<1x32xf32, #tpu.memory_space<vmem>>, vector<1x32xf32>
    %c0_39 = arith.constant 0 : index
    %c0_40 = arith.constant 0 : index
    %77 = vector.load %arg15[%c0_39, %c0_40] : memref<1x32xf32, #tpu.memory_space<vmem>>, vector<1x32xf32>
    %cst_41 = arith.constant dense<0.000000e+00> : vector<8xf32>
    %78 = vector.multi_reduction <add>, %75, %cst_41 [1] : vector<8x32xf32> to vector<8xf32>
    %79 = vector.shape_cast %78 : vector<8xf32> to vector<8x1xf32>
    %cst_42 = arith.constant 3.200000e+01 : f32
    %80 = vector.broadcast %cst_42 : f32 to vector<8x1xf32>
    %81 = arith.divf %79, %80 : vector<8x1xf32>
    %82 = vector.broadcast %81 : vector<8x1xf32> to vector<8x32xf32>
    %83 = arith.subf %75, %82 : vector<8x32xf32>
    %84 = arith.mulf %83, %83 : vector<8x32xf32>
    %cst_43 = arith.constant dense<0.000000e+00> : vector<8xf32>
    %85 = vector.multi_reduction <add>, %84, %cst_43 [1] : vector<8x32xf32> to vector<8xf32>
    %86 = vector.shape_cast %85 : vector<8xf32> to vector<8x1xf32>
    %cst_44 = arith.constant 0.0322580636 : f32
    %87 = vector.broadcast %cst_44 : f32 to vector<8x1xf32>
    %88 = arith.mulf %86, %87 : vector<8x1xf32>
    %89 = math.sqrt %88 : vector<8x1xf32>
    %90 = vector.broadcast %76 : vector<1x32xf32> to vector<8x32xf32>
    %91 = arith.mulf %90, %83 : vector<8x32xf32>
    %cst_45 = arith.constant 9.99999997E-7 : f32
    %92 = vector.broadcast %cst_45 : f32 to vector<8x1xf32>
    %93 = arith.addf %89, %92 : vector<8x1xf32>
    %94 = tpu.reciprocal %93 : vector<8x1xf32> -> vector<8x1xf32>
    %95 = vector.broadcast %94 : vector<8x1xf32> to vector<8x32xf32>
    %96 = arith.mulf %91, %95 : vector<8x32xf32>
    %97 = vector.broadcast %77 : vector<1x32xf32> to vector<8x32xf32>
    %98 = arith.addf %96, %97 : vector<8x32xf32>
    %99 = arith.truncf %98 : vector<8x32xf32> to vector<8x32xbf16>
    %c0_46 = arith.constant 0 : index
    %c0_47 = arith.constant 0 : index
    %100 = vector.load %arg16[%c0_46, %c0_47] : memref<32x64xbf16, #tpu.memory_space<vmem>>, vector<32x64xbf16>
    %cst_48 = arith.constant dense<0.000000e+00> : vector<8x64xf32>
    %101 = tpu.matmul %99, %100, %cst_48 {dimension_numbers = #tpu.dot_dimension_numbers<[1], [0], [0], [1], [0, 0, 1, 1], [], []>} : vector<8x32xbf16>, vector<32x64xbf16>, vector<8x64xf32> -> vector<8x64xf32>
    %c0_49 = arith.constant 0 : index
    %c0_50 = arith.constant 0 : index
    %102 = vector.load %arg17[%c0_49, %c0_50] : memref<1x64xf32, #tpu.memory_space<vmem>>, vector<1x64xf32>
    %103 = vector.broadcast %102 : vector<1x64xf32> to vector<8x64xf32>
    %104 = arith.addf %101, %103 : vector<8x64xf32>
    %cst_51 = arith.constant 0.000000e+00 : f32
    %105 = vector.broadcast %cst_51 : f32 to vector<8x64xf32>
    %106 = arith.maximumf %104, %105 : vector<8x64xf32>
    %107 = arith.truncf %106 : vector<8x64xf32> to vector<8x64xbf16>
    %c0_52 = arith.constant 0 : index
    %c0_53 = arith.constant 0 : index
    %108 = vector.load %arg18[%c0_52, %c0_53] : memref<64x32xbf16, #tpu.memory_space<vmem>>, vector<64x32xbf16>
    %cst_54 = arith.constant dense<0.000000e+00> : vector<8x32xf32>
    %109 = tpu.matmul %107, %108, %cst_54 {dimension_numbers = #tpu.dot_dimension_numbers<[1], [0], [0], [1], [0, 0, 1, 1], [], []>} : vector<8x64xbf16>, vector<64x32xbf16>, vector<8x32xf32> -> vector<8x32xf32>
    %110 = arith.addf %75, %109 : vector<8x32xf32>
    %c0_55 = arith.constant 0 : index
    %c0_56 = arith.constant 0 : index
    %111 = vector.load %arg19[%c0_55, %c0_56] : memref<1x32xf32, #tpu.memory_space<vmem>>, vector<1x32xf32>
    %112 = vector.broadcast %111 : vector<1x32xf32> to vector<8x32xf32>
    %113 = arith.addf %110, %112 : vector<8x32xf32>
    %c0_57 = arith.constant 0 : index
    %c0_58 = arith.constant 0 : index
    %c0_59 = arith.constant 0 : index
    %114 = vector.load %arg20[%c0_57, %c0_58, %c0_59] : memref<1x8x32xf32, #tpu.memory_space<vmem>>, vector<1x8x32xf32>
    %115 = vector.shape_cast %114 : vector<1x8x32xf32> to vector<8x32xf32>
    %116 = vector.shape_cast %113 : vector<8x32xf32> to vector<1x8x32xf32>
    tpu.vector_store %arg20[%c0_57, %c0_58, %c0_59], %116 {strides = array<i32>} : memref<1x8x32xf32, #tpu.memory_space<vmem>>, vector<1x8x32xf32>,
    return
  }
  func.func @transform_0(%arg0: i32, %arg1: i32) -> (i32, i32, i32) {
    %c0_i32 = arith.constant 0 : i32
    %c0_i32_0 = arith.constant 0 : i32
    %c0_i32_1 = arith.constant 0 : i32
    return %arg0, %c0_i32, %c0_i32_0 : i32, i32, i32
  }
  func.func @transform_1(%arg0: i32, %arg1: i32) -> (i32, i32, i32) {
    %c0_i32 = arith.constant 0 : i32
    %c0_i32_0 = arith.constant 0 : i32
    %c0_i32_1 = arith.constant 0 : i32
    return %arg0, %c0_i32, %c0_i32_0 : i32, i32, i32
  }
  func.func @transform_2(%arg0: i32, %arg1: i32) -> (i32, i32) {
    %c0_i32 = arith.constant 0 : i32
    %c0_i32_0 = arith.constant 0 : i32
    %c0_i32_1 = arith.constant 0 : i32
    return %c0_i32, %c0_i32_0 : i32, i32
  }
  func.func @transform_3(%arg0: i32, %arg1: i32) -> (i32, i32) {
    %c0_i32 = arith.constant 0 : i32
    %c0_i32_0 = arith.constant 0 : i32
    %c0_i32_1 = arith.constant 0 : i32
    return %c0_i32, %c0_i32_0 : i32, i32
  }
  func.func @transform_4(%arg0: i32, %arg1: i32) -> (i32, i32) {
    %c0_i32 = arith.constant 0 : i32
    %c0_i32_0 = arith.constant 0 : i32
    %c0_i32_1 = arith.constant 0 : i32
    return %c0_i32, %c0_i32_0 : i32, i32
  }
  func.func @transform_5(%arg0: i32, %arg1: i32) -> (i32, i32) {
    %c0_i32 = arith.constant 0 : i32
    %c0_i32_0 = arith.constant 0 : i32
    %c0_i32_1 = arith.constant 0 : i32
    return %c0_i32, %c0_i32_0 : i32, i32
  }
  func.func @transform_6(%arg0: i32, %arg1: i32) -> (i32, i32) {
    %c0_i32 = arith.constant 0 : i32
    %c0_i32_0 = arith.constant 0 : i32
    %c0_i32_1 = arith.constant 0 : i32
    return %c0_i32, %c0_i32_0 : i32, i32
  }
  func.func @transform_7(%arg0: i32, %arg1: i32) -> (i32, i32) {
    %c0_i32 = arith.constant 0 : i32
    %c0_i32_0 = arith.constant 0 : i32
    %c0_i32_1 = arith.constant 0 : i32
    return %c0_i32, %c0_i32_0 : i32, i32
  }
  func.func @transform_8(%arg0: i32, %arg1: i32) -> (i32, i32) {
    %c0_i32 = arith.constant 0 : i32
    %c0_i32_0 = arith.constant 0 : i32
    %c0_i32_1 = arith.constant 0 : i32
    return %c0_i32, %c0_i32_0 : i32, i32
  }
  func.func @transform_9(%arg0: i32, %arg1: i32) -> (i32, i32) {
    %c0_i32 = arith.constant 0 : i32
    %c0_i32_0 = arith.constant 0 : i32
    %c0_i32_1 = arith.constant 0 : i32
    return %c0_i32, %c0_i32_0 : i32, i32
  }
  func.func @transform_10(%arg0: i32, %arg1: i32) -> (i32, i32) {
    %c0_i32 = arith.constant 0 : i32
    %c0_i32_0 = arith.constant 0 : i32
    %c0_i32_1 = arith.constant 0 : i32
    return %c0_i32, %c0_i32_0 : i32, i32
  }
  func.func @transform_11(%arg0: i32, %arg1: i32) -> (i32, i32) {
    %c0_i32 = arith.constant 0 : i32
    %c0_i32_0 = arith.constant 0 : i32
    %c0_i32_1 = arith.constant 0 : i32
    return %c0_i32, %c0_i32_0 : i32, i32
  }
  func.func @transform_12(%arg0: i32, %arg1: i32) -> (i32, i32) {
    %c0_i32 = arith.constant 0 : i32
    %c0_i32_0 = arith.constant 0 : i32
    %c0_i32_1 = arith.constant 0 : i32
    return %c0_i32, %c0_i32_0 : i32, i32
  }
  func.func @transform_13(%arg0: i32, %arg1: i32) -> (i32, i32) {
    %c0_i32 = arith.constant 0 : i32
    %c0_i32_0 = arith.constant 0 : i32
    %c0_i32_1 = arith.constant 0 : i32
    return %c0_i32, %c0_i32_0 : i32, i32
  }
  func.func @transform_14(%arg0: i32, %arg1: i32) -> (i32, i32) {
    %c0_i32 = arith.constant 0 : i32
    %c0_i32_0 = arith.constant 0 : i32
    %c0_i32_1 = arith.constant 0 : i32
    return %c0_i32, %c0_i32_0 : i32, i32
  }
  func.func @transform_15(%arg0: i32, %arg1: i32) -> (i32, i32) {
    %c0_i32 = arith.constant 0 : i32
    %c0_i32_0 = arith.constant 0 : i32
    %c0_i32_1 = arith.constant 0 : i32
    return %c0_i32, %c0_i32_0 : i32, i32
  }
  func.func @transform_16(%arg0: i32, %arg1: i32) -> (i32, i32) {
    %c0_i32 = arith.constant 0 : i32
    %c0_i32_0 = arith.constant 0 : i32
    %c0_i32_1 = arith.constant 0 : i32
    return %c0_i32, %c0_i32_0 : i32, i32
  }
  func.func @transform_17(%arg0: i32, %arg1: i32) -> (i32, i32) {
    %c0_i32 = arith.constant 0 : i32
    %c0_i32_0 = arith.constant 0 : i32
    %c0_i32_1 = arith.constant 0 : i32
    return %c0_i32, %c0_i32_0 : i32, i32
  }
  func.func @transform_18(%arg0: i32, %arg1: i32) -> (i32, i32, i32) {
    %c0_i32 = arith.constant 0 : i32
    %c0_i32_0 = arith.constant 0 : i32
    return %arg0, %arg1, %c0_i32 : i32, i32, i32
  }
}

module attributes {stable_mosaic.version = 11 : i64} {
  func.func @encoder_layer_kernel(%arg0: i32, %arg1: i32, %arg2: memref<1x8x32xf32, #tpu.memory_space<vmem>>, %arg3: memref<1x1x8xf32, #tpu.memory_space<vmem>>, %arg4: memref<1x32xf32, #tpu.memory_space<vmem>>, %arg5: memref<1x32xf32, #tpu.memory_space<vmem>>, %arg6: memref<32x32xbf16, #tpu.memory_space<vmem>>, %arg7: memref<1x32xf32, #tpu.memory_space<vmem>>, %arg8: memref<32x32xbf16, #tpu.memory_space<vmem>>, %arg9: memref<1x32xf32, #tpu.memory_space<vmem>>, %arg10: memref<32x32xbf16, #tpu.memory_space<vmem>>, %arg11: memref<1x32xf32, #tpu.memory_space<vmem>>, %arg12: memref<32x32xbf16, #tpu.memory_space<vmem>>, %arg13: memref<1x32xf32, #tpu.memory_space<vmem>>, %arg14: memref<1x32xf32, #tpu.memory_space<vmem>>, %arg15: memref<1x32xf32, #tpu.memory_space<vmem>>, %arg16: memref<32x64xbf16, #tpu.memory_space<vmem>>, %arg17: memref<1x64xf32, #tpu.memory_space<vmem>>, %arg18: memref<64x32xbf16, #tpu.memory_space<vmem>>, %arg19: memref<1x32xf32, #tpu.memory_space<vmem>>, %arg20: memref<1x8x32xf32, #tpu.memory_space<vmem>>, %arg21: memref<4x8x8xbf16, #tpu.memory_space<vmem>>, %arg22: memref<4x8x8xbf16, #tpu.memory_space<vmem>>) attributes {dimension_semantics = [#tpu.dimension_semantics<parallel>, #tpu.dimension_semantics<arbitrary>], iteration_bounds = array<i64: 2, 1>, scalar_prefetch = 0 : i64, scratch_operands = 2 : i64, tpu.core_type = #tpu.core_type<tc>, window_params = [{transform_indices = @transform_0, window_bounds = array<i64: 1, 8, 32>}, {transform_indices = @transform_1, window_bounds = array<i64: 1, 1, 8>}, {pipeline_mode = #tpu.pipeline_mode<synchronous>, transform_indices = @transform_2, window_bounds = array<i64: 1, 32>}, {pipeline_mode = #tpu.pipeline_mode<synchronous>, transform_indices = @transform_3, window_bounds = array<i64: 1, 32>}, {pipeline_mode = #tpu.pipeline_mode<synchronous>, transform_indices = @transform_4, window_bounds = array<i64: 32, 32>}, {pipeline_mode = #tpu.pipeline_mode<synchronous>, transform_indices = @transform_5, window_bounds = array<i64: 1, 32>}, {pipeline_mode = #tpu.pipeline_mode<synchronous>, transform_indices = @transform_6, window_bounds = array<i64: 32, 32>}, {pipeline_mode = #tpu.pipeline_mode<synchronous>, transform_indices = @transform_7, window_bounds = array<i64: 1, 32>}, {pipeline_mode = #tpu.pipeline_mode<synchronous>, transform_indices = @transform_8, window_bounds = array<i64: 32, 32>}, {pipeline_mode = #tpu.pipeline_mode<synchronous>, transform_indices = @transform_9, window_bounds = array<i64: 1, 32>}, {pipeline_mode = #tpu.pipeline_mode<synchronous>, transform_indices = @transform_10, window_bounds = array<i64: 32, 32>}, {pipeline_mode = #tpu.pipeline_mode<synchronous>, transform_indices = @transform_11, window_bounds = array<i64: 1, 32>}, {pipeline_mode = #tpu.pipeline_mode<synchronous>, transform_indices = @transform_12, window_bounds = array<i64: 1, 32>}, {pipeline_mode = #tpu.pipeline_mode<synchronous>, transform_indices = @transform_13, window_bounds = array<i64: 1, 32>}, {pipeline_mode = #tpu.pipeline_mode<synchronous>, transform_indices = @transform_14, window_bounds = array<i64: 32, 64>}, {pipeline_mode = #tpu.pipeline_mode<synchronous>, transform_indices = @transform_15, window_bounds = array<i64: 1, 64>}, {pipeline_mode = #tpu.pipeline_mode<synchronous>, transform_indices = @transform_16, window_bounds = array<i64: 64, 32>}, {pipeline_mode = #tpu.pipeline_mode<synchronous>, transform_indices = @transform_17, window_bounds = array<i64: 1, 32>}, {transform_indices = @transform_18, window_bounds = array<i64: 1, 8, 32>}]} {
    %c0_i32 = arith.constant 0 : i32
    %0 = arith.cmpi eq, %arg1, %c0_i32 : i32
    %1 = arith.extui %0 : i1 to i32
    %c0_i32_0 = arith.constant 0 : i32
    %2 = arith.cmpi ne, %1, %c0_i32_0 : i32
    scf.if %2 {
      %c0_60 = arith.constant 0 : index
      %c0_61 = arith.constant 0 : index
      %c0_62 = arith.constant 0 : index
      %117 = vector.load %arg2[%c0_60, %c0_61, %c0_62] : memref<1x8x32xf32, #tpu.memory_space<vmem>>, vector<1x8x32xf32>
      %118 = vector.shape_cast %117 : vector<1x8x32xf32> to vector<8x32xf32>
      %c0_63 = arith.constant 0 : index
      %c0_64 = arith.constant 0 : index
      %119 = vector.load %arg4[%c0_63, %c0_64] : memref<1x32xf32, #tpu.memory_space<vmem>>, vector<1x32xf32>
      %c0_65 = arith.constant 0 : index
      %c0_66 = arith.constant 0 : index
      %120 = vector.load %arg5[%c0_65, %c0_66] : memref<1x32xf32, #tpu.memory_space<vmem>>, vector<1x32xf32>
      %cst_67 = arith.constant dense<0.000000e+00> : vector<8xf32>
      %121 = vector.multi_reduction <add>, %118, %cst_67 [1] : vector<8x32xf32> to vector<8xf32>
      %122 = vector.shape_cast %121 : vector<8xf32> to vector<8x1xf32>
      %cst_68 = arith.constant 3.200000e+01 : f32
      %123 = vector.broadcast %cst_68 : f32 to vector<8x1xf32>
      %124 = arith.divf %122, %123 : vector<8x1xf32>
      %125 = vector.broadcast %124 : vector<8x1xf32> to vector<8x32xf32>
      %126 = arith.subf %118, %125 : vector<8x32xf32>
      %127 = arith.mulf %126, %126 : vector<8x32xf32>
      %cst_69 = arith.constant dense<0.000000e+00> : vector<8xf32>
      %128 = vector.multi_reduction <add>, %127, %cst_69 [1] : vector<8x32xf32> to vector<8xf32>
      %129 = vector.shape_cast %128 : vector<8xf32> to vector<8x1xf32>
      %cst_70 = arith.constant 0.0322580636 : f32
      %130 = vector.broadcast %cst_70 : f32 to vector<8x1xf32>
      %131 = arith.mulf %129, %130 : vector<8x1xf32>
      %132 = math.sqrt %131 : vector<8x1xf32>
      %133 = vector.broadcast %119 : vector<1x32xf32> to vector<8x32xf32>
      %134 = arith.mulf %133, %126 : vector<8x32xf32>
      %cst_71 = arith.constant 9.99999997E-7 : f32
      %135 = vector.broadcast %cst_71 : f32 to vector<8x1xf32>
      %136 = arith.addf %132, %135 : vector<8x1xf32>
      %137 = tpu.reciprocal %136 : vector<8x1xf32> -> vector<8x1xf32>
      %138 = vector.broadcast %137 : vector<8x1xf32> to vector<8x32xf32>
      %139 = arith.mulf %134, %138 : vector<8x32xf32>
      %140 = vector.broadcast %120 : vector<1x32xf32> to vector<8x32xf32>
      %141 = arith.addf %139, %140 : vector<8x32xf32>
      %142 = arith.truncf %141 : vector<8x32xf32> to vector<8x32xbf16>
      %c0_72 = arith.constant 0 : index
      %c0_73 = arith.constant 0 : index
      %143 = vector.load %arg8[%c0_72, %c0_73] : memref<32x32xbf16, #tpu.memory_space<vmem>>, vector<32x32xbf16>
      %cst_74 = arith.constant dense<0.000000e+00> : vector<8x32xf32>
      %144 = tpu.matmul %142, %143, %cst_74 {dimension_numbers = #tpu.dot_dimension_numbers<[1], [0], [0], [1], [0, 0, 1, 1], [], []>} : vector<8x32xbf16>, vector<32x32xbf16>, vector<8x32xf32> -> vector<8x32xf32>
      %c0_75 = arith.constant 0 : index
      %c0_76 = arith.constant 0 : index
      %145 = vector.load %arg9[%c0_75, %c0_76] : memref<1x32xf32, #tpu.memory_space<vmem>>, vector<1x32xf32>
      %146 = vector.broadcast %145 : vector<1x32xf32> to vector<8x32xf32>
      %147 = arith.addf %144, %146 : vector<8x32xf32>
      %c0_77 = arith.constant 0 : index
      %c0_78 = arith.constant 0 : index
      %148 = vector.load %arg10[%c0_77, %c0_78] : memref<32x32xbf16, #tpu.memory_space<vmem>>, vector<32x32xbf16>
      %cst_79 = arith.constant dense<0.000000e+00> : vector<8x32xf32>
      %149 = tpu.matmul %142, %148, %cst_79 {dimension_numbers = #tpu.dot_dimension_numbers<[1], [0], [0], [1], [0, 0, 1, 1], [], []>} : vector<8x32xbf16>, vector<32x32xbf16>, vector<8x32xf32> -> vector<8x32xf32>
      %c0_80 = arith.constant 0 : index
      %c0_81 = arith.constant 0 : index
      %150 = vector.load %arg11[%c0_80, %c0_81] : memref<1x32xf32, #tpu.memory_space<vmem>>, vector<1x32xf32>
      %151 = vector.broadcast %150 : vector<1x32xf32> to vector<8x32xf32>
      %152 = arith.addf %149, %151 : vector<8x32xf32>
      %153 = vector.shape_cast %147 : vector<8x32xf32> to vector<8x4x8xf32>
      %154 = tpu.transpose %153, [1, 0, 2] : vector<8x4x8xf32> -> vector<4x8x8xf32>
      %155 = arith.truncf %154 : vector<4x8x8xf32> to vector<4x8x8xbf16>
      %c0_82 = arith.constant 0 : index
      %c0_83 = arith.constant 0 : index
      %c0_84 = arith.constant 0 : index
      %156 = vector.load %arg21[%c0_82, %c0_83, %c0_84] : memref<4x8x8xbf16, #tpu.memory_space<vmem>>, vector<4x8x8xbf16>
      tpu.vector_store %arg21[%c0_82, %c0_83, %c0_84], %155 {strides = array<i32>} : memref<4x8x8xbf16, #tpu.memory_space<vmem>>, vector<4x8x8xbf16>,
      %157 = vector.shape_cast %152 : vector<8x32xf32> to vector<8x4x8xf32>
      %158 = tpu.transpose %157, [1, 0, 2] : vector<8x4x8xf32> -> vector<4x8x8xf32>
      %159 = arith.truncf %158 : vector<4x8x8xf32> to vector<4x8x8xbf16>
      %c0_85 = arith.constant 0 : index
      %c0_86 = arith.constant 0 : index
      %c0_87 = arith.constant 0 : index
      %160 = vector.load %arg22[%c0_85, %c0_86, %c0_87] : memref<4x8x8xbf16, #tpu.memory_space<vmem>>, vector<4x8x8xbf16>
      tpu.vector_store %arg22[%c0_85, %c0_86, %c0_87], %159 {strides = array<i32>} : memref<4x8x8xbf16, #tpu.memory_space<vmem>>, vector<4x8x8xbf16>,
    } else {
    }
    %c8_i32 = arith.constant 8 : i32
    %3 = arith.muli %arg1, %c8_i32 : i32
    %4 = tpu.assume_multiple %3, 8 : i32
    %c0 = arith.constant 0 : index
    %5 = arith.index_cast %4 : i32 to index
    %c0_1 = arith.constant 0 : index
    %6 = vector.load %arg2[%c0, %5, %c0_1] : memref<1x8x32xf32, #tpu.memory_space<vmem>>, vector<1x8x32xf32>
    %7 = vector.shape_cast %6 : vector<1x8x32xf32> to vector<8x32xf32>
    %c0_2 = arith.constant 0 : index
    %c0_3 = arith.constant 0 : index
    %8 = vector.load %arg4[%c0_2, %c0_3] : memref<1x32xf32, #tpu.memory_space<vmem>>, vector<1x32xf32>
    %c0_4 = arith.constant 0 : index
    %c0_5 = arith.constant 0 : index
    %9 = vector.load %arg5[%c0_4, %c0_5] : memref<1x32xf32, #tpu.memory_space<vmem>>, vector<1x32xf32>
    %cst = arith.constant dense<0.000000e+00> : vector<8xf32>
    %10 = vector.multi_reduction <add>, %7, %cst [1] : vector<8x32xf32> to vector<8xf32>
    %11 = vector.shape_cast %10 : vector<8xf32> to vector<8x1xf32>
    %cst_6 = arith.constant 3.200000e+01 : f32
    %12 = vector.broadcast %cst_6 : f32 to vector<8x1xf32>
    %13 = arith.divf %11, %12 : vector<8x1xf32>
    %14 = vector.broadcast %13 : vector<8x1xf32> to vector<8x32xf32>
    %15 = arith.subf %7, %14 : vector<8x32xf32>
    %16 = arith.mulf %15, %15 : vector<8x32xf32>
    %cst_7 = arith.constant dense<0.000000e+00> : vector<8xf32>
    %17 = vector.multi_reduction <add>, %16, %cst_7 [1] : vector<8x32xf32> to vector<8xf32>
    %18 = vector.shape_cast %17 : vector<8xf32> to vector<8x1xf32>
    %cst_8 = arith.constant 0.0322580636 : f32
    %19 = vector.broadcast %cst_8 : f32 to vector<8x1xf32>
    %20 = arith.mulf %18, %19 : vector<8x1xf32>
    %21 = math.sqrt %20 : vector<8x1xf32>
    %22 = vector.broadcast %8 : vector<1x32xf32> to vector<8x32xf32>
    %23 = arith.mulf %22, %15 : vector<8x32xf32>
    %cst_9 = arith.constant 9.99999997E-7 : f32
    %24 = vector.broadcast %cst_9 : f32 to vector<8x1xf32>
    %25 = arith.addf %21, %24 : vector<8x1xf32>
    %26 = tpu.reciprocal %25 : vector<8x1xf32> -> vector<8x1xf32>
    %27 = vector.broadcast %26 : vector<8x1xf32> to vector<8x32xf32>
    %28 = arith.mulf %23, %27 : vector<8x32xf32>
    %29 = vector.broadcast %9 : vector<1x32xf32> to vector<8x32xf32>
    %30 = arith.addf %28, %29 : vector<8x32xf32>
    %31 = arith.truncf %30 : vector<8x32xf32> to vector<8x32xbf16>
    %c0_10 = arith.constant 0 : index
    %c0_11 = arith.constant 0 : index
    %32 = vector.load %arg6[%c0_10, %c0_11] : memref<32x32xbf16, #tpu.memory_space<vmem>>, vector<32x32xbf16>
    %cst_12 = arith.constant dense<0.000000e+00> : vector<8x32xf32>
    %33 = tpu.matmul %31, %32, %cst_12 {dimension_numbers = #tpu.dot_dimension_numbers<[1], [0], [0], [1], [0, 0, 1, 1], [], []>} : vector<8x32xbf16>, vector<32x32xbf16>, vector<8x32xf32> -> vector<8x32xf32>
    %c0_13 = arith.constant 0 : index
    %c0_14 = arith.constant 0 : index
    %34 = vector.load %arg7[%c0_13, %c0_14] : memref<1x32xf32, #tpu.memory_space<vmem>>, vector<1x32xf32>
    %35 = vector.broadcast %34 : vector<1x32xf32> to vector<8x32xf32>
    %36 = arith.addf %33, %35 : vector<8x32xf32>
    %cst_15 = arith.constant 0.353553385 : f32
    %37 = vector.broadcast %cst_15 : f32 to vector<8x32xf32>
    %38 = arith.mulf %36, %37 : vector<8x32xf32>
    %39 = vector.shape_cast %38 : vector<8x32xf32> to vector<8x4x8xf32>
    %40 = tpu.transpose %39, [1, 0, 2] : vector<8x4x8xf32> -> vector<4x8x8xf32>
    %41 = arith.truncf %40 : vector<4x8x8xf32> to vector<4x8x8xbf16>
    %c0_16 = arith.constant 0 : index
    %c0_17 = arith.constant 0 : index
    %c0_18 = arith.constant 0 : index
    %42 = vector.load %arg3[%c0_16, %c0_17, %c0_18] : memref<1x1x8xf32, #tpu.memory_space<vmem>>, vector<1x1x8xf32>
    %43 = vector.shape_cast %42 : vector<1x1x8xf32> to vector<1x8xf32>
    %cst_19 = arith.constant 0.000000e+00 : f32
    %44 = vector.broadcast %cst_19 : f32 to vector<1x8xf32>
    %45 = arith.cmpf oeq, %43, %44 : vector<1x8xf32>
    %cst_20 = arith.constant -1.000000e+09 : f32
    %cst_21 = arith.constant 0.000000e+00 : f32
    %46 = vector.broadcast %cst_20 : f32 to vector<1x8xf32>
    %47 = vector.broadcast %cst_21 : f32 to vector<1x8xf32>
    %48 = arith.select %45, %46, %47 : vector<1x8xi1>, vector<1x8xf32>
    %c0_22 = arith.constant 0 : index
    %c0_23 = arith.constant 0 : index
    %c0_24 = arith.constant 0 : index
    %49 = vector.load %arg21[%c0_22, %c0_23, %c0_24] : memref<4x8x8xbf16, #tpu.memory_space<vmem>>, vector<4x8x8xbf16>
    "tpu.trace_start"() <{level = 10 : i32, message = "hqd,hkd->hqk"}> : () -> ()
    %cst_25 = arith.constant dense<0.000000e+00> : vector<4x8x8xf32>
    %50 = tpu.matmul %41, %49, %cst_25 {dimension_numbers = #tpu.dot_dimension_numbers<[2], [2], [1], [1], [0, 0, 0, 1, 1, 1], [0], [0]>} : vector<4x8x8xbf16>, vector<4x8x8xbf16>, vector<4x8x8xf32> -> vector<4x8x8xf32>
    "tpu.trace_stop"() : () -> ()
    %51 = vector.shape_cast %48 : vector<1x8xf32> to vector<1x1x8xf32>
    %52 = vector.broadcast %51 : vector<1x1x8xf32> to vector<4x8x8xf32>
    %53 = arith.addf %50, %52 : vector<4x8x8xf32>
    %cst_26 = arith.constant dense<0xFF800000> : vector<4x8xf32>
    %54 = vector.multi_reduction <maximumf>, %53, %cst_26 [2] : vector<4x8x8xf32> to vector<4x8xf32>
    %55 = vector.shape_cast %54 : vector<4x8xf32> to vector<4x8x1xf32>
    %56 = vector.broadcast %55 : vector<4x8x1xf32> to vector<4x8x8xf32>
    %57 = arith.subf %53, %56 : vector<4x8x8xf32>
    %58 = math.exp %57 : vector<4x8x8xf32>
    %cst_27 = arith.constant dense<0.000000e+00> : vector<4x8xf32>
    %59 = vector.multi_reduction <add>, %58, %cst_27 [2] : vector<4x8x8xf32> to vector<4x8xf32>
    %60 = vector.shape_cast %59 : vector<4x8xf32> to vector<4x8x1xf32>
    %61 = tpu.reciprocal %60 {approx = true} : vector<4x8x1xf32> -> vector<4x8x1xf32>
    %62 = vector.broadcast %61 : vector<4x8x1xf32> to vector<4x8x8xf32>
    %63 = arith.mulf %58, %62 : vector<4x8x8xf32>
    %64 = arith.truncf %63 : vector<4x8x8xf32> to vector<4x8x8xbf16>
    %c0_28 = arith.constant 0 : index
    %c0_29 = arith.constant 0 : index
    %c0_30 = arith.constant 0 : index
    %65 = vector.load %arg22[%c0_28, %c0_29, %c0_30] : memref<4x8x8xbf16, #tpu.memory_space<vmem>>, vector<4x8x8xbf16>
    "tpu.trace_start"() <{level = 10 : i32, message = "hqk,hkd->hqd"}> : () -> ()
    %cst_31 = arith.constant dense<0.000000e+00> : vector<4x8x8xf32>
    %66 = tpu.matmul %64, %65, %cst_31 {dimension_numbers = #tpu.dot_dimension_numbers<[2], [1], [1], [2], [0, 0, 0, 1, 1, 2], [0], [0]>} : vector<4x8x8xbf16>, vector<4x8x8xbf16>, vector<4x8x8xf32> -> vector<4x8x8xf32>
    "tpu.trace_stop"() : () -> ()
    %67 = arith.truncf %66 : vector<4x8x8xf32> to vector<4x8x8xbf16>
    %68 = tpu.transpose %67, [1, 0, 2] : vector<4x8x8xbf16> -> vector<8x4x8xbf16>
    %69 = vector.shape_cast %68 : vector<8x4x8xbf16> to vector<8x32xbf16>
    %c0_32 = arith.constant 0 : index
    %c0_33 = arith.constant 0 : index
    %70 = vector.load %arg12[%c0_32, %c0_33] : memref<32x32xbf16, #tpu.memory_space<vmem>>, vector<32x32xbf16>
    %cst_34 = arith.constant dense<0.000000e+00> : vector<8x32xf32>
    %71 = tpu.matmul %69, %70, %cst_34 {dimension_numbers = #tpu.dot_dimension_numbers<[1], [0], [0], [1], [0, 0, 1, 1], [], []>} : vector<8x32xbf16>, vector<32x32xbf16>, vector<8x32xf32> -> vector<8x32xf32>
    %c0_35 = arith.constant 0 : index
    %c0_36 = arith.constant 0 : index
    %72 = vector.load %arg13[%c0_35, %c0_36] : memref<1x32xf32, #tpu.memory_space<vmem>>, vector<1x32xf32>
    %73 = vector.broadcast %72 : vector<1x32xf32> to vector<8x32xf32>
    %74 = arith.addf %71, %73 : vector<8x32xf32>
    %75 = arith.addf %7, %74 : vector<8x32xf32>
    %c0_37 = arith.constant 0 : index
    %c0_38 = arith.constant 0 : index
    %76 = vector.load %arg14[%c0_37, %c0_38] : memref<1x32xf32, #tpu.memory_space<vmem>>, vector<1x32xf32>
    %c0_39 = arith.constant 0 : index
    %c0_40 = arith.constant 0 : index
    %77 = vector.load %arg15[%c0_39, %c0_40] : memref<1x32xf32, #tpu.memory_space<vmem>>, vector<1x32xf32>
    %cst_41 = arith.constant dense<0.000000e+00> : vector<8xf32>
    %78 = vector.multi_reduction <add>, %75, %cst_41 [1] : vector<8x32xf32> to vector<8xf32>
    %79 = vector.shape_cast %78 : vector<8xf32> to vector<8x1xf32>
    %cst_42 = arith.constant 3.200000e+01 : f32
    %80 = vector.broadcast %cst_42 : f32 to vector<8x1xf32>
    %81 = arith.divf %79, %80 : vector<8x1xf32>
    %82 = vector.broadcast %81 : vector<8x1xf32> to vector<8x32xf32>
    %83 = arith.subf %75, %82 : vector<8x32xf32>
    %84 = arith.mulf %83, %83 : vector<8x32xf32>
    %cst_43 = arith.constant dense<0.000000e+00> : vector<8xf32>
    %85 = vector.multi_reduction <add>, %84, %cst_43 [1] : vector<8x32xf32> to vector<8xf32>
    %86 = vector.shape_cast %85 : vector<8xf32> to vector<8x1xf32>
    %cst_44 = arith.constant 0.0322580636 : f32
    %87 = vector.broadcast %cst_44 : f32 to vector<8x1xf32>
    %88 = arith.mulf %86, %87 : vector<8x1xf32>
    %89 = math.sqrt %88 : vector<8x1xf32>
    %90 = vector.broadcast %76 : vector<1x32xf32> to vector<8x32xf32>
    %91 = arith.mulf %90, %83 : vector<8x32xf32>
    %cst_45 = arith.constant 9.99999997E-7 : f32
    %92 = vector.broadcast %cst_45 : f32 to vector<8x1xf32>
    %93 = arith.addf %89, %92 : vector<8x1xf32>
    %94 = tpu.reciprocal %93 : vector<8x1xf32> -> vector<8x1xf32>
    %95 = vector.broadcast %94 : vector<8x1xf32> to vector<8x32xf32>
    %96 = arith.mulf %91, %95 : vector<8x32xf32>
    %97 = vector.broadcast %77 : vector<1x32xf32> to vector<8x32xf32>
    %98 = arith.addf %96, %97 : vector<8x32xf32>
    %99 = arith.truncf %98 : vector<8x32xf32> to vector<8x32xbf16>
    %c0_46 = arith.constant 0 : index
    %c0_47 = arith.constant 0 : index
    %100 = vector.load %arg16[%c0_46, %c0_47] : memref<32x64xbf16, #tpu.memory_space<vmem>>, vector<32x64xbf16>
    %cst_48 = arith.constant dense<0.000000e+00> : vector<8x64xf32>
    %101 = tpu.matmul %99, %100, %cst_48 {dimension_numbers = #tpu.dot_dimension_numbers<[1], [0], [0], [1], [0, 0, 1, 1], [], []>} : vector<8x32xbf16>, vector<32x64xbf16>, vector<8x64xf32> -> vector<8x64xf32>
    %c0_49 = arith.constant 0 : index
    %c0_50 = arith.constant 0 : index
    %102 = vector.load %arg17[%c0_49, %c0_50] : memref<1x64xf32, #tpu.memory_space<vmem>>, vector<1x64xf32>
    %103 = vector.broadcast %102 : vector<1x64xf32> to vector<8x64xf32>
    %104 = arith.addf %101, %103 : vector<8x64xf32>
    %cst_51 = arith.constant 0.000000e+00 : f32
    %105 = vector.broadcast %cst_51 : f32 to vector<8x64xf32>
    %106 = arith.maximumf %104, %105 : vector<8x64xf32>
    %107 = arith.truncf %106 : vector<8x64xf32> to vector<8x64xbf16>
    %c0_52 = arith.constant 0 : index
    %c0_53 = arith.constant 0 : index
    %108 = vector.load %arg18[%c0_52, %c0_53] : memref<64x32xbf16, #tpu.memory_space<vmem>>, vector<64x32xbf16>
    %cst_54 = arith.constant dense<0.000000e+00> : vector<8x32xf32>
    %109 = tpu.matmul %107, %108, %cst_54 {dimension_numbers = #tpu.dot_dimension_numbers<[1], [0], [0], [1], [0, 0, 1, 1], [], []>} : vector<8x64xbf16>, vector<64x32xbf16>, vector<8x32xf32> -> vector<8x32xf32>
    %110 = arith.addf %75, %109 : vector<8x32xf32>
    %c0_55 = arith.constant 0 : index
    %c0_56 = arith.constant 0 : index
    %111 = vector.load %arg19[%c0_55, %c0_56] : memref<1x32xf32, #tpu.memory_space<vmem>>, vector<1x32xf32>
    %112 = vector.broadcast %111 : vector<1x32xf32> to vector<8x32xf32>
    %113 = arith.addf %110, %112 : vector<8x32xf32>
    %c0_57 = arith.constant 0 : index
    %c0_58 = arith.constant 0 : index
    %c0_59 = arith.constant 0 : index
    %114 = vector.load %arg20[%c0_57, %c0_58, %c0_59] : memref<1x8x32xf32, #tpu.memory_space<vmem>>, vector<1x8x32xf32>
    %115 = vector.shape_cast %114 : vector<1x8x32xf32> to vector<8x32xf32>
    %116 = vector.shape_cast %113 : vector<8x32xf32> to vector<1x8x32xf32>
    tpu.vector_store %arg20[%c0_57, %c0_58, %c0_59], %116 {strides = array<i32>} : memref<1x8x32xf32, #tpu.memory_space<vmem>>, vector<1x8x32xf32>,
    return
  }
  func.func @transform_0(%arg0: i32, %arg1: i32) -> (i32, i32, i32) {
    %c0_i32 = arith.constant 0 : i32
    %c0_i32_0 = arith.constant 0 : i32
    %c0_i32_1 = arith.constant 0 : i32
    return %arg0, %c0_i32, %c0_i32_0 : i32, i32, i32
  }
  func.func @transform_1(%arg0: i32, %arg1: i32) -> (i32, i32, i32) {
    %c0_i32 = arith.constant 0 : i32
    %c0_i32_0 = arith.constant 0 : i32
    %c0_i32_1 = arith.constant 0 : i32
    return %arg0, %c0_i32, %c0_i32_0 : i32, i32, i32
  }
  func.func @transform_2(%arg0: i32, %arg1: i32) -> (i32, i32) {
    %c0_i32 = arith.constant 0 : i32
    %c0_i32_0 = arith.constant 0 : i32
    %c0_i32_1 = arith.constant 0 : i32
    return %c0_i32, %c0_i32_0 : i32, i32
  }
  func.func @transform_3(%arg0: i32, %arg1: i32) -> (i32, i32) {
    %c0_i32 = arith.constant 0 : i32
    %c0_i32_0 = arith.constant 0 : i32
    %c0_i32_1 = arith.constant 0 : i32
    return %c0_i32, %c0_i32_0 : i32, i32
  }
  func.func @transform_4(%arg0: i32, %arg1: i32) -> (i32, i32) {
    %c0_i32 = arith.constant 0 : i32
    %c0_i32_0 = arith.constant 0 : i32
    %c0_i32_1 = arith.constant 0 : i32
    return %c0_i32, %c0_i32_0 : i32, i32
  }
  func.func @transform_5(%arg0: i32, %arg1: i32) -> (i32, i32) {
    %c0_i32 = arith.constant 0 : i32
    %c0_i32_0 = arith.constant 0 : i32
    %c0_i32_1 = arith.constant 0 : i32
    return %c0_i32, %c0_i32_0 : i32, i32
  }
  func.func @transform_6(%arg0: i32, %arg1: i32) -> (i32, i32) {
    %c0_i32 = arith.constant 0 : i32
    %c0_i32_0 = arith.constant 0 : i32
    %c0_i32_1 = arith.constant 0 : i32
    return %c0_i32, %c0_i32_0 : i32, i32
  }
  func.func @transform_7(%arg0: i32, %arg1: i32) -> (i32, i32) {
    %c0_i32 = arith.constant 0 : i32
    %c0_i32_0 = arith.constant 0 : i32
    %c0_i32_1 = arith.constant 0 : i32
    return %c0_i32, %c0_i32_0 : i32, i32
  }
  func.func @transform_8(%arg0: i32, %arg1: i32) -> (i32, i32) {
    %c0_i32 = arith.constant 0 : i32
    %c0_i32_0 = arith.constant 0 : i32
    %c0_i32_1 = arith.constant 0 : i32
    return %c0_i32, %c0_i32_0 : i32, i32
  }
  func.func @transform_9(%arg0: i32, %arg1: i32) -> (i32, i32) {
    %c0_i32 = arith.constant 0 : i32
    %c0_i32_0 = arith.constant 0 : i32
    %c0_i32_1 = arith.constant 0 : i32
    return %c0_i32, %c0_i32_0 : i32, i32
  }
  func.func @transform_10(%arg0: i32, %arg1: i32) -> (i32, i32) {
    %c0_i32 = arith.constant 0 : i32
    %c0_i32_0 = arith.constant 0 : i32
    %c0_i32_1 = arith.constant 0 : i32
    return %c0_i32, %c0_i32_0 : i32, i32
  }
  func.func @transform_11(%arg0: i32, %arg1: i32) -> (i32, i32) {
    %c0_i32 = arith.constant 0 : i32
    %c0_i32_0 = arith.constant 0 : i32
    %c0_i32_1 = arith.constant 0 : i32
    return %c0_i32, %c0_i32_0 : i32, i32
  }
  func.func @transform_12(%arg0: i32, %arg1: i32) -> (i32, i32) {
    %c0_i32 = arith.constant 0 : i32
    %c0_i32_0 = arith.constant 0 : i32
    %c0_i32_1 = arith.constant 0 : i32
    return %c0_i32, %c0_i32_0 : i32, i32
  }
  func.func @transform_13(%arg0: i32, %arg1: i32) -> (i32, i32) {
    %c0_i32 = arith.constant 0 : i32
    %c0_i32_0 = arith.constant 0 : i32
    %c0_i32_1 = arith.constant 0 : i32
    return %c0_i32, %c0_i32_0 : i32, i32
  }
  func.func @transform_14(%arg0: i32, %arg1: i32) -> (i32, i32) {
    %c0_i32 = arith.constant 0 : i32
    %c0_i32_0 = arith.constant 0 : i32
    %c0_i32_1 = arith.constant 0 : i32
    return %c0_i32, %c0_i32_0 : i32, i32
  }
  func.func @transform_15(%arg0: i32, %arg1: i32) -> (i32, i32) {
    %c0_i32 = arith.constant 0 : i32
    %c0_i32_0 = arith.constant 0 : i32
    %c0_i32_1 = arith.constant 0 : i32
    return %c0_i32, %c0_i32_0 : i32, i32
  }
  func.func @transform_16(%arg0: i32, %arg1: i32) -> (i32, i32) {
    %c0_i32 = arith.constant 0 : i32
    %c0_i32_0 = arith.constant 0 : i32
    %c0_i32_1 = arith.constant 0 : i32
    return %c0_i32, %c0_i32_0 : i32, i32
  }
  func.func @transform_17(%arg0: i32, %arg1: i32) -> (i32, i32) {
    %c0_i32 = arith.constant 0 : i32
    %c0_i32_0 = arith.constant 0 : i32
    %c0_i32_1 = arith.constant 0 : i32
    return %c0_i32, %c0_i32_0 : i32, i32
  }
  func.func @transform_18(%arg0: i32, %arg1: i32) -> (i32, i32, i32) {
    %c0_i32 = arith.constant 0 : i32
    %c0_i32_0 = arith.constant 0 : i32
    return %arg0, %arg1, %c0_i32 : i32, i32, i32
  }
}

</mosaic_0001>

<bundles_post_ra>
// kernel: tpu_custom_call.1
= control target key start
LH: loop header
LB: loop body
LE: loop exit
PB: predicated region body
PF: predicated region fallthrough
CT: control target
= control target key end

     0   :  { %s4027_s0 = inlined_call_operand.vmem [shape: f32[2,8,32], index: 0, kind: input, shape index: {}]   ;;  %s4028_s1 = inlined_call_operand.hbm [shape: f32[2,1,8], index: 1, kind: input, shape index: {}]   ;;  %s4029_s2 = inlined_call_operand.vmem [shape: f32[1,32], index: 2, kind: input, shape index: {}]   ;;  %s4030_s3 = inlined_call_operand.hbm [shape: f32[1,32], index: 3, kind: input, shape index: {}]   ;;  %s4031_s4 = inlined_call_operand.vmem [shape: bf16[32,32], index: 4, kind: input, shape index: {}]   ;;  %s4032_s5 = inlined_call_operand.hbm [shape: f32[1,32], index: 5, kind: input, shape index: {}]   ;;  %s4033_s6 = inlined_call_operand.vmem [shape: bf16[32,32], index: 6, kind: input, shape index: {}]   ;;  %s4034_s7 = inlined_call_operand.hbm [shape: f32[1,32], index: 7, kind: input, shape index: {}]   ;;  %s4035_s8 = inlined_call_operand.hbm [shape: bf16[32,32], index: 8, kind: input, shape index: {}]   ;;  %s4036_s9 = inlined_call_operand.hbm [shape: f32[1,32], index: 9, kind: input, shape index: {}]   ;;  %s4037_s10 = inlined_call_operand.vmem [shape: bf16[32,32], index: 10, kind: input, shape index: {}]   ;;  %s4038_s11 = inlined_call_operand.hbm [shape: f32[1,32], index: 11, kind: input, shape index: {}]   ;;  %s4039_s12 = inlined_call_operand.hbm [shape: f32[1,32], index: 12, kind: input, shape index: {}]   ;;  %s4040_s13 = inlined_call_operand.hbm [shape: f32[1,32], index: 13, kind: input, shape index: {}]   ;;  %s4041_s14 = inlined_call_operand.vmem [shape: bf16[32,64], index: 14, kind: input, shape index: {}]   ;;  %s4042_s15 = inlined_call_operand.vmem [shape: f32[1,64], index: 15, kind: input, shape index: {}]   ;;  %s4043_s16 = inlined_call_operand.vmem [shape: bf16[64,32], index: 16, kind: input, shape index: {}]   ;;  %s4044_s17 = inlined_call_operand.vmem [shape: f32[1,32], index: 17, kind: input, shape index: {}]   ;;  %s4045_s18 = inlined_call_operand.hbm [shape: f32[2,8,32], index: 18, kind: output, shape index: {}]  }
   0x1   :  { %4059 = sst [smem:[#allocation26_spill]] %s4027_s0 }
   0x2   :  { %4060 = sst [smem:[#allocation27_spill]] %s4028_s1 }
   0x3   :  { %4061 = sst [smem:[#allocation28_spill]] %s4029_s2 }
   0x4   :  { %4062 = sst [smem:[#allocation29_spill]] %s4030_s3 }
   0x5   :  { %4063 = sst [smem:[#allocation30_spill]] %s4031_s4 }
   0x6   :  { %4064 = sst [smem:[#allocation31_spill]] %s4032_s5 }
   0x7   :  { %4065 = sst [smem:[#allocation32_spill]] %s4034_s7 }
   0x8   :  { %4066 = sst [smem:[#allocation33_spill]] %s4037_s10 }
   0x9   :  { %4067 = sst [smem:[#allocation34_spill]] %s4041_s14 }
   0xa   :  { %4068 = sst [smem:[#allocation35_spill]] %s4042_s15 }
   0xb   :  { %4069 = sst [smem:[#allocation36_spill]] %s4043_s16 }
   0xc   :  { %4070 = sst [smem:[#allocation37_spill]] %s4044_s17 }
   0xd   :  { %4071 = sst [smem:[#allocation38_spill]] %s4045_s18 }
   0xe   :  { %23 = vsyncpa [#allocation5], 0 }
   0xf   :  { %25 = vsyncpa [#allocation5 + $0x1], 0 }
  0x10   :  { %26 = vsyncpa [#allocation8], 0 }
  0x11   :  { %27 = vsyncpa [#allocation11], 0 }
  0x12   :  { %28 = vsyncpa [#allocation14], 0 }
  0x13   :  { %29 = vsyncpa [#allocation17], 0 }
  0x14   :  { %30 = vsyncpa [#allocation6], 0 }
  0x15   :  { %32 = vsyncpa [#allocation6 + $0x1], 0  ;;  %s3394_s27 = smov 0   ;;  %s3396_s28 = smov 0  }
  0x16   :  { %s3398_s29 = smov 0   ;;  %s3400_s30 = smov 0  }
  0x17   :  { %s3402_s0 = smov 0   ;;  %s3404_s19 = smov 0  }
  0x18 LB: > { %s4047_s1 = sadd.s32 4294967295, %s3274_s19   ;;  %p2515_p0 = scmp.ge.s32.totalorder %s3274_s19, 1  ;;  %s3274_s19 = sphi %s3404_s19, %s38_s19   ;;  %s3270_s0 = sphi %s3402_s0, %s4105_s0   ;;  %s3266_s30 = sphi %s3400_s30, %s4104_s30   ;;  %s3262_s29 = sphi %s3398_s29, %s4103_s29   ;;  %s3258_s28 = sphi %s3396_s28, %s4102_s28   ;;  %s3254_s27 = sphi %s3394_s27, %s4101_s27  }
  0x19   : > { %p3428_p1 = scmp.eq.s32.totalorder %s4047_s1, 0  ;;  %p471_p2 = scmp.lt.s32.totalorder %s3274_s19, 3 }
  0x1a   : > { %s3276_s22 = smov [#allocation7]   ;;  %s3277_s23 = smov [#allocation10]  }
  0x1b   : > { %s4072_s20 = scalar_select %p3428_p1, 1, 0 }
  0x1c   : > { %p3433_p3 = pnand %p2515_p0, %p471_p2  ;;  %s487_s2 = sshll.u32 %s3276_s22, 4  ;;  %s488_s2 = int_to_ptr.vmem [resolvable:$true] %s487_s2 }
  0x1d   : > { %s515_s24 = sshll.u32 %s3277_s23, 4  ;;  %s3278_s26 = smov [#allocation13]   ;;  %s3446_s24 = int_to_ptr.vmem [resolvable:$true] %s515_s24 }
  0x1e   : > { %s4073_s21 = scalar_select %p3433_p3, 1, 0 }
  0x1f   : > { %p2759_p5 = pneg %p3433_p3  ;;  %s539_s1 = sshll.u32 %s3278_s26, 4  ;;  %s3448_s1 = int_to_ptr.vmem [resolvable:$true] %s539_s1 }
  0x20   : > { %s4075_s3 = sld [smem:[#allocation29_spill]] }
  0x21   : > { %p3442_p6 = pnand %p2759_p5, %p3428_p1 }
  0x23   : > { %p3458_p8 = pneg %p3442_p6 }
  0x26   : > { %s2922_s17 = scalar_lea.hbm %s4075_s3, 16 }
  0x27   : > { %p2923_p7 = scmp.ne.s32.totalorder %s4075_s3, %s2922_s17  ;;  %p2929_p11 = scmp.lt.u32.totalorder %s2922_s17, %s4075_s3 }
  0x29   : > { %p2925_p9 = pnand %p3458_p8, %p2923_p7 }
  0x2b   : > { %p2926_p10 = pneg %p2925_p9 }
  0x2d   : > { %p2931_p12 = pnand %p2929_p11, %p2926_p10 }
  0x2f   : > { %2934 = shalt.err (!%p2931_p12)
}
  0x30   : > { %s2935_s18 = scalar_lea.vmem %s488_s2, 16  ;;  %s2942_s15 = scalar_lea.vmem %s488_s2, 32 }
  0x31   : > { %p2936_p13 = scmp.ne.s32.totalorder %s488_s2, %s2935_s18  ;;  %p2943_p5 = scmp.lt.s32.totalorder %s488_s2, %s488_s2 }
  0x32   : > { %p2944_p4 = scmp.lt.s32.totalorder %s2942_s15, %s2935_s18 }
  0x33   : > { %p2938_p0 = pnand %p2936_p13, %p3458_p8 }
  0x34   : > { %p2945_p3 = por %p2944_p4, %p2943_p5 }
  0x35   : > { %p2939_p2 = pneg %p2938_p0 }
  0x37   : > { %p2946_p1 = pnand %p2945_p3, %p2939_p2 }
  0x39   : > { %2949 = shalt.err (!%p2946_p1)
}
  0x3a   : > { %2762 = dma.hbm_to_vmem [thread:$0]  (!%p3442_p6), %s4075_s3, 16, %s488_s2, [#allocation8]  }
  0x3b   : > { %s4077_s7 = sld [smem:[#allocation32_spill]] }
  0x41   : > { %s2950_s26 = scalar_lea.hbm %s4077_s7, 16 }
  0x42   : > { %p2951_p7 = scmp.ne.s32.totalorder %s4077_s7, %s2950_s26  ;;  %p2957_p1 = scmp.lt.u32.totalorder %s2950_s26, %s4077_s7 }
  0x44   : > { %p2953_p9 = pnand %p2951_p7, %p3458_p8 }
  0x46   : > { %p2954_p4 = pneg %p2953_p9 }
  0x48   : > { %p2959_p3 = pnand %p2957_p1, %p2954_p4 }
  0x4a   : > { %2962 = shalt.err (!%p2959_p3)
}
  0x4b   : > { %s2963_s2 = scalar_lea.vmem %s3446_s24, 16  ;;  %s2970_s4 = scalar_lea.vmem %s3446_s24, 32 }
  0x4c   : > { %p2964_p10 = scmp.ne.s32.totalorder %s3446_s24, %s2963_s2  ;;  %p2971_p13 = scmp.lt.s32.totalorder %s3446_s24, %s3446_s24 }
  0x4d   : > { %p2972_p0 = scmp.lt.s32.totalorder %s2970_s4, %s2963_s2 }
  0x4e   : > { %p2966_p11 = pnand %p2964_p10, %p3458_p8 }
  0x4f   : > { %p2973_p2 = por %p2972_p0, %p2971_p13 }
  0x50   : > { %p2967_p12 = pneg %p2966_p11 }
  0x52   : > { %p2974_p5 = pnand %p2973_p2, %p2967_p12 }
  0x54   : > { %2977 = shalt.err (!%p2974_p5)
}
  0x55   : > { %2768 = dma.hbm_to_vmem [thread:$0]  (!%p3442_p6), %s4077_s7, 16, %s3446_s24, [#allocation11]  }
  0x56   : > { %s2978_s17 = scalar_lea.hbm %s4036_s9, 16 }
  0x57   : > { %p2979_p7 = scmp.ne.s32.totalorder %s4036_s9, %s2978_s17  ;;  %p2985_p1 = scmp.lt.u32.totalorder %s2978_s17, %s4036_s9 }
  0x59   : > { %p2981_p9 = pnand %p2979_p7, %p3458_p8 }
  0x5b   : > { %p2982_p4 = pneg %p2981_p9 }
  0x5d   : > { %p2987_p3 = pnand %p2985_p1, %p2982_p4 }
  0x5f   : > { %2990 = shalt.err (!%p2987_p3)
}
  0x60   : > { %s2991_s24 = scalar_lea.vmem %s3448_s1, 16  ;;  %s2998_s4 = scalar_lea.vmem %s3448_s1, 32 }
  0x61   : > { %p2992_p10 = scmp.ne.s32.totalorder %s3448_s1, %s2991_s24  ;;  %p2999_p13 = scmp.lt.s32.totalorder %s3448_s1, %s3448_s1 }
  0x62   : > { %p3000_p0 = scmp.lt.s32.totalorder %s2998_s4, %s2991_s24 }
  0x63   : > { %p2994_p11 = pnand %p2992_p10, %p3458_p8 }
  0x64   : > { %p3001_p2 = por %p3000_p0, %p2999_p13 }
  0x65   : > { %p2995_p12 = pneg %p2994_p11 }
  0x67   : > { %p3002_p5 = pnand %p3001_p2, %p2995_p12 }
  0x69   : > { %3005 = shalt.err (!%p3002_p5)
}
  0x6a   : > { %2774 = dma.hbm_to_vmem [thread:$0]  (!%p3442_p6), %s4036_s9, 16, %s3448_s1, [#allocation14]  }
  0x6b   : > { %s3279_s22 = smov [#allocation16]   ;;  %s3280_s17 = smov [#allocation9]  }
  0x6c   : > { %s564_s14 = sshll.u32 %s3279_s22, 4  ;;  %s501_s26 = sshll.u32 %s3280_s17, 4  ;;  %s565_s14 = int_to_ptr.vmem [resolvable:$true] %s564_s14  ;;  %s502_s26 = int_to_ptr.vmem [resolvable:$true] %s501_s26 }
  0x6d   : > { %s3006_s2 = scalar_lea.hbm %s4039_s12, 16 }
  0x6e   : > { %p3007_p7 = scmp.ne.s32.totalorder %s4039_s12, %s3006_s2  ;;  %p3013_p1 = scmp.lt.u32.totalorder %s3006_s2, %s4039_s12 }
  0x70   : > { %p3009_p9 = pnand %p3007_p7, %p3458_p8 }
  0x72   : > { %p3010_p4 = pneg %p3009_p9 }
  0x74   : > { %p3015_p3 = pnand %p3013_p1, %p3010_p4 }
  0x76   : > { %3018 = shalt.err (!%p3015_p3)
}
  0x77   : > { %s3019_s1 = scalar_lea.vmem %s565_s14, 16  ;;  %s3026_s16 = scalar_lea.vmem %s565_s14, 32 }
  0x78   : > { %p3020_p10 = scmp.ne.s32.totalorder %s565_s14, %s3019_s1  ;;  %p3027_p13 = scmp.lt.s32.totalorder %s565_s14, %s565_s14 }
  0x79   : > { %p3028_p0 = scmp.lt.s32.totalorder %s3026_s16, %s3019_s1 }
  0x7a   : > { %p3022_p11 = pnand %p3020_p10, %p3458_p8 }
  0x7b   : > { %p3029_p2 = por %p3028_p0, %p3027_p13 }
  0x7c   : > { %p3023_p12 = pneg %p3022_p11 }
  0x7e   : > { %p3030_p5 = pnand %p3029_p2, %p3023_p12 }
  0x80   : > { %3033 = shalt.err (!%p3030_p5)
}
  0x81   : > { %2780 = dma.hbm_to_vmem [thread:$0]  (!%p3442_p6), %s4039_s12, 16, %s565_s14, [#allocation17]  }
  0x82   : > { %s4078_s5 = sld [smem:[#allocation31_spill]] }
  0x88   : > { %s3034_s15 = scalar_lea.hbm %s4078_s5, 16 }
  0x89   : > { %p3035_p7 = scmp.ne.s32.totalorder %s4078_s5, %s3034_s15  ;;  %p3041_p1 = scmp.lt.u32.totalorder %s3034_s15, %s4078_s5 }
  0x8b   : > { %p3037_p9 = pnand %p3035_p7, %p3458_p8 }
  0x8d   : > { %p3038_p4 = pneg %p3037_p9 }
  0x8f   : > { %p3043_p3 = pnand %p3041_p1, %p3038_p4 }
  0x91   : > { %3046 = shalt.err (!%p3043_p3)
}
  0x92   : > { %s3047_s1 = scalar_lea.vmem %s502_s26, 16  ;;  %s3054_s14 = scalar_lea.vmem %s502_s26, 32 }
  0x93   : > { %p3048_p10 = scmp.ne.s32.totalorder %s502_s26, %s3047_s1  ;;  %p3055_p13 = scmp.lt.s32.totalorder %s502_s26, %s502_s26 }
  0x94   : > { %p3056_p0 = scmp.lt.s32.totalorder %s3054_s14, %s3047_s1 }
  0x95   : > { %p3050_p11 = pnand %p3048_p10, %p3458_p8 }
  0x96   : > { %p3057_p2 = por %p3056_p0, %p3055_p13 }
  0x97   : > { %p3051_p12 = pneg %p3050_p11 }
  0x99   : > { %p3058_p5 = pnand %p3057_p2, %p3051_p12 }
  0x9b   : > { %3061 = shalt.err (!%p3058_p5)
}
  0x9c   : > { %2765 = dma.hbm_to_vmem [thread:$0]  (!%p3442_p6), %s4078_s5, 16, %s502_s26, [#allocation8]  }
  0x9d   : > { %s3281_s17 = smov [#allocation12]   ;;  %s3062_s2 = scalar_lea.hbm %s4035_s8, 256 }
  0x9e   : > { %s525_s3 = sshll.u32 %s3281_s17, 4  ;;  %p3063_p7 = scmp.ne.s32.totalorder %s4035_s8, %s3062_s2  ;;  %s526_s3 = int_to_ptr.vmem [resolvable:$true] %s525_s3 }
  0x9f   : > { %p3069_p1 = scmp.lt.u32.totalorder %s3062_s2, %s4035_s8 }
  0xa0   : > { %p3065_p9 = pnand %p3063_p7, %p3458_p8 }
  0xa2   : > { %p3066_p4 = pneg %p3065_p9 }
  0xa4   : > { %p3071_p3 = pnand %p3069_p1, %p3066_p4 }
  0xa6   : > { %3074 = shalt.err (!%p3071_p3)
}
  0xa7   : > { %s3075_s26 = scalar_lea.vmem %s526_s3, 256  ;;  %p3083_p13 = scmp.lt.s32.totalorder %s526_s3, %s526_s3 }
  0xa8   : > { %p3076_p10 = scmp.ne.s32.totalorder %s526_s3, %s3075_s26  ;;  %p3084_p0 = scmp.lt.s32.totalorder %s3075_s26, %s3075_s26 }
  0xaa   : > { %p3078_p11 = pnand %p3076_p10, %p3458_p8  ;;  %p3085_p2 = por %p3084_p0, %p3083_p13 }
  0xac   : > { %p3079_p12 = pneg %p3078_p11 }
  0xae   : > { %p3086_p5 = pnand %p3085_p2, %p3079_p12 }
  0xb0   : > { %3089 = shalt.err (!%p3086_p5)
}
  0xb1   : > { %s3282_s14 = smov 64   ;;  %s3283_s16 = smov 4  }
  0xb2   : > { %2771 = dma.hbm_to_vmem [thread:$0]  (!%p3442_p6), %s4035_s8, 256, %s526_s3, [#allocation11], %s3282_s14, %s3282_s14, %s3283_s16  }
  0xb3   : > { %s3284_s18 = smov [#allocation15]   ;;  %s3285_s2 = smov [#allocation18]  }
  0xb4   : > { %s553_s15 = sshll.u32 %s3284_s18, 4  ;;  %s575_s24 = sshll.u32 %s3285_s2, 4  ;;  %s554_s15 = int_to_ptr.vmem [resolvable:$true] %s553_s15  ;;  %s3576_s24 = int_to_ptr.vmem [resolvable:$true] %s575_s24 }
  0xb5   : > { %s3090_s1 = scalar_lea.hbm %s4038_s11, 16 }
  0xb6   : > { %p3091_p7 = scmp.ne.s32.totalorder %s4038_s11, %s3090_s1  ;;  %p3097_p1 = scmp.lt.u32.totalorder %s3090_s1, %s4038_s11 }
  0xb8   : > { %p3093_p9 = pnand %p3091_p7, %p3458_p8 }
  0xba   : > { %p3094_p4 = pneg %p3093_p9 }
  0xbc   : > { %p3099_p3 = pnand %p3097_p1, %p3094_p4 }
  0xbe   : > { %3102 = shalt.err (!%p3099_p3)
}
  0xbf   : > { %s3103_s14 = scalar_lea.vmem %s554_s15, 16  ;;  %s3110_s16 = scalar_lea.vmem %s554_s15, 32 }
  0xc0   : > { %p3104_p10 = scmp.ne.s32.totalorder %s554_s15, %s3103_s14  ;;  %p3111_p13 = scmp.lt.s32.totalorder %s554_s15, %s554_s15 }
  0xc1   : > { %p3112_p0 = scmp.lt.s32.totalorder %s3110_s16, %s3103_s14 }
  0xc2   : > { %p3106_p11 = pnand %p3104_p10, %p3458_p8 }
  0xc3   : > { %p3113_p2 = por %p3112_p0, %p3111_p13 }
  0xc4   : > { %p3107_p12 = pneg %p3106_p11 }
  0xc6   : > { %p3114_p5 = pnand %p3113_p2, %p3107_p12 }
  0xc8   : > { %3117 = shalt.err (!%p3114_p5)
}
  0xc9   : > { %2777 = dma.hbm_to_vmem [thread:$0]  (!%p3442_p6), %s4038_s11, 16, %s554_s15, [#allocation14]  }
  0xca   : > { %s3118_s4 = scalar_lea.hbm %s4040_s13, 16 }
  0xcb   : > { %p3119_p7 = scmp.ne.s32.totalorder %s4040_s13, %s3118_s4  ;;  %p3125_p1 = scmp.lt.u32.totalorder %s3118_s4, %s4040_s13 }
  0xcd   : > { %p3121_p9 = pnand %p3119_p7, %p3458_p8 }
  0xcf   : > { %p3122_p4 = pneg %p3121_p9 }
  0xd1   : > { %p3127_p3 = pnand %p3125_p1, %p3122_p4 }
  0xd3   : > { %3130 = shalt.err (!%p3127_p3)
}
  0xd4   : > { %s3131_s15 = scalar_lea.vmem %s3576_s24, 16  ;;  %s3138_s3 = scalar_lea.vmem %s3576_s24, 32 }
  0xd5   : > { %p3132_p10 = scmp.ne.s32.totalorder %s3576_s24, %s3131_s15  ;;  %p3139_p13 = scmp.lt.s32.totalorder %s3576_s24, %s3576_s24 }
  0xd6   : > { %p3140_p0 = scmp.lt.s32.totalorder %s3138_s3, %s3131_s15 }
  0xd7   : > { %p3134_p11 = pnand %p3132_p10, %p3458_p8 }
  0xd8   : > { %p3141_p2 = por %p3140_p0, %p3139_p13 }
  0xd9   : > { %p3135_p12 = pneg %p3134_p11 }
  0xdb   : > { %p3142_p5 = pnand %p3141_p2, %p3135_p12 }
  0xdd   : > { %3145 = shalt.err (!%p3142_p5)
}
  0xde   : > { %2783 = dma.hbm_to_vmem [thread:$0]  (!%p3442_p6), %s4040_s13, 16, %s3576_s24, [#allocation17]  }
  0xdf   : > { %s2514_s23 = sadd.s32 4294967294, %s3274_s19   ;;  %s50_s5 = sadd.s32 1, %s3270_s0 }
  0xe0   : > { %p52_p8 = scmp.ge.s32.totalorder %s50_s5, 2  ;;  %s83_s25 = sadd.s32 1, %s3262_s29 }
  0xe1   : > { %p90_p7 = scmp.ne.s32.totalorder %s3262_s29, %s3258_s28  ;;  %p91_p9 = scmp.eq.s32.totalorder %s3274_s19, 0 }
  0xe2   : > { %s4107_s5 = smov (%p52_p8, %s50_s5), 0  ;;  %p96_p1 = scmp.ne.s32.totalorder %s3258_s28, %s3254_s27 }
  0xe3   : > { %p3628_p4 = por %p91_p9, %p90_p7  ;;  %s80_s24 = ssub.s32 %s3270_s0, %s4107_s5 }
  0xe4   : > { %s4080_s18 = sadd.s32 4294967295, %s3274_s19   ;;  %p81_p3 = scmp.eq.s32.totalorder %s80_s24, 0 }
  0xe5   : > { %p458_p6 = scmp.eq.s32.totalorder %s4080_s18, 1  ;;  %p4081_p10 = scmp.ne.s32.totalorder %s4072_s20, 0 }
  0xe6   : > { %p464_p13 = scmp.eq.s32.totalorder %s2514_s23, 1  ;;  %p2800_p2 = scmp.lt.s32.totalorder %s3274_s19, 2 }
  0xe7   : > { %p3640_p11 = por %p4081_p10, %p96_p1  ;;  %p3644_p12 = por %p458_p6, %p90_p7 }
  0xe8   : > { %s3649_s10 = scalar_select %p81_p3, %s3262_s29, %s83_s25  }
  0xe9   : > { %s4083_s4 = scalar_select %p3644_p12, 1, 0 }
  0xea   : > { %p3651_p0 = por %p464_p13, %p96_p1  ;;  %s605_s26 = sand.u32 1, %s3262_s29  }
  0xeb   : > { %s2525_s22 = sshll.u32 %s3270_s0, 4  ;;  %s4085_s14 = sld [smem:[#allocation27_spill]] }
  0xec   : > { %s4084_s1 = scalar_select %p3651_p0, 1, 0 }
  0xed   : > { %s608_s24 = scalar_lea.vmem [#allocation4], %s605_s26  ;;  %p3667_p5 = pnand %p2800_p2, %p3628_p4 }
  0xee   : > { %s615_s23 = sshll.u32 %s608_s24, 4  ;;  %s606_s18 = scalar_lea.sflag [#allocation5], %s605_s26  ;;  %s3663_s23 = int_to_ptr.vmem [resolvable:$true] %s615_s23 }
  0xef   : > { %p3148_p7 = pneg %p3667_p5 }
  0xf1   : > { %s3661_s16 = scalar_lea.hbm %s4085_s14, %s2525_s22  ;;  %s3151_s3 = scalar_lea.hbm %s4085_s14, 32 }
  0xf2   : > { %s3146_s7 = scalar_lea.hbm %s3661_s16, 16  ;;  %p3152_p4 = scmp.lt.u32.totalorder %s3661_s16, %s4085_s14 }
  0xf3   : > { %p3147_p8 = scmp.ne.s32.totalorder %s3661_s16, %s3146_s7  ;;  %p3153_p6 = scmp.lt.u32.totalorder %s3151_s3, %s3146_s7 }
  0xf4   : > { %p3155_p10 = scmp.lt.u32.totalorder %s3146_s7, %s3661_s16 }
  0xf5   : > { %p3149_p9 = pnand %p3148_p7, %p3147_p8  ;;  %p3154_p3 = por %p3153_p6, %p3152_p4 }
  0xf7   : > { %p3150_p1 = pneg %p3149_p9  ;;  %p3156_p13 = por %p3155_p10, %p3154_p3 }
  0xf9   : > { %p3157_p2 = pnand %p3156_p13, %p3150_p1 }
  0xfb   : > { %3160 = shalt.err (!%p3157_p2)
}
  0xfc   : > { %s3161_s26 = scalar_lea.vmem %s3663_s23, 16  ;;  %s3286_s22 = smov [#allocation4]  }
  0xfd   : > { %p3162_p8 = scmp.ne.s32.totalorder %s3663_s23, %s3161_s26  ;;  %s3166_s15 = sshll.u32 %s3286_s22, 4  ;;  %s3167_s15 = int_to_ptr.vmem [resolvable:$false] %s3166_s15 }
  0xfe   : > { %s3168_s17 = scalar_lea.vmem %s3167_s15, 32  ;;  %p3169_p12 = scmp.lt.s32.totalorder %s3663_s23, %s3167_s15 }
  0xff   : > { %p3164_p9 = pnand %p3162_p8, %p3148_p7  ;;  %p3170_p4 = scmp.lt.s32.totalorder %s3168_s17, %s3161_s26 }
 0x101   : > { %p3165_p0 = pneg %p3164_p9  ;;  %p3171_p6 = por %p3170_p4, %p3169_p12 }
 0x103   : > { %p3172_p3 = pnand %p3171_p6, %p3165_p0 }
 0x105   : > { %3175 = shalt.err (!%p3172_p3)
}
 0x106   : > { %2787 = dma.hbm_to_vmem [thread:$0]  (!%p3667_p5), %s3661_s16, 16, %s3663_s23, %s606_s18  }
 0x107   : > { %p4087_p1 = scmp.ne.s32.totalorder %s4073_s21, 0 }
 0x108   : > { %s3699_s7 = sand.u32 (!%p4087_p1), 1, %s3258_s28  }
 0x109   : > { %624 = sbr.rel (%p4087_p1) target bundleno = 2880 (0xb40), region = 92  ;;  %s627_s3 = scalar_lea.sflag (!%p4087_p1), [#allocation5], %s3699_s7 }
 0x10a   : > { %s629_s24 = scalar_lea.vmem (!%p4087_p1), [#allocation4], %s3699_s7 }
 0x110   : > { %3229 = dma.done.wait (%p3640_p11), %s627_s3, 16  }
 0x111   : > { %3231 = vsyncadd (%p3640_p11), %s627_s3, 4294967280  ;;  %p4088_p12 = scmp.ne.s32.totalorder %s4072_s20, 0 }
 0x113   : > { %3233 = dma.done.wait (%p4088_p12), [#allocation8], 32  }
 0x114   : > { %3235 = vsyncadd (%p4088_p12), [#allocation8], 4294967264 }
 0x115   : > { %3237 = dma.done.wait (%p4088_p12), [#allocation11], 272  }
 0x116   : > { %3239 = vsyncadd (%p4088_p12), [#allocation11], 4294967024 }
 0x117   : > { %3241 = dma.done.wait (%p4088_p12), [#allocation14], 32  }
 0x118   : > { %3243 = vsyncadd (%p4088_p12), [#allocation14], 4294967264 }
 0x119   : > { %3245 = dma.done.wait (%p4088_p12), [#allocation17], 32  }
 0x11a   : > { %3247 = vsyncadd (%p4088_p12), [#allocation17], 4294967264  ;;  %p717_p11 = scmp.lt.s32.totalorder %s3266_s30, 1  ;;  %s4089_s25 = sld [smem:[#allocation26_spill]]  ;;  %vm729_vm0 = vcmask 261120   ;;  %v2879_v12 = vld [vmem:[%s4033_s6] sm:$0xff]  }
 0x11b   : > { %v2880_v13 = vld [vmem:[#allocation12] sm:$0xff]   ;;  %v3287_v14 = vmov 0.0   ;;  %v2882_v16 = vld [vmem:[#allocation12 + $0x8] sm:$0xff]   ;;  %vm3288_vm1 = vmmov 0   ;;  %v2538_v36 = vld [vmem:[#allocation7] ss:$0 sm:$0xff] }
 0x11c   : > { %s718_s21 = scalar_select %p717_p11, %s3266_s30, 1  ;;  %2623 = vmatprep.subr.bf16.mxu0 %v3287_v14  ;;  %2631 = vmatprep.subr.bf16.mxu1 %v3287_v14  ;;  %v2881_v15 = vld [vmem:[%s4033_s6 + $0x8] sm:$0xff]   ;;  %v2539_v47 = vld [vmem:[#allocation10] ss:$0 sm:$0xff]  ;;  %v2553_v57 = vld [vmem:[#allocation9] ss:$0 sm:$0xff] }
 0x11d   : > { %2624 = vmatpush3.bf16.msra.mxu0 %v2879_v12  ;;  %2632 = vmatpush3.bf16.msra.mxu1 %v2880_v13  ;;  %s4091_s23 = sld [smem:[#allocation30_spill]]  ;;  %s3289_s26 = smov 120   ;;  %vm1045_vm6 = vcmask 60416   ;;  %vm1476_vm7 = vcmask 64512   ;;  %vm1716_vm9 = vcmask 1043456   ;;  %vm2069_vm10 = vcmask 130048  }
 0x11e   : > { %s2536_s2 = sshll.u32 %s718_s21, 3  ;;  %2625 = vmatprep.subr.bf16.mxu0 %v3287_v14  ;;  %2633 = vmatprep.subr.bf16.mxu1 %v3287_v14  ;;  %s4090_s21 = sld [smem:[#allocation28_spill]]  ;;  %vm2072_vm11 = vcmask 195584   ;;  %vm2278_vm14 = vcmask 523264  }
 0x11f   : > { %2627 = vmatprep.mubr.msk.bf16.mxu0 %vm3288_vm1, %v3287_v14  ;;  %2635 = vmatprep.mubr.msk.bf16.mxu1 %vm3288_vm1, %v3287_v14  ;;  %s3290_s22 = smov 112   ;;  %s3291_s15 = smov 104  }
 0x120   : > { %s3728_s18 = scalar_lea.vmem %s4089_s25, %s2536_s2  ;;  %s4092_s3 = sld [smem:[#allocation33_spill]] }
 0x121   : > { %v726_v0 = vld [vmem:[%s3728_s18] sm:$0xff]  ;;  %2626 = vmatpush3.bf16.msra.mxu0 %v2881_v15  ;;  %2634 = vmatpush3.bf16.msra.mxu1 %v2882_v16  ;;  %s3295_s16 = smov 8   ;;  %s3296_s25 = smov 16  }
 0x122   : > { %v730_v1 = vsel %vm729_vm0, %v726_v0, 0.0  ;;  %2639 = vmatprep.subr.bf16.mxu0 %v3287_v14  ;;  %2647 = vmatprep.subr.bf16.mxu1 %v3287_v14  ;;  %s3297_s20 = smov 24   ;;  %s4094_s2 = sld [smem:[#allocation36_spill]] }
 0x123   : > { %731 = vadd.xlane.f32.xlu0 %v730_v1  ;;  %v2883_v41 = vld [vmem:[%s4091_s23] sm:$0xff]   ;;  %v2884_v44 = vld [vmem:[%s4091_s23 + $0x8] sm:$0xff]   ;;  %p4098_p5 = scmp.ne.s32.totalorder %s4083_s4, 0 }
 0x124   : > { %v2537_v33 = vld [vmem:[%s4090_s21] ss:$0 sm:$0xff]  ;;  %s4095_s21 = sld [smem:[#allocation35_spill]] }
 0x127   : > { %1211 = vadd.xlane.f32.xlu0 %v730_v1 }
 0x1b0   : > { %v732_v2 = vpop.xlane.xlu0 %731 }
 0x1b1   : > { %v734_v3 = vmul.f32 0.03125, %v732_v2  ;;  %v910_v2 = vlaneseq }
 0x1b3   : > { %v735_v4 = vsub.f32 %v726_v0, %v734_v3  ;;  %v3293_v3 = vmov 1934713408  }
 0x1b4   : > { %v1212_v5 = vpop.xlane.xlu0 %1211 }
 0x1b5   : > { %v1214_v6 = vmul.f32 0.03125, %v1212_v5  ;;  %v736_v7 = vmul.f32 %v735_v4, %v735_v4  ;;  %v754_v34 = vmul.f32 %v2537_v33, %v735_v4  ;;  %v940_v4 = vunpack.c.l.s4 %v3293_v3 }
 0x1b7   : > { %v1215_v8 = vsub.f32 %v726_v0, %v1214_v6  ;;  %v737_v9 = vsel %vm729_vm0, %v736_v7, 0.0  ;;  %v3292_v0 = vmov 1983009808   ;;  %v3778_v6 = vshrl.u32 %v910_v2, 7 }
 0x1b8   : > { %738 = vadd.xlane.f32.xlu1 %v737_v9  ;;  %v908_v1 = vunpack.c.l.s4 %v3292_v0 }
 0x1b9   : > { %v1216_v10 = vmul.f32 %v1215_v8, %v1215_v8  ;;  %v1234_v38 = vmul.f32 %v2537_v33, %v1215_v8  ;;  %v941_v8 = vunpack.c.0.s8 %v940_v4 }
 0x1ba   : > { %v909_v5 = vunpack.c.0.s8 %v908_v1 }
 0x1bb   : > { %v1217_v11 = vsel %vm729_vm0, %v1216_v10, 0.0 }
 0x1bc   : > { %1218 = vadd.xlane.f32.xlu1 %v1217_v11  ;;  %v3781_v9 = vsub.s32 %v909_v5, %v3778_v6 }
 0x245   : > { %v739_v17 = vpop.xlane.xlu1 %738 }
 0x246   : > { %v740_v18 = vmul.f32 0.032258064, %v739_v17  ;;  %v3784_v17 = vsub.s32 %v941_v8, %v3778_v6 }
 0x248   : > { %2893 = vrsqrt.f32 %v740_v18  ;;  %vm743_vm2 = vcmp.eq.f32.partialorder %v740_v18, inf  ;;  %v746_v23 = vand.u32 2147483648, %v740_v18  ;;  %vm745_vm3 = vcmp.eq.f32.partialorder %v740_v18, 0.0 }
 0x249   : > { %v1219_v19 = vpop.xlane.xlu1 %1218 }
 0x24a   : > { %v1220_v20 = vmul.f32 0.032258064, %v1219_v19 }
 0x24c   : > { %2895 = vrsqrt.f32 %v1220_v20  ;;  %vm1223_vm4 = vcmp.eq.f32.partialorder %v1220_v20, inf  ;;  %v1226_v29 = vand.u32 2147483648, %v1220_v20  ;;  %vm1225_vm5 = vcmp.eq.f32.partialorder %v1220_v20, 0.0 }
 0x252   : > { %v2894_v21 = vpop.eup %2893 }
 0x253   : > { %v742_v22 = vmul.f32 %v2894_v21, %v740_v18 }
 0x255   : > { %v744_v24 = vsel %vm743_vm2, %v740_v18, %v742_v22 }
 0x256   : > { %v2896_v25 = vpop.eup %2895  ;;  %v747_v26 = vsel %vm745_vm3, %v746_v23, %v744_v24 }
 0x257   : > { %v755_v27 = vadd.f32 1e-06, %v747_v26  ;;  %v1222_v28 = vmul.f32 %v2896_v25, %v1220_v20 }
 0x259   : > { %v1224_v30 = vsel %vm1223_vm4, %v1220_v20, %v1222_v28  ;;  %2897 = vrcp.f32 %v755_v27 }
 0x25a   : > { %v1227_v31 = vsel %vm1225_vm5, %v1226_v29, %v1224_v30 }
 0x25b   : > { %v1235_v32 = vadd.f32 1e-06, %v1227_v31 }
 0x25d   : > { %2899 = vrcp.f32 %v1235_v32 }
 0x263   : > { %v2898_v35 = vpop.eup %2897 }
 0x264   : > { %v757_v37 = vmul.f32 %v2898_v35, %v754_v34 }
 0x266   : > { %v764_v39 = vadd.f32 %v2538_v36, %v757_v37 }
 0x267   : > { %v2900_v40 = vpop.eup %2899 }
 0x268   : > { %v765_v42 = vpack.c.bf16 %v764_v39, %v764_v39  ;;  %v1237_v43 = vmul.f32 %v2900_v40, %v1234_v38 }
 0x26a   : > { %2628 = vmatmul.mubr.msk.bf16.vlgmr.msra.gmra.mrb[0].mxu0 %vm729_vm0, %v765_v42  ;;  %2636 = vmatmul.mubr.msk.bf16.vlgmr.msra.gmra.mrb[0].mxu1 %vm729_vm0, %v765_v42  ;;  %v1244_v45 = vadd.f32 %v2538_v36, %v1237_v43 }
 0x26b   : > { %2640 = vmatpush3.bf16.msra.mxu0 %v2883_v41  ;;  %2643 = vmatprep.mubr.msk.bf16.mxu0 %vm3288_vm1, %v3287_v14 }
 0x26c   : > { %2641 = vmatprep.subr.bf16.mxu0 %v3287_v14  ;;  %2649 = vmatprep.mubr.msk.bf16.mxu1 %vm3288_vm1, %v3287_v14  ;;  %v1245_v46 = vpack.c.bf16 %v1244_v45, %v1244_v45 }
 0x26f   : > { %2642 = vmatpush3.bf16.msra.mxu0 %v2884_v44 }
 0x270   : > { %2653 = vmatprep.subr.bf16.mxu0 %v3287_v14 }
 0x272   : > { %2644 = vmatmul.mubr.msk.bf16.vlgmr.msra.gmra.mrb[4].mxu0 %vm729_vm0, %v1245_v46 }
 0x273   : > { %2655 = vmatprep.mubr.msk.bf16.mxu0 %vm3288_vm1, %v3287_v14 }
 0x33d   : > { %v826_v48 = vpop.f32.mrb[0].mxu0  ;;  %v3770_v49 = vpop.f32.mrb[0].mxu1 }
 0x33e   : > { %v827_v50 = vadd.f32 %v2539_v47, %v826_v48  ;;  %v2629_v51 = vpop.f32.mrb[1].mxu0  ;;  %v2637_v52 = vpop.f32.mrb[1].mxu1 }
 0x33f   : > { %v829_v53 = vpop.f32.mrb[2].mxu0  ;;  %v892_v54 = vpop.f32.mrb[2].mxu1 }
 0x340   : > { %v2638_v55 = vpop.f32.mrb[3].mxu1  ;;  %896 = vrot.lane.b32.xlu0 %v827_v50, %s3289_s26  ;;  %v2630_v56 = vpop.f32.mrb[3].mxu0  ;;  %899 = vrot.lane.b32.xlu1 %v827_v50, %s3290_s22 }
 0x344   : > { %902 = vrot.lane.b32.xlu1 %v827_v50, %s3291_s15 }
 0x345   : > { %v1306_v58 = vpop.f32.mrb[4].mxu0 }
 0x346   : > { %v1307_v59 = vadd.f32 %v2553_v57, %v1306_v58  ;;  %v2645_v60 = vpop.f32.mrb[5].mxu0 }
 0x347   : > { %v1309_v61 = vpop.f32.mrb[6].mxu0 }
 0x348   : > { %v1312_v62 = vmul.f32 0.35355338, %v1307_v59  ;;  %v2646_v63 = vpop.f32.mrb[7].mxu0 }
 0x34a   : > { %1317 = vrot.lane.b32.xlu0 %v1312_v62, %s3290_s22  ;;  %1314 = vrot.lane.b32.xlu1 %v1312_v62, %s3289_s26 }
 0x34e   : > { %1320 = vrot.lane.b32.xlu1 %v1312_v62, %s3291_s15 }
 0x3b2   : > { %v900_v7 = vpop.permute.xlu1 %899  ;;  %v897_v12 = vpop.permute.xlu0 %896 }
 0x3b3   : > { %v905_v10 = vcombine.low %v827_v50, %v900_v7  ;;  %v906_v11 = vcombine.high %v827_v50, %v900_v7 }
 0x3b5   : > { %v913_v18 = vrot.slane %v905_v10, %v3781_v9  ;;  %v920_v19 = vrot.slane %v906_v11, %v3781_v9 }
 0x3b6   : > { %v903_v13 = vpop.permute.xlu1 %902 }
 0x3b7   : > { %v921_v15 = vcombine.low %v897_v12, %v903_v13  ;;  %v922_v16 = vcombine.high %v897_v12, %v903_v13 }
 0x3b9   : > { %v929_v20 = vrot.slane %v921_v15, %v3781_v9  ;;  %v936_v21 = vrot.slane %v922_v16, %v3781_v9 }
 0x3bb   : > { %v937_v22 = vcombine.low %v913_v18, %v929_v20  ;;  %v938_v23 = vcombine.high %v913_v18, %v929_v20  ;;  %v953_v24 = vcombine.low %v920_v19, %v936_v21  ;;  %v954_v25 = vcombine.high %v920_v19, %v936_v21 }
 0x3bc   : > { %v1315_v26 = vpop.permute.xlu1 %1314  ;;  %v1318_v31 = vpop.permute.xlu0 %1317 }
 0x3bd   : > { %v945_v27 = vrot.slane %v937_v22, %v3784_v17  ;;  %v952_v28 = vrot.slane %v938_v23, %v3784_v17  ;;  %v961_v29 = vrot.slane %v953_v24, %v3784_v17  ;;  %v968_v30 = vrot.slane %v954_v25, %v3784_v17 }
 0x3be   : > { %v1323_v36 = vcombine.low %v1312_v62, %v1318_v31  ;;  %v1324_v37 = vcombine.high %v1312_v62, %v1318_v31 }
 0x3bf   : > { %v973_v32 = vcombine.low %v945_v27, %v952_v28  ;;  %v2547_v33 = vcombine.high %v945_v27, %v952_v28  ;;  %v989_v34 = vcombine.low %v961_v29, %v968_v30  ;;  %v2548_v35 = vcombine.high %v961_v29, %v968_v30 }
 0x3c0   : > { %v1321_v38 = vpop.permute.xlu1 %1320  ;;  %v1331_v50 = vrot.slane %v1323_v36, %v3781_v9  ;;  %v1338_v51 = vrot.slane %v1324_v37, %v3781_v9 }
 0x3c1   : > { %v980_v39 = vrot.slane %v973_v32, %v3781_v9  ;;  %v988_v40 = vrot.slane %v2547_v33, %v3781_v9  ;;  %v996_v41 = vrot.slane %v989_v34, %v3781_v9  ;;  %v1004_v42 = vrot.slane %v2548_v35, %v3781_v9 }
 0x3c2   : > { %v1339_v43 = vcombine.low %v1315_v26, %v1321_v38  ;;  %v1340_v44 = vcombine.high %v1315_v26, %v1321_v38 }
 0x3c3   : > { %v1005_v45 = vcombine.low %v980_v39, %v988_v40  ;;  %v1006_v46 = vcombine.high %v980_v39, %v988_v40  ;;  %v1021_v47 = vcombine.low %v996_v41, %v1004_v42  ;;  %v1022_v48 = vcombine.high %v996_v41, %v1004_v42 }
 0x3c4   : > { %v1347_v52 = vrot.slane %v1339_v43, %v3781_v9  ;;  %v1354_v53 = vrot.slane %v1340_v44, %v3781_v9 }
 0x3c5   : > { %v1013_v54 = vrot.slane %v1005_v45, %v3784_v17  ;;  %v1020_v55 = vrot.slane %v1006_v46, %v3784_v17  ;;  %v1029_v56 = vrot.slane %v1021_v47, %v3784_v17  ;;  %v1036_v57 = vrot.slane %v1022_v48, %v3784_v17  ;;  %v1463_v46 = vld [vmem:[%s629_s24] sm:$0x1] }
 0x3c6   : > { %v1355_v58 = vcombine.low %v1331_v50, %v1347_v52  ;;  %v1356_v59 = vcombine.high %v1331_v50, %v1347_v52  ;;  %v1371_v60 = vcombine.low %v1338_v51, %v1354_v53  ;;  %v1372_v61 = vcombine.high %v1338_v51, %v1354_v53 }
 0x3c7   : > { %v1037_v62 = vcombine.low %v1013_v54, %v1029_v56  ;;  %v1038_v63 = vcombine.high %v1013_v54, %v1029_v56  ;;  %v1039_v0 = vcombine.low %v1020_v55, %v1036_v57  ;;  %v1040_v1 = vcombine.high %v1020_v55, %v1036_v57 }
 0x3c8   : > { %v1363_v2 = vrot.slane %v1355_v58, %v3784_v17  ;;  %v1370_v3 = vrot.slane %v1356_v59, %v3784_v17  ;;  %v1379_v4 = vrot.slane %v1371_v60, %v3784_v17  ;;  %v1386_v5 = vrot.slane %v1372_v61, %v3784_v17 }
 0x3c9   : > { %v1041_v7 = vpack.c.bf16 %v1037_v62, %v1037_v62  ;;  %v1042_v8 = vpack.c.bf16 %v1038_v63, %v1038_v63  ;;  %v1043_v10 = vpack.c.bf16 %v1039_v0, %v1039_v0  ;;  %v1044_v11 = vpack.c.bf16 %v1040_v1, %v1040_v1 }
 0x3ca   : > { %v1391_v12 = vcombine.low %v1363_v2, %v1370_v3  ;;  %v2557_v13 = vcombine.high %v1363_v2, %v1370_v3  ;;  %v1407_v15 = vcombine.low %v1379_v4, %v1386_v5  ;;  %v2558_v16 = vcombine.high %v1379_v4, %v1386_v5 }
 0x3cb   : > { %1046 = vst.msk [vmem:[#allocation2] sm:$0xf] %vm1045_vm6, %v1041_v7  ;;  %1047 = vst.msk [vmem:[#allocation2 + $0x4] sm:$0xf] %vm1045_vm6, %v1042_v8  ;;  %vm1464_vm8 = vcmp.eq.f32.partialorder %v1463_v46, 0.0  ;;  %v1473_v47 = vsub.s32 0, %v3778_v6 }
 0x3cc   : > { %1048 = vst.msk [vmem:[#allocation2 + $0x8] sm:$0xf] %vm1045_vm6, %v1043_v10  ;;  %1049 = vst.msk [vmem:[#allocation2 + $0xc] sm:$0xf] %vm1045_vm6, %v1044_v11  ;;  %v1398_v18 = vrot.slane %v1391_v12, %v3781_v9  ;;  %v1406_v19 = vrot.slane %v2557_v13, %v3781_v9  ;;  %v1414_v20 = vrot.slane %v1407_v15, %v3781_v9  ;;  %v1465_v48 = vsel %vm1464_vm8, -1e+09, %v3287_v14 }
 0x3cd   : > { %v1422_v21 = vrot.slane %v2558_v16, %v3781_v9  ;;  %v1474_v50 = vrot.slane %v1465_v48, %v1473_v47  ;;  %v2543_v12 = vld [vmem:[#allocation13] ss:$0 sm:$0xff] }
 0x3ce   : > { %v1423_v22 = vcombine.low %v1398_v18, %v1406_v19  ;;  %v1424_v30 = vcombine.high %v1398_v18, %v1406_v19  ;;  %v890_v13 = vadd.f32 %v2543_v12, %v3770_v49 }
 0x3cf   : > { %v1439_v23 = vcombine.low %v1414_v20, %v1422_v21  ;;  %v1440_v31 = vcombine.high %v1414_v20, %v1422_v21 }
 0x3d0   : > { %v1431_v24 = vrot.slane %v1423_v22, %v3784_v17  ;;  %v1438_v38 = vrot.slane %v1424_v30, %v3784_v17 }
 0x3d1   : > { %v1447_v25 = vrot.slane %v1439_v23, %v3784_v17  ;;  %v1454_v39 = vrot.slane %v1440_v31, %v3784_v17 }
 0x3d2   : > { %v1466_v26 = vld [vmem:[#allocation2] sm:$0xf]  ;;  %v1467_v27 = vld [vmem:[#allocation2 + $0x4] sm:$0xf] }
 0x3d3   : > { %v1481_v28 = vsel %vm1476_vm7, %v1466_v26, 0  ;;  %v1527_v29 = vsel %vm1476_vm7, %v1467_v27, 0  ;;  %v1455_v32 = vcombine.low %v1431_v24, %v1447_v25  ;;  %v1456_v33 = vcombine.high %v1431_v24, %v1447_v25  ;;  %v1468_v34 = vld [vmem:[#allocation2 + $0x8] sm:$0xf]  ;;  %v1469_v35 = vld [vmem:[#allocation2 + $0xc] sm:$0xf] }
 0x3d4   : > { %2648 = vmatpush3.bf16.xpose.msra.mxu1 %v1481_v28  ;;  %2654 = vmatpush3.bf16.xpose.msra.mxu0 %v1527_v29  ;;  %v1573_v40 = vsel %vm1476_vm7, %v1468_v34, 0  ;;  %v1619_v41 = vsel %vm1476_vm7, %v1469_v35, 0  ;;  %v1457_v42 = vcombine.low %v1438_v38, %v1454_v39  ;;  %v1458_v43 = vcombine.high %v1438_v38, %v1454_v39 }
 0x3d5   : > { %2659 = vmatprep.subr.bf16.mxu1 %v3287_v14  ;;  %2665 = vmatprep.subr.bf16.mxu0 %v3287_v14  ;;  %v1459_v36 = vpack.c.bf16 %v1455_v32, %v1455_v32  ;;  %v1460_v37 = vpack.c.bf16 %v1456_v33, %v1456_v33 }
 0x3d6   : > { %v1461_v44 = vpack.c.bf16 %v1457_v42, %v1457_v42  ;;  %v1462_v45 = vpack.c.bf16 %v1458_v43, %v1458_v43 }
 0x3db   : > { %2650 = vmatmul.mubr.msk.bf16.vlgmr.msra.gmra.mrb[4].mxu1 %vm1476_vm7, %v1459_v36  ;;  %2656 = vmatmul.mubr.msk.bf16.vlgmr.msra.gmra.mrb[8].mxu0 %vm1476_vm7, %v1460_v37 }
 0x3dc   : > { %2660 = vmatpush3.bf16.xpose.msra.mxu1 %v1573_v40  ;;  %2666 = vmatpush3.bf16.xpose.msra.mxu0 %v1619_v41 }
 0x3dd   : > { %2661 = vmatprep.mubr.msk.bf16.mxu1 %vm3288_vm1, %v3287_v14  ;;  %2667 = vmatprep.mubr.msk.bf16.mxu0 %vm3288_vm1, %v3287_v14 }
 0x3de   : > { %2671 = vmatprep.subr.bf16.mxu1 %v3287_v14  ;;  %2677 = vmatprep.subr.bf16.mxu0 %v3287_v14 }
 0x3e3   : > { %2662 = vmatmul.mubr.msk.bf16.vlgmr.msra.gmra.mrb[8].mxu1 %vm1476_vm7, %v1461_v44  ;;  %2668 = vmatmul.mubr.msk.bf16.vlgmr.msra.gmra.mrb[12].mxu0 %vm1476_vm7, %v1462_v45 }
 0x3e4   : > { %2673 = vmatprep.mubr.msk.bf16.mxu1 %vm3288_vm1, %v3287_v14  ;;  %2679 = vmatprep.mubr.msk.bf16.mxu0 %vm3288_vm1, %v3287_v14 }
 0x4ae   : > { %v1517_v51 = vpop.f32.mrb[4].mxu1  ;;  %v1563_v52 = vpop.f32.mrb[8].mxu0 }
 0x4af   : > { %v1518_v53 = vadd.f32 %v1517_v51, %v1474_v50  ;;  %v1564_v54 = vadd.f32 %v1563_v52, %v1474_v50  ;;  %v2651_v55 = vpop.f32.mrb[5].mxu1  ;;  %v2657_v56 = vpop.f32.mrb[9].mxu0 }
 0x4b0   : > { %v1520_v57 = vpop.f32.mrb[6].mxu1  ;;  %v1566_v58 = vpop.f32.mrb[10].mxu0 }
 0x4b1   : > { %v2652_v59 = vpop.f32.mrb[7].mxu1  ;;  %v2658_v60 = vpop.f32.mrb[11].mxu0  ;;  %v1664_v61 = vsel %vm1476_vm7, %v1564_v54, -inf  ;;  %v1661_v62 = vsel %vm1476_vm7, %v1518_v53, -inf }
 0x4b2   : > { %1665 = vmax.xlane.f32.xlu1 %v1664_v61  ;;  %1662 = vmax.xlane.f32.xlu0 %v1661_v62 }
 0x4b6   : > { %v1609_v6 = vpop.f32.mrb[8].mxu1  ;;  %v1655_v63 = vpop.f32.mrb[12].mxu0 }
 0x4b7   : > { %v1610_v0 = vadd.f32 %v1609_v6, %v1474_v50  ;;  %v2663_v1 = vpop.f32.mrb[9].mxu1  ;;  %v2669_v2 = vpop.f32.mrb[13].mxu0  ;;  %v1656_v5 = vadd.f32 %v1655_v63, %v1474_v50 }
 0x4b8   : > { %v1612_v3 = vpop.f32.mrb[10].mxu1  ;;  %v1658_v4 = vpop.f32.mrb[14].mxu0 }
 0x4b9   : > { %v2664_v7 = vpop.f32.mrb[11].mxu1  ;;  %v2670_v8 = vpop.f32.mrb[15].mxu0  ;;  %v1667_v10 = vsel %vm1476_vm7, %v1610_v0, -inf  ;;  %v1670_v11 = vsel %vm1476_vm7, %v1656_v5, -inf }
 0x4ba   : > { %1668 = vmax.xlane.f32.xlu0 %v1667_v10 }
 0x4be   : > { %1671 = vmax.xlane.f32.xlu0 %v1670_v11 }
 0x4c3   : > { %1054 = vrot.lane.b32.xlu1 %v890_v13, %s3290_s22  ;;  %s2584_s22 = sshll.u32 %s3266_s30, 7  ;;  %s2333_s30 = scalar_lea.sflag [#allocation6], %s3699_s7 }
 0x4c7   : > { %1057 = vrot.lane.b32.xlu1 %v890_v13, %s3291_s15  ;;  %s4093_s15 = sld [smem:[#allocation34_spill]] }
 0x4d4   : > { %1051 = vrot.lane.b32.xlu0 %v890_v13, %s3289_s26  ;;  %s4096_s26 = sld [smem:[#allocation37_spill]] }
 0x53f   : > { %v1666_v15 = vpop.xlane.xlu1 %1665  ;;  %v1663_v16 = vpop.xlane.xlu0 %1662 }
 0x540   : > { %v1674_v18 = vsub.f32 %v1564_v54, %v1666_v15  ;;  %v1673_v19 = vsub.f32 %v1518_v53, %v1663_v16 }
 0x542   : > { %v1679_v20 = vmul.f32 1.442695, %v1674_v18  ;;  %v1677_v21 = vmul.f32 1.442695, %v1673_v19 }
 0x543   : > { %v1055_v24 = vpop.permute.xlu1 %1054 }
 0x544   : > { %2901 = vpow2.f32 %v1679_v20  ;;  %v1060_v28 = vcombine.low %v890_v13, %v1055_v24  ;;  %v1061_v29 = vcombine.high %v890_v13, %v1055_v24 }
 0x545   : > { %2903 = vpow2.f32 %v1677_v21 }
 0x546   : > { %v1068_v38 = vrot.slane %v1060_v28, %v3781_v9  ;;  %v1075_v39 = vrot.slane %v1061_v29, %v3781_v9 }
 0x547   : > { %v1669_v22 = vpop.xlane.xlu0 %1668  ;;  %v1058_v32 = vpop.permute.xlu1 %1057 }
 0x548   : > { %v1675_v23 = vsub.f32 %v1610_v0, %v1669_v22 }
 0x54a   : > { %v1681_v25 = vmul.f32 1.442695, %v1675_v23 }
 0x54b   : > { %v1672_v26 = vpop.xlane.xlu0 %1671 }
 0x54c   : > { %2905 = vpow2.f32 %v1681_v25  ;;  %v1676_v49 = vsub.f32 %v1656_v5, %v1672_v26 }
 0x54e   : > { %v3854_v27 = vpop.eup %2901  ;;  %v1683_v30 = vmul.f32 1.442695, %v1676_v49 }
 0x54f   : > { %v3856_v31 = vpop.eup %2903  ;;  %v1052_v33 = vpop.permute.xlu0 %1051  ;;  %v1688_v34 = vsel %vm1476_vm7, %v3854_v27, 0.0 }
 0x550   : > { %2907 = vpow2.f32 %v1683_v30  ;;  %v1076_v35 = vcombine.low %v1052_v33, %v1058_v32  ;;  %v1077_v36 = vcombine.high %v1052_v33, %v1058_v32  ;;  %v1685_v37 = vsel %vm1476_vm7, %v3856_v31, 0.0  ;;  %1689 = vadd.xlane.f32.xlu0 %v1688_v34 }
 0x551   : > { %1686 = vadd.xlane.f32.xlu1 %v1685_v37 }
 0x552   : > { %v1084_v40 = vrot.slane %v1076_v35, %v3781_v9  ;;  %v1091_v41 = vrot.slane %v1077_v36, %v3781_v9 }
 0x554   : > { %v1092_v42 = vcombine.low %v1068_v38, %v1084_v40  ;;  %v1093_v43 = vcombine.high %v1068_v38, %v1084_v40  ;;  %v1108_v44 = vcombine.low %v1075_v39, %v1091_v41  ;;  %v1109_v45 = vcombine.high %v1075_v39, %v1091_v41  ;;  %v2885_v41 = vld [vmem:[%s4092_s3] sm:$0xff]  }
 0x556   : > { %v3866_v46 = vpop.eup %2905  ;;  %v1100_v47 = vrot.slane %v1092_v42, %v3784_v17  ;;  %v1107_v48 = vrot.slane %v1093_v43, %v3784_v17  ;;  %v1116_v50 = vrot.slane %v1108_v44, %v3784_v17  ;;  %v1123_v51 = vrot.slane %v1109_v45, %v3784_v17 }
 0x557   : > { %v1691_v52 = vsel %vm1476_vm7, %v3866_v46, 0.0 }
 0x558   : > { %v1128_v53 = vcombine.low %v1100_v47, %v1107_v48  ;;  %v2549_v54 = vcombine.high %v1100_v47, %v1107_v48  ;;  %v1144_v55 = vcombine.low %v1116_v50, %v1123_v51  ;;  %v2550_v56 = vcombine.high %v1116_v50, %v1123_v51  ;;  %1692 = vadd.xlane.f32.xlu0 %v1691_v52 }
 0x55a   : > { %v3874_v57 = vpop.eup %2907  ;;  %v1135_v58 = vrot.slane %v1128_v53, %v3781_v9  ;;  %v1143_v59 = vrot.slane %v2549_v54, %v3781_v9  ;;  %v1151_v60 = vrot.slane %v1144_v55, %v3781_v9  ;;  %v1159_v61 = vrot.slane %v2550_v56, %v3781_v9 }
 0x55b   : > { %v1694_v62 = vsel %vm1476_vm7, %v3874_v57, 0.0 }
 0x55c   : > { %v1160_v6 = vcombine.low %v1135_v58, %v1143_v59  ;;  %v1161_v63 = vcombine.high %v1135_v58, %v1143_v59  ;;  %v1176_v0 = vcombine.low %v1151_v60, %v1159_v61  ;;  %v1177_v1 = vcombine.high %v1151_v60, %v1159_v61  ;;  %1695 = vadd.xlane.f32.xlu0 %v1694_v62 }
 0x55e   : > { %v1168_v2 = vrot.slane %v1160_v6, %v3784_v17  ;;  %v1175_v3 = vrot.slane %v1161_v63, %v3784_v17  ;;  %v1184_v4 = vrot.slane %v1176_v0, %v3784_v17  ;;  %v1191_v5 = vrot.slane %v1177_v1, %v3784_v17 }
 0x560   : > { %v1192_v7 = vcombine.low %v1168_v2, %v1184_v4  ;;  %v1193_v8 = vcombine.high %v1168_v2, %v1184_v4  ;;  %v1194_v10 = vcombine.low %v1175_v3, %v1191_v5  ;;  %v1195_v11 = vcombine.high %v1175_v3, %v1191_v5 }
 0x562   : > { %v1196_v12 = vpack.c.bf16 %v1192_v7, %v1192_v7  ;;  %v1197_v13 = vpack.c.bf16 %v1193_v8, %v1193_v8  ;;  %v1198_v15 = vpack.c.bf16 %v1194_v10, %v1194_v10  ;;  %v1199_v16 = vpack.c.bf16 %v1195_v11, %v1195_v11 }
 0x563   : > { %v3294_v10 = vmov 0  }
 0x564   : > { %1200 = vst.msk [vmem:[#allocation3] sm:$0xf] %vm1045_vm6, %v1196_v12  ;;  %1201 = vst.msk [vmem:[#allocation3 + $0x4] sm:$0xf] %vm1045_vm6, %v1197_v13 }
 0x565   : > { %1202 = vst.msk [vmem:[#allocation3 + $0x8] sm:$0xf] %vm1045_vm6, %v1198_v15  ;;  %1203 = vst.msk [vmem:[#allocation3 + $0xc] sm:$0xf] %vm1045_vm6, %v1199_v16 }
 0x56b   : > { %v1709_v18 = vld [vmem:[#allocation3] sm:$0xf]  ;;  %v1710_v19 = vld [vmem:[#allocation3 + $0x4] sm:$0xf] }
 0x56c   : > { %v1718_v20 = vsel %vm1716_vm9, %v1709_v18, 0  ;;  %v1764_v21 = vsel %vm1716_vm9, %v1710_v19, 0  ;;  %v1712_v30 = vld [vmem:[#allocation3 + $0xc] sm:$0xf]  ;;  %v1711_v33 = vld [vmem:[#allocation3 + $0x8] sm:$0xf] }
 0x56d   : > { %2672 = vmatpush3.bf16.msra.mxu1 %v1718_v20  ;;  %2678 = vmatpush3.bf16.msra.mxu0 %v1764_v21  ;;  %v1856_v35 = vsel %vm1716_vm9, %v1712_v30, 0  ;;  %v1810_v36 = vsel %vm1716_vm9, %v1711_v33, 0 }
 0x56e   : > { %2683 = vmatprep.subr.bf16.mxu1 %v3287_v14  ;;  %2689 = vmatprep.subr.bf16.mxu0 %v3287_v14 }
 0x5dd   : > { %v1690_v22 = vpop.xlane.xlu0 %1689 }
 0x5de   : > { %v1687_v23 = vpop.xlane.xlu1 %1686  ;;  %2909 = vrcp.f32 %v1690_v22 }
 0x5df   : > { %2911 = vrcp.f32 %v1687_v23 }
 0x5e5   : > { %v1693_v24 = vpop.xlane.xlu0 %1692 }
 0x5e6   : > { %2913 = vrcp.f32 %v1693_v24 }
 0x5e8   : > { %v2910_v25 = vpop.eup %2909 }
 0x5e9   : > { %v2912_v26 = vpop.eup %2911  ;;  %v1702_v49 = vmul.f32 %v2910_v25, %v3854_v27  ;;  %v1696_v28 = vpop.xlane.xlu0 %1695 }
 0x5ea   : > { %v1701_v29 = vmul.f32 %v2912_v26, %v3856_v31  ;;  %2915 = vrcp.f32 %v1696_v28 }
 0x5eb   : > { %v1706_v32 = vpack.c.bf16 %v1702_v49, %v1702_v49 }
 0x5ec   : > { %v1705_v34 = vpack.c.bf16 %v1701_v29, %v1701_v29 }
 0x5ed   : > { %2680 = vmatmul.mubr.msk.bf16.vlgmr.msra.gmra.mrb[16].mxu0 %vm1476_vm7, %v1706_v32 }
 0x5ee   : > { %2674 = vmatmul.mubr.msk.bf16.vlgmr.msra.gmra.mrb[12].mxu1 %vm1476_vm7, %v1705_v34  ;;  %2690 = vmatpush3.bf16.msra.mxu0 %v1856_v35 }
 0x5ef   : > { %2684 = vmatpush3.bf16.msra.mxu1 %v1810_v36  ;;  %2685 = vmatprep.mubr.msk.bf16.mxu1 %vm3288_vm1, %v3287_v14 }
 0x5f0   : > { %v2914_v27 = vpop.eup %2913  ;;  %2691 = vmatprep.mubr.msk.bf16.mxu0 %vm3288_vm1, %v3287_v14  ;;  %2695 = vmatprep.subr.bf16.mxu1 %v3287_v14 }
 0x5f1   : > { %v1703_v31 = vmul.f32 %v2914_v27, %v3866_v46  ;;  %2703 = vmatprep.subr.bf16.mxu0 %v3287_v14 }
 0x5f3   : > { %v1707_v37 = vpack.c.bf16 %v1703_v31, %v1703_v31 }
 0x5f4   : > { %v2916_v38 = vpop.eup %2915 }
 0x5f5   : > { %v1704_v39 = vmul.f32 %v2916_v38, %v3874_v57 }
 0x5f6   : > { %2686 = vmatmul.mubr.msk.bf16.vlgmr.msra.gmra.mrb[16].mxu1 %vm1476_vm7, %v1707_v37 }
 0x5f7   : > { %v1708_v40 = vpack.c.bf16 %v1704_v39, %v1704_v39  ;;  %2699 = vmatprep.mubr.msk.bf16.mxu1 %vm3288_vm1, %v3287_v14  ;;  %2696 = vmatpush3.bf16.msra.mxu1 %v2885_v41 }
 0x5f8   : > { %2697 = vmatprep.subr.bf16.mxu1 %v3287_v14 }
 0x5f9   : > { %2692 = vmatmul.mubr.msk.bf16.vlgmr.msra.gmra.mrb[20].mxu0 %vm1476_vm7, %v1708_v40  ;;  %v2886_v40 = vld [vmem:[%s4092_s3 + $0x8] sm:$0xff]  }
 0x5fa   : > { %2707 = vmatprep.mubr.msk.bf16.mxu0 %vm3288_vm1, %v3287_v14 }
 0x5fb   : > { %2698 = vmatpush3.bf16.msra.mxu1 %v2886_v40 }
 0x5fc   : > { %2711 = vmatprep.subr.bf16.mxu1 %v3287_v14 }
 0x6c0   : > { %v1800_v42 = vpop.f32.mrb[16].mxu0 }
 0x6c1   : > { %v1754_v43 = vpop.f32.mrb[12].mxu1  ;;  %v2681_v44 = vpop.f32.mrb[17].mxu0  ;;  %v1932_v55 = vpack.c.bf16 %v1800_v42, %v1800_v42 }
 0x6c2   : > { %v2675_v45 = vpop.f32.mrb[13].mxu1  ;;  %v1803_v46 = vpop.f32.mrb[18].mxu0  ;;  %v1898_v51 = vpack.c.bf16 %v1754_v43, %v1754_v43 }
 0x6c3   : > { %v1757_v47 = vpop.f32.mrb[14].mxu1  ;;  %v2682_v48 = vpop.f32.mrb[19].mxu0  ;;  %v1939_v1 = vrot.slane %v1932_v55, %v3781_v9 }
 0x6c4   : > { %v2676_v50 = vpop.f32.mrb[15].mxu1  ;;  %v1905_v57 = vrot.slane %v1898_v51, %v3781_v9 }
 0x6c9   : > { %v1846_v52 = vpop.f32.mrb[16].mxu1 }
 0x6ca   : > { %v1906_v53 = vpack.c.bf16 %v1846_v52, %v1846_v52  ;;  %v2687_v54 = vpop.f32.mrb[17].mxu1 }
 0x6cb   : > { %v1849_v56 = vpop.f32.mrb[18].mxu1 }
 0x6cc   : > { %v1913_v58 = vrot.slane %v1906_v53, %v3781_v9  ;;  %v2688_v59 = vpop.f32.mrb[19].mxu1  ;;  %v1892_v60 = vpop.f32.mrb[20].mxu0 }
 0x6cd   : > { %v1940_v61 = vpack.c.bf16 %v1892_v60, %v1892_v60  ;;  %v2693_v62 = vpop.f32.mrb[21].mxu0 }
 0x6ce   : > { %v1914_v6 = vcombine.low %v1905_v57, %v1913_v58  ;;  %v1915_v63 = vcombine.high %v1905_v57, %v1913_v58  ;;  %v1895_v0 = vpop.f32.mrb[22].mxu0  ;;  %v2567_v62 = vld [vmem:[#allocation15] ss:$0 sm:$0xff] }
 0x6cf   : > { %v1947_v2 = vrot.slane %v1940_v61, %v3781_v9  ;;  %v2694_v3 = vpop.f32.mrb[23].mxu0 }
 0x6d0   : > { %v1922_v4 = vrot.slane %v1914_v6, %v3784_v17  ;;  %v1929_v5 = vrot.slane %v1915_v63, %v3784_v17 }
 0x6d1   : > { %v1948_v7 = vcombine.low %v1939_v1, %v1947_v2  ;;  %v1949_v8 = vcombine.high %v1939_v1, %v1947_v2  ;;  %v2921_v2 = vld [vmem:[%s3728_s18] sm:$0xff] }
 0x6d2   : > { %v1930_v11 = vcombine.high %v1922_v4, %v3294_v10  ;;  %v1931_v15 = vcombine.high %v1929_v5, %v3294_v10  ;;  %v1970_v16 = vshrl.u32 %v1922_v4, 16  ;;  %v1986_v23 = vshrl.u32 %v1929_v5, 16 }
 0x6d3   : > { %v1956_v12 = vrot.slane %v1948_v7, %v3784_v17  ;;  %v1963_v13 = vrot.slane %v1949_v8, %v3784_v17 }
 0x6d4   : > { %v1978_v22 = vshrl.u32 %v1930_v11, 16  ;;  %v1994_v30 = vshrl.u32 %v1931_v15, 16 }
 0x6d5   : > { %v1964_v18 = vcombine.high %v1956_v12, %v3294_v10  ;;  %v1965_v19 = vcombine.high %v1963_v13, %v3294_v10  ;;  %v1968_v20 = vpack.i.b16 %v1956_v12, %v1922_v4  ;;  %v1971_v21 = vshrl.u32 %v1956_v12, 16 }
 0x6d6   : > { %v1984_v24 = vpack.i.b16 %v1963_v13, %v1929_v5  ;;  %v1987_v25 = vshrl.u32 %v1963_v13, 16  ;;  %v2887_v13 = vld [vmem:[%s4093_s15] sm:$0xff]  }
 0x6d7   : > { %v1972_v26 = vpack.i.b16 %v1971_v21, %v1970_v16  ;;  %v1976_v49 = vpack.i.b16 %v1964_v18, %v1930_v11  ;;  %v1979_v28 = vshrl.u32 %v1964_v18, 16  ;;  %v1992_v29 = vpack.i.b16 %v1965_v19, %v1931_v15  ;;  %2704 = vmatpush3.bf16.msra.mxu0 %v2887_v13  ;;  %v2888_v15 = vld [vmem:[%s4093_s15 + $0x8] sm:$0xff]   ;;  %v2889_v16 = vld [vmem:[%s4094_s2] sm:$0xff]  }
 0x6d8   : > { %v1988_v32 = vpack.i.b16 %v1987_v25, %v1986_v23  ;;  %v1995_v33 = vshrl.u32 %v1965_v19, 16  ;;  %v1998_v34 = vcombine.low %v1968_v20, %v1984_v24  ;;  %2705 = vmatprep.subr.bf16.mxu0 %v3287_v14  ;;  %v2890_v18 = vld [vmem:[%s4094_s2 + $0x8] sm:$0xff]  }
 0x6d9   : > { %v1980_v35 = vpack.i.b16 %v1979_v28, %v1978_v22  ;;  %v2006_v36 = vcombine.low %v1976_v49, %v1992_v29  ;;  %v2571_v49 = vld [vmem:[#allocation16] ss:$0 sm:$0xff] }
 0x6da   : > { %v1996_v27 = vpack.i.b16 %v1995_v33, %v1994_v30  ;;  %v2023_v31 = vcombine.low %v1972_v26, %v1988_v32  ;;  %v2005_v37 = vrot.slane %v1998_v34, %v3781_v9  ;;  %v2572_v30 = vld [vmem:[#allocation18] ss:$0 sm:$0xff] }
 0x6db   : > { %v2013_v38 = vrot.slane %v2006_v36, %v3781_v9  ;;  %2706 = vmatpush3.bf16.msra.mxu0 %v2888_v15  ;;  %v2892_v36 = vld [vmem:[%s4094_s2 + $0x18] sm:$0xff]  }
 0x6dc   : > { %v2031_v39 = vcombine.low %v1980_v35, %v1996_v27  ;;  %v2030_v42 = vrot.slane %v2023_v31, %v3781_v9  ;;  %v2891_v35 = vld [vmem:[%s4094_s2 + $0x10] sm:$0xff]   ;;  %v2573_v27 = vld [vmem:[%s4095_s21] ss:$0 sm:$0xff]  ;;  %s4097_s2 = sld [smem:[#allocation38_spill]] }
 0x6dd   : > { %v2014_v41 = vcombine.low %v2005_v37, %v2013_v38 }
 0x6de   : > { %v2038_v43 = vrot.slane %v2031_v39, %v3781_v9 }
 0x6df   : > { %v2021_v44 = vrot.slane %v2014_v41, %v3784_v17 }
 0x6e0   : > { %v2039_v45 = vcombine.low %v2030_v42, %v2038_v43  ;;  %v2582_v43 = vld [vmem:[%s4096_s26] ss:$0 sm:$0xff] }
 0x6e1   : > { %v2022_v47 = vcombine.high %v2021_v44, %v3294_v10  ;;  %v2051_v48 = vshrl.u32 %v2021_v44, 16 }
 0x6e2   : > { %v2046_v46 = vrot.slane %v2039_v45, %v3784_v17  ;;  %s3977_s3 = scalar_lea.hbm %s4097_s2, %s2584_s22 }
 0x6e3   : > { %v2057_v55 = vshrl.u32 %v2022_v47, 16 }
 0x6e4   : > { %v2052_v50 = vshrl.u32 %v2046_v46, 16  ;;  %v2047_v51 = vcombine.high %v2046_v46, %v3294_v10  ;;  %v2050_v52 = vpack.i.b16 %v2046_v46, %v2021_v44 }
 0x6e6   : > { %v2053_v53 = vpack.i.b16 %v2052_v50, %v2051_v48  ;;  %v2056_v54 = vpack.i.b16 %v2047_v51, %v2022_v47  ;;  %v2058_v56 = vshrl.u32 %v2047_v51, 16 }
 0x6e8   : > { %2060 = vrot.lane.b32.xlu1 %v2053_v53, %s3295_s16  ;;  %2062 = vrot.lane.b32.xlu0 %v2056_v54, %s3296_s25  ;;  %v2059_v9 = vpack.i.b16 %v2058_v56, %v2057_v55  ;;  %s2535_s16 = sshll.u32 %s3699_s7, 3  ;;  %s3298_s25 = smov [#allocation19]  }
 0x6e9   : > { %s716_s24 = scalar_lea.vmem [#allocation19], %s2535_s16 }
 0x6ea   : > { %s2347_s17 = sshll.u32 %s716_s24, 4  ;;  %s3979_s17 = int_to_ptr.vmem [resolvable:$true] %s2347_s17 }
 0x6eb   : > { %s3176_s16 = scalar_lea.vmem %s3979_s17, 128 }
 0x6ec   : > { %2064 = vrot.lane.b32.xlu1 %v2059_v9, %s3297_s20  ;;  %p3177_p0 = scmp.ne.s32.totalorder %s3979_s17, %s3176_s16  ;;  %s3180_s20 = sshll.u32 %s3298_s25, 4  ;;  %s3181_s20 = int_to_ptr.vmem [resolvable:$false] %s3180_s20 }
 0x6ed   : > { %s3182_s26 = scalar_lea.vmem %s3181_s20, 256  ;;  %p3183_p13 = scmp.lt.s32.totalorder %s3979_s17, %s3181_s20 }
 0x6ee   : > { %p3178_p7 = pnand %p3177_p0, %p4098_p5  ;;  %p3184_p2 = scmp.lt.s32.totalorder %s3182_s26, %s3176_s16 }
 0x6f0   : > { %p3179_p10 = pneg %p3178_p7  ;;  %p3185_p8 = por %p3184_p2, %p3183_p13 }
 0x6f2   : > { %p3186_p9 = pnand %p3185_p8, %p3179_p10 }
 0x75a   : > { %v2061_v57 = vpop.permute.xlu1 %2060  ;;  %v2063_v58 = vpop.permute.xlu0 %2062 }
 0x75b   : > { %v2068_v17 = vsel %vm1476_vm7, %v2050_v52, %v2061_v57 }
 0x75c   : > { %v2071_v59 = vsel %vm2069_vm10, %v2068_v17, %v2063_v58 }
 0x75e   : > { %v2065_v60 = vpop.permute.xlu1 %2064 }
 0x75f   : > { %v2074_v61 = vsel %vm2072_vm11, %v2071_v59, %v2065_v60 }
 0x760   : > { %2700 = vmatmul.mubr.msk.bf16.vlgmr.msra.gmra.mrb[20].mxu1 %vm729_vm0, %v2074_v61 }
 0x761   : > { %2719 = vmatprep.mubr.msk.bf16.mxu1 %vm3288_vm1, %v3287_v14  ;;  %2712 = vmatpush3.bf16.msra.mxu1 %v2889_v16 }
 0x762   : > { %2713 = vmatprep.subr.bf16.mxu1 %v3287_v14 }
 0x765   : > { %2714 = vmatpush3.bf16.msra.mxu1 %v2890_v18 }
 0x766   : > { %2715 = vmatprep.subr.bf16.mxu1 %v3287_v14 }
 0x769   : > { %2716 = vmatpush3.bf16.msra.mxu1 %v2891_v35 }
 0x76a   : > { %2717 = vmatprep.subr.bf16.mxu1 %v3287_v14 }
 0x76d   : > { %2718 = vmatpush3.bf16.msra.mxu1 %v2892_v36 }
 0x833   : > { %v2134_v6 = vpop.f32.mrb[20].mxu1 }
 0x834   : > { %v2135_v63 = vadd.f32 %v2567_v62, %v2134_v6  ;;  %v2701_v0 = vpop.f32.mrb[21].mxu1 }
 0x835   : > { %v2137_v1 = vpop.f32.mrb[22].mxu1 }
 0x836   : > { %v2140_v3 = vadd.f32 %v2921_v2, %v2135_v63  ;;  %v2702_v4 = vpop.f32.mrb[23].mxu1 }
 0x838   : > { %v2143_v5 = vsel %vm729_vm0, %v2140_v3, 0.0 }
 0x839   : > { %2144 = vadd.xlane.f32.xlu1 %v2143_v5 }
 0x8c6   : > { %v2145_v7 = vpop.xlane.xlu1 %2144 }
 0x8c7   : > { %v2146_v8 = vmul.f32 0.03125, %v2145_v7 }
 0x8c9   : > { %v2147_v10 = vsub.f32 %v2140_v3, %v2146_v8 }
 0x8cb   : > { %v2148_v11 = vmul.f32 %v2147_v10, %v2147_v10  ;;  %v2166_v28 = vmul.f32 %v2571_v49, %v2147_v10 }
 0x8cd   : > { %v2149_v12 = vsel %vm729_vm0, %v2148_v11, 0.0 }
 0x8ce   : > { %2150 = vadd.xlane.f32.xlu0 %v2149_v12 }
 0x95b   : > { %v2151_v19 = vpop.xlane.xlu0 %2150 }
 0x95c   : > { %v2152_v20 = vmul.f32 0.032258064, %v2151_v19 }
 0x95e   : > { %2917 = vrsqrt.f32 %v2152_v20  ;;  %vm2155_vm12 = vcmp.eq.f32.partialorder %v2152_v20, inf  ;;  %v2158_v23 = vand.u32 2147483648, %v2152_v20  ;;  %vm2157_vm13 = vcmp.eq.f32.partialorder %v2152_v20, 0.0 }
 0x968   : > { %v2918_v21 = vpop.eup %2917 }
 0x969   : > { %v2154_v22 = vmul.f32 %v2918_v21, %v2152_v20 }
 0x96b   : > { %v2156_v24 = vsel %vm2155_vm12, %v2152_v20, %v2154_v22 }
 0x96c   : > { %v2159_v25 = vsel %vm2157_vm13, %v2158_v23, %v2156_v24 }
 0x96d   : > { %v2167_v26 = vadd.f32 1e-06, %v2159_v25 }
 0x96f   : > { %2919 = vrcp.f32 %v2167_v26 }
 0x979   : > { %v2920_v29 = vpop.eup %2919 }
 0x97a   : > { %v2169_v32 = vmul.f32 %v2920_v29, %v2166_v28 }
 0x97c   : > { %v2176_v33 = vadd.f32 %v2572_v30, %v2169_v32 }
 0x97e   : > { %v2177_v34 = vpack.c.bf16 %v2176_v33, %v2176_v33 }
 0x980   : > { %2708 = vmatmul.mubr.msk.bf16.vlgmr.msra.gmra.mrb[24].mxu0 %vm729_vm0, %v2177_v34 }
 0xa53   : > { %v2238_v31 = vpop.f32.mrb[24].mxu0 }
 0xa54   : > { %v2239_v37 = vadd.f32 %v2573_v27, %v2238_v31  ;;  %v2709_v38 = vpop.f32.mrb[25].mxu0 }
 0xa55   : > { %v2241_v39 = vpop.f32.mrb[26].mxu0 }
 0xa56   : > { %v2244_v40 = vmax.f32 %v2239_v37, 0.0  ;;  %v2710_v41 = vpop.f32.mrb[27].mxu0 }
 0xa58   : > { %v2245_v42 = vpack.c.bf16 %v2244_v40, %v2244_v40 }
 0xa5a   : > { %2720 = vmatmul.mubr.msk.bf16.vlgmr.msra.gmra.mrb[24].mxu1 %vm2278_vm14, %v2245_v42 }
 0xb2d   : > { %v2316_v14 = vpop.f32.mrb[24].mxu1 }
 0xb2e   : > { %v2322_v44 = vadd.f32 %v2316_v14, %v2140_v3  ;;  %v2721_v45 = vpop.f32.mrb[25].mxu1 }
 0xb2f   : > { %v2319_v46 = vpop.f32.mrb[26].mxu1 }
 0xb30   : > { %v2330_v47 = vadd.f32 %v2582_v43, %v2322_v44  ;;  %v2722_v48 = vpop.f32.mrb[27].mxu1 }
 0xb32   : > { %2331 = vst.msk [vmem:[%s716_s24] sm:$0xff] %vm729_vm0, %v2330_v47 }
 0xb33   : > { %3189 = shalt.err (!%p3186_p9)
}
 0xb34   : > { %s3190_s7 = scalar_lea.hbm %s3977_s3, 128  ;;  %s3194_s18 = scalar_lea.hbm %s4097_s2, 256 }
 0xb35   : > { %p3191_p4 = scmp.ne.s32.totalorder %s3977_s3, %s3190_s7  ;;  %p3195_p1 = scmp.lt.u32.totalorder %s3977_s3, %s4097_s2 }
 0xb36   : > { %p3196_p12 = scmp.lt.u32.totalorder %s3194_s18, %s3190_s7  ;;  %p3198_p0 = scmp.lt.u32.totalorder %s3190_s7, %s3977_s3 }
 0xb37   : > { %p3192_p6 = pnand %p3191_p4, %p4098_p5 }
 0xb38   : > { %p3197_p11 = por %p3196_p12, %p3195_p1 }
 0xb39   : > { %p3193_p3 = pneg %p3192_p6 }
 0xb3a   : > { %p3199_p7 = por %p3198_p0, %p3197_p11 }
 0xb3c   : > { %p3200_p10 = pnand %p3199_p7, %p3193_p3 }
 0xb3e   : > { %3203 = shalt.err (!%p3200_p10)
}
 0xb3f   : > { %2757 = dma.vmem_to_hbm [thread:$0]  (%p4098_p5), %s3979_s17, 128, %s3977_s3, %s2333_s30  }
 0xb40 PF: > { %s2359_s16 = sand.u32 1, %s3254_s27   ;;  %p4099_p13 = scmp.ne.s32.totalorder %s4084_s1, 0 }
 0xb41   : > { %p4100_p2 = scmp.ge.s32.totalorder %s3274_s19, 2  ;;  %s2360_s20 = scalar_lea.sflag [#allocation6], %s2359_s16 }
 0xb43   : > { %p2789_p8 = pnand %p4100_p2, %p4099_p13 }
 0xb45   : > { %3249 = dma.done.wait (!%p2789_p8), %s2360_s20, 128  }
 0xb46   : > { %3251 = vsyncadd (!%p2789_p8), %s2360_s20, 4294967168  ;;  %s38_s19 = sadd.s32 1, %s3274_s19   ;;  %s4101_s27 = smov %s3258_s28 }
 0xb47   : > { %p35_p9 = scmp.ge.s32.totalorder %s38_s19, 4   ;;  %s4102_s28 = smov %s3262_s29 }
 0xb48   : > { %s4103_s29 = smov %s3649_s10  ;;  %s4104_s30 = smov %s3270_s0 }
 0xb49   : > { %s4105_s0 = smov %s4107_s5  ;;  %37 = sbr.rel (!%p35_p9) target bundleno = 24 (0x18), region = 177 }
 0xb50   :  { %2365 = vsyncpa [#allocation5], 1 }
 0xb51   :  { %2367 = vsyncpa [#allocation5 + $0x1], 1 }
 0xb52   :  { %2368 = vsyncpa [#allocation8], 1 }
 0xb53   :  { %2369 = vsyncpa [#allocation11], 1 }
 0xb54   :  { %2370 = vsyncpa [#allocation14], 1 }
 0xb55   :  { %2371 = vsyncpa [#allocation17], 1 }
 0xb56   :  { %2372 = vsyncpa [#allocation6], 1 }
 0xb57   :  { %2374 = vsyncpa [#allocation6 + $0x1], 1 }

// kernel: tpu_custom_call.1
= control target key start
LH: loop header
LB: loop body
LE: loop exit
PB: predicated region body
PF: predicated region fallthrough
CT: control target
= control target key end

     0   :  { %s4027_s0 = inlined_call_operand.vmem [shape: f32[2,8,32], index: 0, kind: input, shape index: {}]   ;;  %s4028_s1 = inlined_call_operand.hbm [shape: f32[2,1,8], index: 1, kind: input, shape index: {}]   ;;  %s4029_s2 = inlined_call_operand.vmem [shape: f32[1,32], index: 2, kind: input, shape index: {}]   ;;  %s4030_s3 = inlined_call_operand.hbm [shape: f32[1,32], index: 3, kind: input, shape index: {}]   ;;  %s4031_s4 = inlined_call_operand.vmem [shape: bf16[32,32], index: 4, kind: input, shape index: {}]   ;;  %s4032_s5 = inlined_call_operand.hbm [shape: f32[1,32], index: 5, kind: input, shape index: {}]   ;;  %s4033_s6 = inlined_call_operand.vmem [shape: bf16[32,32], index: 6, kind: input, shape index: {}]   ;;  %s4034_s7 = inlined_call_operand.hbm [shape: f32[1,32], index: 7, kind: input, shape index: {}]   ;;  %s4035_s8 = inlined_call_operand.hbm [shape: bf16[32,32], index: 8, kind: input, shape index: {}]   ;;  %s4036_s9 = inlined_call_operand.hbm [shape: f32[1,32], index: 9, kind: input, shape index: {}]   ;;  %s4037_s10 = inlined_call_operand.vmem [shape: bf16[32,32], index: 10, kind: input, shape index: {}]   ;;  %s4038_s11 = inlined_call_operand.hbm [shape: f32[1,32], index: 11, kind: input, shape index: {}]   ;;  %s4039_s12 = inlined_call_operand.hbm [shape: f32[1,32], index: 12, kind: input, shape index: {}]   ;;  %s4040_s13 = inlined_call_operand.hbm [shape: f32[1,32], index: 13, kind: input, shape index: {}]   ;;  %s4041_s14 = inlined_call_operand.vmem [shape: bf16[32,64], index: 14, kind: input, shape index: {}]   ;;  %s4042_s15 = inlined_call_operand.vmem [shape: f32[1,64], index: 15, kind: input, shape index: {}]   ;;  %s4043_s16 = inlined_call_operand.vmem [shape: bf16[64,32], index: 16, kind: input, shape index: {}]   ;;  %s4044_s17 = inlined_call_operand.vmem [shape: f32[1,32], index: 17, kind: input, shape index: {}]   ;;  %s4045_s18 = inlined_call_operand.hbm [shape: f32[2,8,32], index: 18, kind: output, shape index: {}]  }
   0x1   :  { %4059 = sst [smem:[#allocation26_spill]] %s4027_s0 }
   0x2   :  { %4060 = sst [smem:[#allocation27_spill]] %s4028_s1 }
   0x3   :  { %4061 = sst [smem:[#allocation28_spill]] %s4029_s2 }
   0x4   :  { %4062 = sst [smem:[#allocation29_spill]] %s4030_s3 }
   0x5   :  { %4063 = sst [smem:[#allocation30_spill]] %s4031_s4 }
   0x6   :  { %4064 = sst [smem:[#allocation31_spill]] %s4032_s5 }
   0x7   :  { %4065 = sst [smem:[#allocation32_spill]] %s4034_s7 }
   0x8   :  { %4066 = sst [smem:[#allocation33_spill]] %s4037_s10 }
   0x9   :  { %4067 = sst [smem:[#allocation34_spill]] %s4041_s14 }
   0xa   :  { %4068 = sst [smem:[#allocation35_spill]] %s4042_s15 }
   0xb   :  { %4069 = sst [smem:[#allocation36_spill]] %s4043_s16 }
   0xc   :  { %4070 = sst [smem:[#allocation37_spill]] %s4044_s17 }
   0xd   :  { %4071 = sst [smem:[#allocation38_spill]] %s4045_s18 }
   0xe   :  { %23 = vsyncpa [#allocation5], 0 }
   0xf   :  { %25 = vsyncpa [#allocation5 + $0x1], 0 }
  0x10   :  { %26 = vsyncpa [#allocation8], 0 }
  0x11   :  { %27 = vsyncpa [#allocation11], 0 }
  0x12   :  { %28 = vsyncpa [#allocation14], 0 }
  0x13   :  { %29 = vsyncpa [#allocation17], 0 }
  0x14   :  { %30 = vsyncpa [#allocation6], 0 }
  0x15   :  { %32 = vsyncpa [#allocation6 + $0x1], 0  ;;  %s3394_s27 = smov 0   ;;  %s3396_s28 = smov 0  }
  0x16   :  { %s3398_s29 = smov 0   ;;  %s3400_s30 = smov 0  }
  0x17   :  { %s3402_s0 = smov 0   ;;  %s3404_s19 = smov 0  }
  0x18 LB: > { %s4047_s1 = sadd.s32 4294967295, %s3274_s19   ;;  %p2515_p0 = scmp.ge.s32.totalorder %s3274_s19, 1  ;;  %s3274_s19 = sphi %s3404_s19, %s38_s19   ;;  %s3270_s0 = sphi %s3402_s0, %s4105_s0   ;;  %s3266_s30 = sphi %s3400_s30, %s4104_s30   ;;  %s3262_s29 = sphi %s3398_s29, %s4103_s29   ;;  %s3258_s28 = sphi %s3396_s28, %s4102_s28   ;;  %s3254_s27 = sphi %s3394_s27, %s4101_s27  }
  0x19   : > { %p3428_p1 = scmp.eq.s32.totalorder %s4047_s1, 0  ;;  %p471_p2 = scmp.lt.s32.totalorder %s3274_s19, 3 }
  0x1a   : > { %s3276_s22 = smov [#allocation7]   ;;  %s3277_s23 = smov [#allocation10]  }
  0x1b   : > { %s4072_s20 = scalar_select %p3428_p1, 1, 0 }
  0x1c   : > { %p3433_p3 = pnand %p2515_p0, %p471_p2  ;;  %s487_s2 = sshll.u32 %s3276_s22, 4  ;;  %s488_s2 = int_to_ptr.vmem [resolvable:$true] %s487_s2 }
  0x1d   : > { %s515_s24 = sshll.u32 %s3277_s23, 4  ;;  %s3278_s26 = smov [#allocation13]   ;;  %s3446_s24 = int_to_ptr.vmem [resolvable:$true] %s515_s24 }
  0x1e   : > { %s4073_s21 = scalar_select %p3433_p3, 1, 0 }
  0x1f   : > { %p2759_p5 = pneg %p3433_p3  ;;  %s539_s1 = sshll.u32 %s3278_s26, 4  ;;  %s3448_s1 = int_to_ptr.vmem [resolvable:$true] %s539_s1 }
  0x20   : > { %s4075_s3 = sld [smem:[#allocation29_spill]] }
  0x21   : > { %p3442_p6 = pnand %p2759_p5, %p3428_p1 }
  0x23   : > { %p3458_p8 = pneg %p3442_p6 }
  0x26   : > { %s2922_s17 = scalar_lea.hbm %s4075_s3, 16 }
  0x27   : > { %p2923_p7 = scmp.ne.s32.totalorder %s4075_s3, %s2922_s17  ;;  %p2929_p11 = scmp.lt.u32.totalorder %s2922_s17, %s4075_s3 }
  0x29   : > { %p2925_p9 = pnand %p3458_p8, %p2923_p7 }
  0x2b   : > { %p2926_p10 = pneg %p2925_p9 }
  0x2d   : > { %p2931_p12 = pnand %p2929_p11, %p2926_p10 }
  0x2f   : > { %2934 = shalt.err (!%p2931_p12)
}
  0x30   : > { %s2935_s18 = scalar_lea.vmem %s488_s2, 16  ;;  %s2942_s15 = scalar_lea.vmem %s488_s2, 32 }
  0x31   : > { %p2936_p13 = scmp.ne.s32.totalorder %s488_s2, %s2935_s18  ;;  %p2943_p5 = scmp.lt.s32.totalorder %s488_s2, %s488_s2 }
  0x32   : > { %p2944_p4 = scmp.lt.s32.totalorder %s2942_s15, %s2935_s18 }
  0x33   : > { %p2938_p0 = pnand %p2936_p13, %p3458_p8 }
  0x34   : > { %p2945_p3 = por %p2944_p4, %p2943_p5 }
  0x35   : > { %p2939_p2 = pneg %p2938_p0 }
  0x37   : > { %p2946_p1 = pnand %p2945_p3, %p2939_p2 }
  0x39   : > { %2949 = shalt.err (!%p2946_p1)
}
  0x3a   : > { %2762 = dma.hbm_to_vmem [thread:$0]  (!%p3442_p6), %s4075_s3, 16, %s488_s2, [#allocation8]  }
  0x3b   : > { %s4077_s7 = sld [smem:[#allocation32_spill]] }
  0x41   : > { %s2950_s26 = scalar_lea.hbm %s4077_s7, 16 }
  0x42   : > { %p2951_p7 = scmp.ne.s32.totalorder %s4077_s7, %s2950_s26  ;;  %p2957_p1 = scmp.lt.u32.totalorder %s2950_s26, %s4077_s7 }
  0x44   : > { %p2953_p9 = pnand %p2951_p7, %p3458_p8 }
  0x46   : > { %p2954_p4 = pneg %p2953_p9 }
  0x48   : > { %p2959_p3 = pnand %p2957_p1, %p2954_p4 }
  0x4a   : > { %2962 = shalt.err (!%p2959_p3)
}
  0x4b   : > { %s2963_s2 = scalar_lea.vmem %s3446_s24, 16  ;;  %s2970_s4 = scalar_lea.vmem %s3446_s24, 32 }
  0x4c   : > { %p2964_p10 = scmp.ne.s32.totalorder %s3446_s24, %s2963_s2  ;;  %p2971_p13 = scmp.lt.s32.totalorder %s3446_s24, %s3446_s24 }
  0x4d   : > { %p2972_p0 = scmp.lt.s32.totalorder %s2970_s4, %s2963_s2 }
  0x4e   : > { %p2966_p11 = pnand %p2964_p10, %p3458_p8 }
  0x4f   : > { %p2973_p2 = por %p2972_p0, %p2971_p13 }
  0x50   : > { %p2967_p12 = pneg %p2966_p11 }
  0x52   : > { %p2974_p5 = pnand %p2973_p2, %p2967_p12 }
  0x54   : > { %2977 = shalt.err (!%p2974_p5)
}
  0x55   : > { %2768 = dma.hbm_to_vmem [thread:$0]  (!%p3442_p6), %s4077_s7, 16, %s3446_s24, [#allocation11]  }
  0x56   : > { %s2978_s17 = scalar_lea.hbm %s4036_s9, 16 }
  0x57   : > { %p2979_p7 = scmp.ne.s32.totalorder %s4036_s9, %s2978_s17  ;;  %p2985_p1 = scmp.lt.u32.totalorder %s2978_s17, %s4036_s9 }
  0x59   : > { %p2981_p9 = pnand %p2979_p7, %p3458_p8 }
  0x5b   : > { %p2982_p4 = pneg %p2981_p9 }
  0x5d   : > { %p2987_p3 = pnand %p2985_p1, %p2982_p4 }
  0x5f   : > { %2990 = shalt.err (!%p2987_p3)
}
  0x60   : > { %s2991_s24 = scalar_lea.vmem %s3448_s1, 16  ;;  %s2998_s4 = scalar_lea.vmem %s3448_s1, 32 }
  0x61   : > { %p2992_p10 = scmp.ne.s32.totalorder %s3448_s1, %s2991_s24  ;;  %p2999_p13 = scmp.lt.s32.totalorder %s3448_s1, %s3448_s1 }
  0x62   : > { %p3000_p0 = scmp.lt.s32.totalorder %s2998_s4, %s2991_s24 }
  0x63   : > { %p2994_p11 = pnand %p2992_p10, %p3458_p8 }
  0x64   : > { %p3001_p2 = por %p3000_p0, %p2999_p13 }
  0x65   : > { %p2995_p12 = pneg %p2994_p11 }
  0x67   : > { %p3002_p5 = pnand %p3001_p2, %p2995_p12 }
  0x69   : > { %3005 = shalt.err (!%p3002_p5)
}
  0x6a   : > { %2774 = dma.hbm_to_vmem [thread:$0]  (!%p3442_p6), %s4036_s9, 16, %s3448_s1, [#allocation14]  }
  0x6b   : > { %s3279_s22 = smov [#allocation16]   ;;  %s3280_s17 = smov [#allocation9]  }
  0x6c   : > { %s564_s14 = sshll.u32 %s3279_s22, 4  ;;  %s501_s26 = sshll.u32 %s3280_s17, 4  ;;  %s565_s14 = int_to_ptr.vmem [resolvable:$true] %s564_s14  ;;  %s502_s26 = int_to_ptr.vmem [resolvable:$true] %s501_s26 }
  0x6d   : > { %s3006_s2 = scalar_lea.hbm %s4039_s12, 16 }
  0x6e   : > { %p3007_p7 = scmp.ne.s32.totalorder %s4039_s12, %s3006_s2  ;;  %p3013_p1 = scmp.lt.u32.totalorder %s3006_s2, %s4039_s12 }
  0x70   : > { %p3009_p9 = pnand %p3007_p7, %p3458_p8 }
  0x72   : > { %p3010_p4 = pneg %p3009_p9 }
  0x74   : > { %p3015_p3 = pnand %p3013_p1, %p3010_p4 }
  0x76   : > { %3018 = shalt.err (!%p3015_p3)
}
  0x77   : > { %s3019_s1 = scalar_lea.vmem %s565_s14, 16  ;;  %s3026_s16 = scalar_lea.vmem %s565_s14, 32 }
  0x78   : > { %p3020_p10 = scmp.ne.s32.totalorder %s565_s14, %s3019_s1  ;;  %p3027_p13 = scmp.lt.s32.totalorder %s565_s14, %s565_s14 }
  0x79   : > { %p3028_p0 = scmp.lt.s32.totalorder %s3026_s16, %s3019_s1 }
  0x7a   : > { %p3022_p11 = pnand %p3020_p10, %p3458_p8 }
  0x7b   : > { %p3029_p2 = por %p3028_p0, %p3027_p13 }
  0x7c   : > { %p3023_p12 = pneg %p3022_p11 }
  0x7e   : > { %p3030_p5 = pnand %p3029_p2, %p3023_p12 }
  0x80   : > { %3033 = shalt.err (!%p3030_p5)
}
  0x81   : > { %2780 = dma.hbm_to_vmem [thread:$0]  (!%p3442_p6), %s4039_s12, 16, %s565_s14, [#allocation17]  }
  0x82   : > { %s4078_s5 = sld [smem:[#allocation31_spill]] }
  0x88   : > { %s3034_s15 = scalar_lea.hbm %s4078_s5, 16 }
  0x89   : > { %p3035_p7 = scmp.ne.s32.totalorder %s4078_s5, %s3034_s15  ;;  %p3041_p1 = scmp.lt.u32.totalorder %s3034_s15, %s4078_s5 }
  0x8b   : > { %p3037_p9 = pnand %p3035_p7, %p3458_p8 }
  0x8d   : > { %p3038_p4 = pneg %p3037_p9 }
  0x8f   : > { %p3043_p3 = pnand %p3041_p1, %p3038_p4 }
  0x91   : > { %3046 = shalt.err (!%p3043_p3)
}
  0x92   : > { %s3047_s1 = scalar_lea.vmem %s502_s26, 16  ;;  %s3054_s14 = scalar_lea.vmem %s502_s26, 32 }
  0x93   : > { %p3048_p10 = scmp.ne.s32.totalorder %s502_s26, %s3047_s1  ;;  %p3055_p13 = scmp.lt.s32.totalorder %s502_s26, %s502_s26 }
  0x94   : > { %p3056_p0 = scmp.lt.s32.totalorder %s3054_s14, %s3047_s1 }
  0x95   : > { %p3050_p11 = pnand %p3048_p10, %p3458_p8 }
  0x96   : > { %p3057_p2 = por %p3056_p0, %p3055_p13 }
  0x97   : > { %p3051_p12 = pneg %p3050_p11 }
  0x99   : > { %p3058_p5 = pnand %p3057_p2, %p3051_p12 }
  0x9b   : > { %3061 = shalt.err (!%p3058_p5)
}
  0x9c   : > { %2765 = dma.hbm_to_vmem [thread:$0]  (!%p3442_p6), %s4078_s5, 16, %s502_s26, [#allocation8]  }
  0x9d   : > { %s3281_s17 = smov [#allocation12]   ;;  %s3062_s2 = scalar_lea.hbm %s4035_s8, 256 }
  0x9e   : > { %s525_s3 = sshll.u32 %s3281_s17, 4  ;;  %p3063_p7 = scmp.ne.s32.totalorder %s4035_s8, %s3062_s2  ;;  %s526_s3 = int_to_ptr.vmem [resolvable:$true] %s525_s3 }
  0x9f   : > { %p3069_p1 = scmp.lt.u32.totalorder %s3062_s2, %s4035_s8 }
  0xa0   : > { %p3065_p9 = pnand %p3063_p7, %p3458_p8 }
  0xa2   : > { %p3066_p4 = pneg %p3065_p9 }
  0xa4   : > { %p3071_p3 = pnand %p3069_p1, %p3066_p4 }
  0xa6   : > { %3074 = shalt.err (!%p3071_p3)
}
  0xa7   : > { %s3075_s26 = scalar_lea.vmem %s526_s3, 256  ;;  %p3083_p13 = scmp.lt.s32.totalorder %s526_s3, %s526_s3 }
  0xa8   : > { %p3076_p10 = scmp.ne.s32.totalorder %s526_s3, %s3075_s26  ;;  %p3084_p0 = scmp.lt.s32.totalorder %s3075_s26, %s3075_s26 }
  0xaa   : > { %p3078_p11 = pnand %p3076_p10, %p3458_p8  ;;  %p3085_p2 = por %p3084_p0, %p3083_p13 }
  0xac   : > { %p3079_p12 = pneg %p3078_p11 }
  0xae   : > { %p3086_p5 = pnand %p3085_p2, %p3079_p12 }
  0xb0   : > { %3089 = shalt.err (!%p3086_p5)
}
  0xb1   : > { %s3282_s14 = smov 64   ;;  %s3283_s16 = smov 4  }
  0xb2   : > { %2771 = dma.hbm_to_vmem [thread:$0]  (!%p3442_p6), %s4035_s8, 256, %s526_s3, [#allocation11], %s3282_s14, %s3282_s14, %s3283_s16  }
  0xb3   : > { %s3284_s18 = smov [#allocation15]   ;;  %s3285_s2 = smov [#allocation18]  }
  0xb4   : > { %s553_s15 = sshll.u32 %s3284_s18, 4  ;;  %s575_s24 = sshll.u32 %s3285_s2, 4  ;;  %s554_s15 = int_to_ptr.vmem [resolvable:$true] %s553_s15  ;;  %s3576_s24 = int_to_ptr.vmem [resolvable:$true] %s575_s24 }
  0xb5   : > { %s3090_s1 = scalar_lea.hbm %s4038_s11, 16 }
  0xb6   : > { %p3091_p7 = scmp.ne.s32.totalorder %s4038_s11, %s3090_s1  ;;  %p3097_p1 = scmp.lt.u32.totalorder %s3090_s1, %s4038_s11 }
  0xb8   : > { %p3093_p9 = pnand %p3091_p7, %p3458_p8 }
  0xba   : > { %p3094_p4 = pneg %p3093_p9 }
  0xbc   : > { %p3099_p3 = pnand %p3097_p1, %p3094_p4 }
  0xbe   : > { %3102 = shalt.err (!%p3099_p3)
}
  0xbf   : > { %s3103_s14 = scalar_lea.vmem %s554_s15, 16  ;;  %s3110_s16 = scalar_lea.vmem %s554_s15, 32 }
  0xc0   : > { %p3104_p10 = scmp.ne.s32.totalorder %s554_s15, %s3103_s14  ;;  %p3111_p13 = scmp.lt.s32.totalorder %s554_s15, %s554_s15 }
  0xc1   : > { %p3112_p0 = scmp.lt.s32.totalorder %s3110_s16, %s3103_s14 }
  0xc2   : > { %p3106_p11 = pnand %p3104_p10, %p3458_p8 }
  0xc3   : > { %p3113_p2 = por %p3112_p0, %p3111_p13 }
  0xc4   : > { %p3107_p12 = pneg %p3106_p11 }
  0xc6   : > { %p3114_p5 = pnand %p3113_p2, %p3107_p12 }
  0xc8   : > { %3117 = shalt.err (!%p3114_p5)
}
  0xc9   : > { %2777 = dma.hbm_to_vmem [thread:$0]  (!%p3442_p6), %s4038_s11, 16, %s554_s15, [#allocation14]  }
  0xca   : > { %s3118_s4 = scalar_lea.hbm %s4040_s13, 16 }
  0xcb   : > { %p3119_p7 = scmp.ne.s32.totalorder %s4040_s13, %s3118_s4  ;;  %p3125_p1 = scmp.lt.u32.totalorder %s3118_s4, %s4040_s13 }
  0xcd   : > { %p3121_p9 = pnand %p3119_p7, %p3458_p8 }
  0xcf   : > { %p3122_p4 = pneg %p3121_p9 }
  0xd1   : > { %p3127_p3 = pnand %p3125_p1, %p3122_p4 }
  0xd3   : > { %3130 = shalt.err (!%p3127_p3)
}
  0xd4   : > { %s3131_s15 = scalar_lea.vmem %s3576_s24, 16  ;;  %s3138_s3 = scalar_lea.vmem %s3576_s24, 32 }
  0xd5   : > { %p3132_p10 = scmp.ne.s32.totalorder %s3576_s24, %s3131_s15  ;;  %p3139_p13 = scmp.lt.s32.totalorder %s3576_s24, %s3576_s24 }
  0xd6   : > { %p3140_p0 = scmp.lt.s32.totalorder %s3138_s3, %s3131_s15 }
  0xd7   : > { %p3134_p11 = pnand %p3132_p10, %p3458_p8 }
  0xd8   : > { %p3141_p2 = por %p3140_p0, %p3139_p13 }
  0xd9   : > { %p3135_p12 = pneg %p3134_p11 }
  0xdb   : > { %p3142_p5 = pnand %p3141_p2, %p3135_p12 }
  0xdd   : > { %3145 = shalt.err (!%p3142_p5)
}
  0xde   : > { %2783 = dma.hbm_to_vmem [thread:$0]  (!%p3442_p6), %s4040_s13, 16, %s3576_s24, [#allocation17]  }
  0xdf   : > { %s2514_s23 = sadd.s32 4294967294, %s3274_s19   ;;  %s50_s5 = sadd.s32 1, %s3270_s0 }
  0xe0   : > { %p52_p8 = scmp.ge.s32.totalorder %s50_s5, 2  ;;  %s83_s25 = sadd.s32 1, %s3262_s29 }
  0xe1   : > { %p90_p7 = scmp.ne.s32.totalorder %s3262_s29, %s3258_s28  ;;  %p91_p9 = scmp.eq.s32.totalorder %s3274_s19, 0 }
  0xe2   : > { %s4107_s5 = smov (%p52_p8, %s50_s5), 0  ;;  %p96_p1 = scmp.ne.s32.totalorder %s3258_s28, %s3254_s27 }
  0xe3   : > { %p3628_p4 = por %p91_p9, %p90_p7  ;;  %s80_s24 = ssub.s32 %s3270_s0, %s4107_s5 }
  0xe4   : > { %s4080_s18 = sadd.s32 4294967295, %s3274_s19   ;;  %p81_p3 = scmp.eq.s32.totalorder %s80_s24, 0 }
  0xe5   : > { %p458_p6 = scmp.eq.s32.totalorder %s4080_s18, 1  ;;  %p4081_p10 = scmp.ne.s32.totalorder %s4072_s20, 0 }
  0xe6   : > { %p464_p13 = scmp.eq.s32.totalorder %s2514_s23, 1  ;;  %p2800_p2 = scmp.lt.s32.totalorder %s3274_s19, 2 }
  0xe7   : > { %p3640_p11 = por %p4081_p10, %p96_p1  ;;  %p3644_p12 = por %p458_p6, %p90_p7 }
  0xe8   : > { %s3649_s10 = scalar_select %p81_p3, %s3262_s29, %s83_s25  }
  0xe9   : > { %s4083_s4 = scalar_select %p3644_p12, 1, 0 }
  0xea   : > { %p3651_p0 = por %p464_p13, %p96_p1  ;;  %s605_s26 = sand.u32 1, %s3262_s29  }
  0xeb   : > { %s2525_s22 = sshll.u32 %s3270_s0, 4  ;;  %s4085_s14 = sld [smem:[#allocation27_spill]] }
  0xec   : > { %s4084_s1 = scalar_select %p3651_p0, 1, 0 }
  0xed   : > { %s608_s24 = scalar_lea.vmem [#allocation4], %s605_s26  ;;  %p3667_p5 = pnand %p2800_p2, %p3628_p4 }
  0xee   : > { %s615_s23 = sshll.u32 %s608_s24, 4  ;;  %s606_s18 = scalar_lea.sflag [#allocation5], %s605_s26  ;;  %s3663_s23 = int_to_ptr.vmem [resolvable:$true] %s615_s23 }
  0xef   : > { %p3148_p7 = pneg %p3667_p5 }
  0xf1   : > { %s3661_s16 = scalar_lea.hbm %s4085_s14, %s2525_s22  ;;  %s3151_s3 = scalar_lea.hbm %s4085_s14, 32 }
  0xf2   : > { %s3146_s7 = scalar_lea.hbm %s3661_s16, 16  ;;  %p3152_p4 = scmp.lt.u32.totalorder %s3661_s16, %s4085_s14 }
  0xf3   : > { %p3147_p8 = scmp.ne.s32.totalorder %s3661_s16, %s3146_s7  ;;  %p3153_p6 = scmp.lt.u32.totalorder %s3151_s3, %s3146_s7 }
  0xf4   : > { %p3155_p10 = scmp.lt.u32.totalorder %s3146_s7, %s3661_s16 }
  0xf5   : > { %p3149_p9 = pnand %p3148_p7, %p3147_p8  ;;  %p3154_p3 = por %p3153_p6, %p3152_p4 }
  0xf7   : > { %p3150_p1 = pneg %p3149_p9  ;;  %p3156_p13 = por %p3155_p10, %p3154_p3 }
  0xf9   : > { %p3157_p2 = pnand %p3156_p13, %p3150_p1 }
  0xfb   : > { %3160 = shalt.err (!%p3157_p2)
}
  0xfc   : > { %s3161_s26 = scalar_lea.vmem %s3663_s23, 16  ;;  %s3286_s22 = smov [#allocation4]  }
  0xfd   : > { %p3162_p8 = scmp.ne.s32.totalorder %s3663_s23, %s3161_s26  ;;  %s3166_s15 = sshll.u32 %s3286_s22, 4  ;;  %s3167_s15 = int_to_ptr.vmem [resolvable:$false] %s3166_s15 }
  0xfe   : > { %s3168_s17 = scalar_lea.vmem %s3167_s15, 32  ;;  %p3169_p12 = scmp.lt.s32.totalorder %s3663_s23, %s3167_s15 }
  0xff   : > { %p3164_p9 = pnand %p3162_p8, %p3148_p7  ;;  %p3170_p4 = scmp.lt.s32.totalorder %s3168_s17, %s3161_s26 }
 0x101   : > { %p3165_p0 = pneg %p3164_p9  ;;  %p3171_p6 = por %p3170_p4, %p3169_p12 }
 0x103   : > { %p3172_p3 = pnand %p3171_p6, %p3165_p0 }
 0x105   : > { %3175 = shalt.err (!%p3172_p3)
}
 0x106   : > { %2787 = dma.hbm_to_vmem [thread:$0]  (!%p3667_p5), %s3661_s16, 16, %s3663_s23, %s606_s18  }
 0x107   : > { %p4087_p1 = scmp.ne.s32.totalorder %s4073_s21, 0 }
 0x108   : > { %s3699_s7 = sand.u32 (!%p4087_p1), 1, %s3258_s28  }
 0x109   : > { %624 = sbr.rel (%p4087_p1) target bundleno = 2880 (0xb40), region = 92  ;;  %s627_s3 = scalar_lea.sflag (!%p4087_p1), [#allocation5], %s3699_s7 }
 0x10a   : > { %s629_s24 = scalar_lea.vmem (!%p4087_p1), [#allocation4], %s3699_s7 }
 0x110   : > { %3229 = dma.done.wait (%p3640_p11), %s627_s3, 16  }
 0x111   : > { %3231 = vsyncadd (%p3640_p11), %s627_s3, 4294967280  ;;  %p4088_p12 = scmp.ne.s32.totalorder %s4072_s20, 0 }
 0x113   : > { %3233 = dma.done.wait (%p4088_p12), [#allocation8], 32  }
 0x114   : > { %3235 = vsyncadd (%p4088_p12), [#allocation8], 4294967264 }
 0x115   : > { %3237 = dma.done.wait (%p4088_p12), [#allocation11], 272  }
 0x116   : > { %3239 = vsyncadd (%p4088_p12), [#allocation11], 4294967024 }
 0x117   : > { %3241 = dma.done.wait (%p4088_p12), [#allocation14], 32  }
 0x118   : > { %3243 = vsyncadd (%p4088_p12), [#allocation14], 4294967264 }
 0x119   : > { %3245 = dma.done.wait (%p4088_p12), [#allocation17], 32  }
 0x11a   : > { %3247 = vsyncadd (%p4088_p12), [#allocation17], 4294967264  ;;  %p717_p11 = scmp.lt.s32.totalorder %s3266_s30, 1  ;;  %s4089_s25 = sld [smem:[#allocation26_spill]]  ;;  %vm729_vm0 = vcmask 261120   ;;  %v2879_v12 = vld [vmem:[%s4033_s6] sm:$0xff]  }
 0x11b   : > { %v2880_v13 = vld [vmem:[#allocation12] sm:$0xff]   ;;  %v3287_v14 = vmov 0.0   ;;  %v2882_v16 = vld [vmem:[#allocation12 + $0x8] sm:$0xff]   ;;  %vm3288_vm1 = vmmov 0   ;;  %v2538_v36 = vld [vmem:[#allocation7] ss:$0 sm:$0xff] }
 0x11c   : > { %s718_s21 = scalar_select %p717_p11, %s3266_s30, 1  ;;  %2623 = vmatprep.subr.bf16.mxu0 %v3287_v14  ;;  %2631 = vmatprep.subr.bf16.mxu1 %v3287_v14  ;;  %v2881_v15 = vld [vmem:[%s4033_s6 + $0x8] sm:$0xff]   ;;  %v2539_v47 = vld [vmem:[#allocation10] ss:$0 sm:$0xff]  ;;  %v2553_v57 = vld [vmem:[#allocation9] ss:$0 sm:$0xff] }
 0x11d   : > { %2624 = vmatpush3.bf16.msra.mxu0 %v2879_v12  ;;  %2632 = vmatpush3.bf16.msra.mxu1 %v2880_v13  ;;  %s4091_s23 = sld [smem:[#allocation30_spill]]  ;;  %s3289_s26 = smov 120   ;;  %vm1045_vm6 = vcmask 60416   ;;  %vm1476_vm7 = vcmask 64512   ;;  %vm1716_vm9 = vcmask 1043456   ;;  %vm2069_vm10 = vcmask 130048  }
 0x11e   : > { %s2536_s2 = sshll.u32 %s718_s21, 3  ;;  %2625 = vmatprep.subr.bf16.mxu0 %v3287_v14  ;;  %2633 = vmatprep.subr.bf16.mxu1 %v3287_v14  ;;  %s4090_s21 = sld [smem:[#allocation28_spill]]  ;;  %vm2072_vm11 = vcmask 195584   ;;  %vm2278_vm14 = vcmask 523264  }
 0x11f   : > { %2627 = vmatprep.mubr.msk.bf16.mxu0 %vm3288_vm1, %v3287_v14  ;;  %2635 = vmatprep.mubr.msk.bf16.mxu1 %vm3288_vm1, %v3287_v14  ;;  %s3290_s22 = smov 112   ;;  %s3291_s15 = smov 104  }
 0x120   : > { %s3728_s18 = scalar_lea.vmem %s4089_s25, %s2536_s2  ;;  %s4092_s3 = sld [smem:[#allocation33_spill]] }
 0x121   : > { %v726_v0 = vld [vmem:[%s3728_s18] sm:$0xff]  ;;  %2626 = vmatpush3.bf16.msra.mxu0 %v2881_v15  ;;  %2634 = vmatpush3.bf16.msra.mxu1 %v2882_v16  ;;  %s3295_s16 = smov 8   ;;  %s3296_s25 = smov 16  }
 0x122   : > { %v730_v1 = vsel %vm729_vm0, %v726_v0, 0.0  ;;  %2639 = vmatprep.subr.bf16.mxu0 %v3287_v14  ;;  %2647 = vmatprep.subr.bf16.mxu1 %v3287_v14  ;;  %s3297_s20 = smov 24   ;;  %s4094_s2 = sld [smem:[#allocation36_spill]] }
 0x123   : > { %731 = vadd.xlane.f32.xlu0 %v730_v1  ;;  %v2883_v41 = vld [vmem:[%s4091_s23] sm:$0xff]   ;;  %v2884_v44 = vld [vmem:[%s4091_s23 + $0x8] sm:$0xff]   ;;  %p4098_p5 = scmp.ne.s32.totalorder %s4083_s4, 0 }
 0x124   : > { %v2537_v33 = vld [vmem:[%s4090_s21] ss:$0 sm:$0xff]  ;;  %s4095_s21 = sld [smem:[#allocation35_spill]] }
 0x127   : > { %1211 = vadd.xlane.f32.xlu0 %v730_v1 }
 0x1b0   : > { %v732_v2 = vpop.xlane.xlu0 %731 }
 0x1b1   : > { %v734_v3 = vmul.f32 0.03125, %v732_v2  ;;  %v910_v2 = vlaneseq }
 0x1b3   : > { %v735_v4 = vsub.f32 %v726_v0, %v734_v3  ;;  %v3293_v3 = vmov 1934713408  }
 0x1b4   : > { %v1212_v5 = vpop.xlane.xlu0 %1211 }
 0x1b5   : > { %v1214_v6 = vmul.f32 0.03125, %v1212_v5  ;;  %v736_v7 = vmul.f32 %v735_v4, %v735_v4  ;;  %v754_v34 = vmul.f32 %v2537_v33, %v735_v4  ;;  %v940_v4 = vunpack.c.l.s4 %v3293_v3 }
 0x1b7   : > { %v1215_v8 = vsub.f32 %v726_v0, %v1214_v6  ;;  %v737_v9 = vsel %vm729_vm0, %v736_v7, 0.0  ;;  %v3292_v0 = vmov 1983009808   ;;  %v3778_v6 = vshrl.u32 %v910_v2, 7 }
 0x1b8   : > { %738 = vadd.xlane.f32.xlu1 %v737_v9  ;;  %v908_v1 = vunpack.c.l.s4 %v3292_v0 }
 0x1b9   : > { %v1216_v10 = vmul.f32 %v1215_v8, %v1215_v8  ;;  %v1234_v38 = vmul.f32 %v2537_v33, %v1215_v8  ;;  %v941_v8 = vunpack.c.0.s8 %v940_v4 }
 0x1ba   : > { %v909_v5 = vunpack.c.0.s8 %v908_v1 }
 0x1bb   : > { %v1217_v11 = vsel %vm729_vm0, %v1216_v10, 0.0 }
 0x1bc   : > { %1218 = vadd.xlane.f32.xlu1 %v1217_v11  ;;  %v3781_v9 = vsub.s32 %v909_v5, %v3778_v6 }
 0x245   : > { %v739_v17 = vpop.xlane.xlu1 %738 }
 0x246   : > { %v740_v18 = vmul.f32 0.032258064, %v739_v17  ;;  %v3784_v17 = vsub.s32 %v941_v8, %v3778_v6 }
 0x248   : > { %2893 = vrsqrt.f32 %v740_v18  ;;  %vm743_vm2 = vcmp.eq.f32.partialorder %v740_v18, inf  ;;  %v746_v23 = vand.u32 2147483648, %v740_v18  ;;  %vm745_vm3 = vcmp.eq.f32.partialorder %v740_v18, 0.0 }
 0x249   : > { %v1219_v19 = vpop.xlane.xlu1 %1218 }
 0x24a   : > { %v1220_v20 = vmul.f32 0.032258064, %v1219_v19 }
 0x24c   : > { %2895 = vrsqrt.f32 %v1220_v20  ;;  %vm1223_vm4 = vcmp.eq.f32.partialorder %v1220_v20, inf  ;;  %v1226_v29 = vand.u32 2147483648, %v1220_v20  ;;  %vm1225_vm5 = vcmp.eq.f32.partialorder %v1220_v20, 0.0 }
 0x252   : > { %v2894_v21 = vpop.eup %2893 }
 0x253   : > { %v742_v22 = vmul.f32 %v2894_v21, %v740_v18 }
 0x255   : > { %v744_v24 = vsel %vm743_vm2, %v740_v18, %v742_v22 }
 0x256   : > { %v2896_v25 = vpop.eup %2895  ;;  %v747_v26 = vsel %vm745_vm3, %v746_v23, %v744_v24 }
 0x257   : > { %v755_v27 = vadd.f32 1e-06, %v747_v26  ;;  %v1222_v28 = vmul.f32 %v2896_v25, %v1220_v20 }
 0x259   : > { %v1224_v30 = vsel %vm1223_vm4, %v1220_v20, %v1222_v28  ;;  %2897 = vrcp.f32 %v755_v27 }
 0x25a   : > { %v1227_v31 = vsel %vm1225_vm5, %v1226_v29, %v1224_v30 }
 0x25b   : > { %v1235_v32 = vadd.f32 1e-06, %v1227_v31 }
 0x25d   : > { %2899 = vrcp.f32 %v1235_v32 }
 0x263   : > { %v2898_v35 = vpop.eup %2897 }
 0x264   : > { %v757_v37 = vmul.f32 %v2898_v35, %v754_v34 }
 0x266   : > { %v764_v39 = vadd.f32 %v2538_v36, %v757_v37 }
 0x267   : > { %v2900_v40 = vpop.eup %2899 }
 0x268   : > { %v765_v42 = vpack.c.bf16 %v764_v39, %v764_v39  ;;  %v1237_v43 = vmul.f32 %v2900_v40, %v1234_v38 }
 0x26a   : > { %2628 = vmatmul.mubr.msk.bf16.vlgmr.msra.gmra.mrb[0].mxu0 %vm729_vm0, %v765_v42  ;;  %2636 = vmatmul.mubr.msk.bf16.vlgmr.msra.gmra.mrb[0].mxu1 %vm729_vm0, %v765_v42  ;;  %v1244_v45 = vadd.f32 %v2538_v36, %v1237_v43 }
 0x26b   : > { %2640 = vmatpush3.bf16.msra.mxu0 %v2883_v41  ;;  %2643 = vmatprep.mubr.msk.bf16.mxu0 %vm3288_vm1, %v3287_v14 }
 0x26c   : > { %2641 = vmatprep.subr.bf16.mxu0 %v3287_v14  ;;  %2649 = vmatprep.mubr.msk.bf16.mxu1 %vm3288_vm1, %v3287_v14  ;;  %v1245_v46 = vpack.c.bf16 %v1244_v45, %v1244_v45 }
 0x26f   : > { %2642 = vmatpush3.bf16.msra.mxu0 %v2884_v44 }
 0x270   : > { %2653 = vmatprep.subr.bf16.mxu0 %v3287_v14 }
 0x272   : > { %2644 = vmatmul.mubr.msk.bf16.vlgmr.msra.gmra.mrb[4].mxu0 %vm729_vm0, %v1245_v46 }
 0x273   : > { %2655 = vmatprep.mubr.msk.bf16.mxu0 %vm3288_vm1, %v3287_v14 }
 0x33d   : > { %v826_v48 = vpop.f32.mrb[0].mxu0  ;;  %v3770_v49 = vpop.f32.mrb[0].mxu1 }
 0x33e   : > { %v827_v50 = vadd.f32 %v2539_v47, %v826_v48  ;;  %v2629_v51 = vpop.f32.mrb[1].mxu0  ;;  %v2637_v52 = vpop.f32.mrb[1].mxu1 }
 0x33f   : > { %v829_v53 = vpop.f32.mrb[2].mxu0  ;;  %v892_v54 = vpop.f32.mrb[2].mxu1 }
 0x340   : > { %v2638_v55 = vpop.f32.mrb[3].mxu1  ;;  %896 = vrot.lane.b32.xlu0 %v827_v50, %s3289_s26  ;;  %v2630_v56 = vpop.f32.mrb[3].mxu0  ;;  %899 = vrot.lane.b32.xlu1 %v827_v50, %s3290_s22 }
 0x344   : > { %902 = vrot.lane.b32.xlu1 %v827_v50, %s3291_s15 }
 0x345   : > { %v1306_v58 = vpop.f32.mrb[4].mxu0 }
 0x346   : > { %v1307_v59 = vadd.f32 %v2553_v57, %v1306_v58  ;;  %v2645_v60 = vpop.f32.mrb[5].mxu0 }
 0x347   : > { %v1309_v61 = vpop.f32.mrb[6].mxu0 }
 0x348   : > { %v1312_v62 = vmul.f32 0.35355338, %v1307_v59  ;;  %v2646_v63 = vpop.f32.mrb[7].mxu0 }
 0x34a   : > { %1317 = vrot.lane.b32.xlu0 %v1312_v62, %s3290_s22  ;;  %1314 = vrot.lane.b32.xlu1 %v1312_v62, %s3289_s26 }
 0x34e   : > { %1320 = vrot.lane.b32.xlu1 %v1312_v62, %s3291_s15 }
 0x3b2   : > { %v900_v7 = vpop.permute.xlu1 %899  ;;  %v897_v12 = vpop.permute.xlu0 %896 }
 0x3b3   : > { %v905_v10 = vcombine.low %v827_v50, %v900_v7  ;;  %v906_v11 = vcombine.high %v827_v50, %v900_v7 }
 0x3b5   : > { %v913_v18 = vrot.slane %v905_v10, %v3781_v9  ;;  %v920_v19 = vrot.slane %v906_v11, %v3781_v9 }
 0x3b6   : > { %v903_v13 = vpop.permute.xlu1 %902 }
 0x3b7   : > { %v921_v15 = vcombine.low %v897_v12, %v903_v13  ;;  %v922_v16 = vcombine.high %v897_v12, %v903_v13 }
 0x3b9   : > { %v929_v20 = vrot.slane %v921_v15, %v3781_v9  ;;  %v936_v21 = vrot.slane %v922_v16, %v3781_v9 }
 0x3bb   : > { %v937_v22 = vcombine.low %v913_v18, %v929_v20  ;;  %v938_v23 = vcombine.high %v913_v18, %v929_v20  ;;  %v953_v24 = vcombine.low %v920_v19, %v936_v21  ;;  %v954_v25 = vcombine.high %v920_v19, %v936_v21 }
 0x3bc   : > { %v1315_v26 = vpop.permute.xlu1 %1314  ;;  %v1318_v31 = vpop.permute.xlu0 %1317 }
 0x3bd   : > { %v945_v27 = vrot.slane %v937_v22, %v3784_v17  ;;  %v952_v28 = vrot.slane %v938_v23, %v3784_v17  ;;  %v961_v29 = vrot.slane %v953_v24, %v3784_v17  ;;  %v968_v30 = vrot.slane %v954_v25, %v3784_v17 }
 0x3be   : > { %v1323_v36 = vcombine.low %v1312_v62, %v1318_v31  ;;  %v1324_v37 = vcombine.high %v1312_v62, %v1318_v31 }
 0x3bf   : > { %v973_v32 = vcombine.low %v945_v27, %v952_v28  ;;  %v2547_v33 = vcombine.high %v945_v27, %v952_v28  ;;  %v989_v34 = vcombine.low %v961_v29, %v968_v30  ;;  %v2548_v35 = vcombine.high %v961_v29, %v968_v30 }
 0x3c0   : > { %v1321_v38 = vpop.permute.xlu1 %1320  ;;  %v1331_v50 = vrot.slane %v1323_v36, %v3781_v9  ;;  %v1338_v51 = vrot.slane %v1324_v37, %v3781_v9 }
 0x3c1   : > { %v980_v39 = vrot.slane %v973_v32, %v3781_v9  ;;  %v988_v40 = vrot.slane %v2547_v33, %v3781_v9  ;;  %v996_v41 = vrot.slane %v989_v34, %v3781_v9  ;;  %v1004_v42 = vrot.slane %v2548_v35, %v3781_v9 }
 0x3c2   : > { %v1339_v43 = vcombine.low %v1315_v26, %v1321_v38  ;;  %v1340_v44 = vcombine.high %v1315_v26, %v1321_v38 }
 0x3c3   : > { %v1005_v45 = vcombine.low %v980_v39, %v988_v40  ;;  %v1006_v46 = vcombine.high %v980_v39, %v988_v40  ;;  %v1021_v47 = vcombine.low %v996_v41, %v1004_v42  ;;  %v1022_v48 = vcombine.high %v996_v41, %v1004_v42 }
 0x3c4   : > { %v1347_v52 = vrot.slane %v1339_v43, %v3781_v9  ;;  %v1354_v53 = vrot.slane %v1340_v44, %v3781_v9 }
 0x3c5   : > { %v1013_v54 = vrot.slane %v1005_v45, %v3784_v17  ;;  %v1020_v55 = vrot.slane %v1006_v46, %v3784_v17  ;;  %v1029_v56 = vrot.slane %v1021_v47, %v3784_v17  ;;  %v1036_v57 = vrot.slane %v1022_v48, %v3784_v17  ;;  %v1463_v46 = vld [vmem:[%s629_s24] sm:$0x1] }
 0x3c6   : > { %v1355_v58 = vcombine.low %v1331_v50, %v1347_v52  ;;  %v1356_v59 = vcombine.high %v1331_v50, %v1347_v52  ;;  %v1371_v60 = vcombine.low %v1338_v51, %v1354_v53  ;;  %v1372_v61 = vcombine.high %v1338_v51, %v1354_v53 }
 0x3c7   : > { %v1037_v62 = vcombine.low %v1013_v54, %v1029_v56  ;;  %v1038_v63 = vcombine.high %v1013_v54, %v1029_v56  ;;  %v1039_v0 = vcombine.low %v1020_v55, %v1036_v57  ;;  %v1040_v1 = vcombine.high %v1020_v55, %v1036_v57 }
 0x3c8   : > { %v1363_v2 = vrot.slane %v1355_v58, %v3784_v17  ;;  %v1370_v3 = vrot.slane %v1356_v59, %v3784_v17  ;;  %v1379_v4 = vrot.slane %v1371_v60, %v3784_v17  ;;  %v1386_v5 = vrot.slane %v1372_v61, %v3784_v17 }
 0x3c9   : > { %v1041_v7 = vpack.c.bf16 %v1037_v62, %v1037_v62  ;;  %v1042_v8 = vpack.c.bf16 %v1038_v63, %v1038_v63  ;;  %v1043_v10 = vpack.c.bf16 %v1039_v0, %v1039_v0  ;;  %v1044_v11 = vpack.c.bf16 %v1040_v1, %v1040_v1 }
 0x3ca   : > { %v1391_v12 = vcombine.low %v1363_v2, %v1370_v3  ;;  %v2557_v13 = vcombine.high %v1363_v2, %v1370_v3  ;;  %v1407_v15 = vcombine.low %v1379_v4, %v1386_v5  ;;  %v2558_v16 = vcombine.high %v1379_v4, %v1386_v5 }
 0x3cb   : > { %1046 = vst.msk [vmem:[#allocation2] sm:$0xf] %vm1045_vm6, %v1041_v7  ;;  %1047 = vst.msk [vmem:[#allocation2 + $0x4] sm:$0xf] %vm1045_vm6, %v1042_v8  ;;  %vm1464_vm8 = vcmp.eq.f32.partialorder %v1463_v46, 0.0  ;;  %v1473_v47 = vsub.s32 0, %v3778_v6 }
 0x3cc   : > { %1048 = vst.msk [vmem:[#allocation2 + $0x8] sm:$0xf] %vm1045_vm6, %v1043_v10  ;;  %1049 = vst.msk [vmem:[#allocation2 + $0xc] sm:$0xf] %vm1045_vm6, %v1044_v11  ;;  %v1398_v18 = vrot.slane %v1391_v12, %v3781_v9  ;;  %v1406_v19 = vrot.slane %v2557_v13, %v3781_v9  ;;  %v1414_v20 = vrot.slane %v1407_v15, %v3781_v9  ;;  %v1465_v48 = vsel %vm1464_vm8, -1e+09, %v3287_v14 }
 0x3cd   : > { %v1422_v21 = vrot.slane %v2558_v16, %v3781_v9  ;;  %v1474_v50 = vrot.slane %v1465_v48, %v1473_v47  ;;  %v2543_v12 = vld [vmem:[#allocation13] ss:$0 sm:$0xff] }
 0x3ce   : > { %v1423_v22 = vcombine.low %v1398_v18, %v1406_v19  ;;  %v1424_v30 = vcombine.high %v1398_v18, %v1406_v19  ;;  %v890_v13 = vadd.f32 %v2543_v12, %v3770_v49 }
 0x3cf   : > { %v1439_v23 = vcombine.low %v1414_v20, %v1422_v21  ;;  %v1440_v31 = vcombine.high %v1414_v20, %v1422_v21 }
 0x3d0   : > { %v1431_v24 = vrot.slane %v1423_v22, %v3784_v17  ;;  %v1438_v38 = vrot.slane %v1424_v30, %v3784_v17 }
 0x3d1   : > { %v1447_v25 = vrot.slane %v1439_v23, %v3784_v17  ;;  %v1454_v39 = vrot.slane %v1440_v31, %v3784_v17 }
 0x3d2   : > { %v1466_v26 = vld [vmem:[#allocation2] sm:$0xf]  ;;  %v1467_v27 = vld [vmem:[#allocation2 + $0x4] sm:$0xf] }
 0x3d3   : > { %v1481_v28 = vsel %vm1476_vm7, %v1466_v26, 0  ;;  %v1527_v29 = vsel %vm1476_vm7, %v1467_v27, 0  ;;  %v1455_v32 = vcombine.low %v1431_v24, %v1447_v25  ;;  %v1456_v33 = vcombine.high %v1431_v24, %v1447_v25  ;;  %v1468_v34 = vld [vmem:[#allocation2 + $0x8] sm:$0xf]  ;;  %v1469_v35 = vld [vmem:[#allocation2 + $0xc] sm:$0xf] }
 0x3d4   : > { %2648 = vmatpush3.bf16.xpose.msra.mxu1 %v1481_v28  ;;  %2654 = vmatpush3.bf16.xpose.msra.mxu0 %v1527_v29  ;;  %v1573_v40 = vsel %vm1476_vm7, %v1468_v34, 0  ;;  %v1619_v41 = vsel %vm1476_vm7, %v1469_v35, 0  ;;  %v1457_v42 = vcombine.low %v1438_v38, %v1454_v39  ;;  %v1458_v43 = vcombine.high %v1438_v38, %v1454_v39 }
 0x3d5   : > { %2659 = vmatprep.subr.bf16.mxu1 %v3287_v14  ;;  %2665 = vmatprep.subr.bf16.mxu0 %v3287_v14  ;;  %v1459_v36 = vpack.c.bf16 %v1455_v32, %v1455_v32  ;;  %v1460_v37 = vpack.c.bf16 %v1456_v33, %v1456_v33 }
 0x3d6   : > { %v1461_v44 = vpack.c.bf16 %v1457_v42, %v1457_v42  ;;  %v1462_v45 = vpack.c.bf16 %v1458_v43, %v1458_v43 }
 0x3db   : > { %2650 = vmatmul.mubr.msk.bf16.vlgmr.msra.gmra.mrb[4].mxu1 %vm1476_vm7, %v1459_v36  ;;  %2656 = vmatmul.mubr.msk.bf16.vlgmr.msra.gmra.mrb[8].mxu0 %vm1476_vm7, %v1460_v37 }
 0x3dc   : > { %2660 = vmatpush3.bf16.xpose.msra.mxu1 %v1573_v40  ;;  %2666 = vmatpush3.bf16.xpose.msra.mxu0 %v1619_v41 }
 0x3dd   : > { %2661 = vmatprep.mubr.msk.bf16.mxu1 %vm3288_vm1, %v3287_v14  ;;  %2667 = vmatprep.mubr.msk.bf16.mxu0 %vm3288_vm1, %v3287_v14 }
 0x3de   : > { %2671 = vmatprep.subr.bf16.mxu1 %v3287_v14  ;;  %2677 = vmatprep.subr.bf16.mxu0 %v3287_v14 }
 0x3e3   : > { %2662 = vmatmul.mubr.msk.bf16.vlgmr.msra.gmra.mrb[8].mxu1 %vm1476_vm7, %v1461_v44  ;;  %2668 = vmatmul.mubr.msk.bf16.vlgmr.msra.gmra.mrb[12].mxu0 %vm1476_vm7, %v1462_v45 }
 0x3e4   : > { %2673 = vmatprep.mubr.msk.bf16.mxu1 %vm3288_vm1, %v3287_v14  ;;  %2679 = vmatprep.mubr.msk.bf16.mxu0 %vm3288_vm1, %v3287_v14 }
 0x4ae   : > { %v1517_v51 = vpop.f32.mrb[4].mxu1  ;;  %v1563_v52 = vpop.f32.mrb[8].mxu0 }
 0x4af   : > { %v1518_v53 = vadd.f32 %v1517_v51, %v1474_v50  ;;  %v1564_v54 = vadd.f32 %v1563_v52, %v1474_v50  ;;  %v2651_v55 = vpop.f32.mrb[5].mxu1  ;;  %v2657_v56 = vpop.f32.mrb[9].mxu0 }
 0x4b0   : > { %v1520_v57 = vpop.f32.mrb[6].mxu1  ;;  %v1566_v58 = vpop.f32.mrb[10].mxu0 }
 0x4b1   : > { %v2652_v59 = vpop.f32.mrb[7].mxu1  ;;  %v2658_v60 = vpop.f32.mrb[11].mxu0  ;;  %v1664_v61 = vsel %vm1476_vm7, %v1564_v54, -inf  ;;  %v1661_v62 = vsel %vm1476_vm7, %v1518_v53, -inf }
 0x4b2   : > { %1665 = vmax.xlane.f32.xlu1 %v1664_v61  ;;  %1662 = vmax.xlane.f32.xlu0 %v1661_v62 }
 0x4b6   : > { %v1609_v6 = vpop.f32.mrb[8].mxu1  ;;  %v1655_v63 = vpop.f32.mrb[12].mxu0 }
 0x4b7   : > { %v1610_v0 = vadd.f32 %v1609_v6, %v1474_v50  ;;  %v2663_v1 = vpop.f32.mrb[9].mxu1  ;;  %v2669_v2 = vpop.f32.mrb[13].mxu0  ;;  %v1656_v5 = vadd.f32 %v1655_v63, %v1474_v50 }
 0x4b8   : > { %v1612_v3 = vpop.f32.mrb[10].mxu1  ;;  %v1658_v4 = vpop.f32.mrb[14].mxu0 }
 0x4b9   : > { %v2664_v7 = vpop.f32.mrb[11].mxu1  ;;  %v2670_v8 = vpop.f32.mrb[15].mxu0  ;;  %v1667_v10 = vsel %vm1476_vm7, %v1610_v0, -inf  ;;  %v1670_v11 = vsel %vm1476_vm7, %v1656_v5, -inf }
 0x4ba   : > { %1668 = vmax.xlane.f32.xlu0 %v1667_v10 }
 0x4be   : > { %1671 = vmax.xlane.f32.xlu0 %v1670_v11 }
 0x4c3   : > { %1054 = vrot.lane.b32.xlu1 %v890_v13, %s3290_s22  ;;  %s2584_s22 = sshll.u32 %s3266_s30, 7  ;;  %s2333_s30 = scalar_lea.sflag [#allocation6], %s3699_s7 }
 0x4c7   : > { %1057 = vrot.lane.b32.xlu1 %v890_v13, %s3291_s15  ;;  %s4093_s15 = sld [smem:[#allocation34_spill]] }
 0x4d4   : > { %1051 = vrot.lane.b32.xlu0 %v890_v13, %s3289_s26  ;;  %s4096_s26 = sld [smem:[#allocation37_spill]] }
 0x53f   : > { %v1666_v15 = vpop.xlane.xlu1 %1665  ;;  %v1663_v16 = vpop.xlane.xlu0 %1662 }
 0x540   : > { %v1674_v18 = vsub.f32 %v1564_v54, %v1666_v15  ;;  %v1673_v19 = vsub.f32 %v1518_v53, %v1663_v16 }
 0x542   : > { %v1679_v20 = vmul.f32 1.442695, %v1674_v18  ;;  %v1677_v21 = vmul.f32 1.442695, %v1673_v19 }
 0x543   : > { %v1055_v24 = vpop.permute.xlu1 %1054 }
 0x544   : > { %2901 = vpow2.f32 %v1679_v20  ;;  %v1060_v28 = vcombine.low %v890_v13, %v1055_v24  ;;  %v1061_v29 = vcombine.high %v890_v13, %v1055_v24 }
 0x545   : > { %2903 = vpow2.f32 %v1677_v21 }
 0x546   : > { %v1068_v38 = vrot.slane %v1060_v28, %v3781_v9  ;;  %v1075_v39 = vrot.slane %v1061_v29, %v3781_v9 }
 0x547   : > { %v1669_v22 = vpop.xlane.xlu0 %1668  ;;  %v1058_v32 = vpop.permute.xlu1 %1057 }
 0x548   : > { %v1675_v23 = vsub.f32 %v1610_v0, %v1669_v22 }
 0x54a   : > { %v1681_v25 = vmul.f32 1.442695, %v1675_v23 }
 0x54b   : > { %v1672_v26 = vpop.xlane.xlu0 %1671 }
 0x54c   : > { %2905 = vpow2.f32 %v1681_v25  ;;  %v1676_v49 = vsub.f32 %v1656_v5, %v1672_v26 }
 0x54e   : > { %v3854_v27 = vpop.eup %2901  ;;  %v1683_v30 = vmul.f32 1.442695, %v1676_v49 }
 0x54f   : > { %v3856_v31 = vpop.eup %2903  ;;  %v1052_v33 = vpop.permute.xlu0 %1051  ;;  %v1688_v34 = vsel %vm1476_vm7, %v3854_v27, 0.0 }
 0x550   : > { %2907 = vpow2.f32 %v1683_v30  ;;  %v1076_v35 = vcombine.low %v1052_v33, %v1058_v32  ;;  %v1077_v36 = vcombine.high %v1052_v33, %v1058_v32  ;;  %v1685_v37 = vsel %vm1476_vm7, %v3856_v31, 0.0  ;;  %1689 = vadd.xlane.f32.xlu0 %v1688_v34 }
 0x551   : > { %1686 = vadd.xlane.f32.xlu1 %v1685_v37 }
 0x552   : > { %v1084_v40 = vrot.slane %v1076_v35, %v3781_v9  ;;  %v1091_v41 = vrot.slane %v1077_v36, %v3781_v9 }
 0x554   : > { %v1092_v42 = vcombine.low %v1068_v38, %v1084_v40  ;;  %v1093_v43 = vcombine.high %v1068_v38, %v1084_v40  ;;  %v1108_v44 = vcombine.low %v1075_v39, %v1091_v41  ;;  %v1109_v45 = vcombine.high %v1075_v39, %v1091_v41  ;;  %v2885_v41 = vld [vmem:[%s4092_s3] sm:$0xff]  }
 0x556   : > { %v3866_v46 = vpop.eup %2905  ;;  %v1100_v47 = vrot.slane %v1092_v42, %v3784_v17  ;;  %v1107_v48 = vrot.slane %v1093_v43, %v3784_v17  ;;  %v1116_v50 = vrot.slane %v1108_v44, %v3784_v17  ;;  %v1123_v51 = vrot.slane %v1109_v45, %v3784_v17 }
 0x557   : > { %v1691_v52 = vsel %vm1476_vm7, %v3866_v46, 0.0 }
 0x558   : > { %v1128_v53 = vcombine.low %v1100_v47, %v1107_v48  ;;  %v2549_v54 = vcombine.high %v1100_v47, %v1107_v48  ;;  %v1144_v55 = vcombine.low %v1116_v50, %v1123_v51  ;;  %v2550_v56 = vcombine.high %v1116_v50, %v1123_v51  ;;  %1692 = vadd.xlane.f32.xlu0 %v1691_v52 }
 0x55a   : > { %v3874_v57 = vpop.eup %2907  ;;  %v1135_v58 = vrot.slane %v1128_v53, %v3781_v9  ;;  %v1143_v59 = vrot.slane %v2549_v54, %v3781_v9  ;;  %v1151_v60 = vrot.slane %v1144_v55, %v3781_v9  ;;  %v1159_v61 = vrot.slane %v2550_v56, %v3781_v9 }
 0x55b   : > { %v1694_v62 = vsel %vm1476_vm7, %v3874_v57, 0.0 }
 0x55c   : > { %v1160_v6 = vcombine.low %v1135_v58, %v1143_v59  ;;  %v1161_v63 = vcombine.high %v1135_v58, %v1143_v59  ;;  %v1176_v0 = vcombine.low %v1151_v60, %v1159_v61  ;;  %v1177_v1 = vcombine.high %v1151_v60, %v1159_v61  ;;  %1695 = vadd.xlane.f32.xlu0 %v1694_v62 }
 0x55e   : > { %v1168_v2 = vrot.slane %v1160_v6, %v3784_v17  ;;  %v1175_v3 = vrot.slane %v1161_v63, %v3784_v17  ;;  %v1184_v4 = vrot.slane %v1176_v0, %v3784_v17  ;;  %v1191_v5 = vrot.slane %v1177_v1, %v3784_v17 }
 0x560   : > { %v1192_v7 = vcombine.low %v1168_v2, %v1184_v4  ;;  %v1193_v8 = vcombine.high %v1168_v2, %v1184_v4  ;;  %v1194_v10 = vcombine.low %v1175_v3, %v1191_v5  ;;  %v1195_v11 = vcombine.high %v1175_v3, %v1191_v5 }
 0x562   : > { %v1196_v12 = vpack.c.bf16 %v1192_v7, %v1192_v7  ;;  %v1197_v13 = vpack.c.bf16 %v1193_v8, %v1193_v8  ;;  %v1198_v15 = vpack.c.bf16 %v1194_v10, %v1194_v10  ;;  %v1199_v16 = vpack.c.bf16 %v1195_v11, %v1195_v11 }
 0x563   : > { %v3294_v10 = vmov 0  }
 0x564   : > { %1200 = vst.msk [vmem:[#allocation3] sm:$0xf] %vm1045_vm6, %v1196_v12  ;;  %1201 = vst.msk [vmem:[#allocation3 + $0x4] sm:$0xf] %vm1045_vm6, %v1197_v13 }
 0x565   : > { %1202 = vst.msk [vmem:[#allocation3 + $0x8] sm:$0xf] %vm1045_vm6, %v1198_v15  ;;  %1203 = vst.msk [vmem:[#allocation3 + $0xc] sm:$0xf] %vm1045_vm6, %v1199_v16 }
 0x56b   : > { %v1709_v18 = vld [vmem:[#allocation3] sm:$0xf]  ;;  %v1710_v19 = vld [vmem:[#allocation3 + $0x4] sm:$0xf] }
 0x56c   : > { %v1718_v20 = vsel %vm1716_vm9, %v1709_v18, 0  ;;  %v1764_v21 = vsel %vm1716_vm9, %v1710_v19, 0  ;;  %v1712_v30 = vld [vmem:[#allocation3 + $0xc] sm:$0xf]  ;;  %v1711_v33 = vld [vmem:[#allocation3 + $0x8] sm:$0xf] }
 0x56d   : > { %2672 = vmatpush3.bf16.msra.mxu1 %v1718_v20  ;;  %2678 = vmatpush3.bf16.msra.mxu0 %v1764_v21  ;;  %v1856_v35 = vsel %vm1716_vm9, %v1712_v30, 0  ;;  %v1810_v36 = vsel %vm1716_vm9, %v1711_v33, 0 }
 0x56e   : > { %2683 = vmatprep.subr.bf16.mxu1 %v3287_v14  ;;  %2689 = vmatprep.subr.bf16.mxu0 %v3287_v14 }
 0x5dd   : > { %v1690_v22 = vpop.xlane.xlu0 %1689 }
 0x5de   : > { %v1687_v23 = vpop.xlane.xlu1 %1686  ;;  %2909 = vrcp.f32 %v1690_v22 }
 0x5df   : > { %2911 = vrcp.f32 %v1687_v23 }
 0x5e5   : > { %v1693_v24 = vpop.xlane.xlu0 %1692 }
 0x5e6   : > { %2913 = vrcp.f32 %v1693_v24 }
 0x5e8   : > { %v2910_v25 = vpop.eup %2909 }
 0x5e9   : > { %v2912_v26 = vpop.eup %2911  ;;  %v1702_v49 = vmul.f32 %v2910_v25, %v3854_v27  ;;  %v1696_v28 = vpop.xlane.xlu0 %1695 }
 0x5ea   : > { %v1701_v29 = vmul.f32 %v2912_v26, %v3856_v31  ;;  %2915 = vrcp.f32 %v1696_v28 }
 0x5eb   : > { %v1706_v32 = vpack.c.bf16 %v1702_v49, %v1702_v49 }
 0x5ec   : > { %v1705_v34 = vpack.c.bf16 %v1701_v29, %v1701_v29 }
 0x5ed   : > { %2680 = vmatmul.mubr.msk.bf16.vlgmr.msra.gmra.mrb[16].mxu0 %vm1476_vm7, %v1706_v32 }
 0x5ee   : > { %2674 = vmatmul.mubr.msk.bf16.vlgmr.msra.gmra.mrb[12].mxu1 %vm1476_vm7, %v1705_v34  ;;  %2690 = vmatpush3.bf16.msra.mxu0 %v1856_v35 }
 0x5ef   : > { %2684 = vmatpush3.bf16.msra.mxu1 %v1810_v36  ;;  %2685 = vmatprep.mubr.msk.bf16.mxu1 %vm3288_vm1, %v3287_v14 }
 0x5f0   : > { %v2914_v27 = vpop.eup %2913  ;;  %2691 = vmatprep.mubr.msk.bf16.mxu0 %vm3288_vm1, %v3287_v14  ;;  %2695 = vmatprep.subr.bf16.mxu1 %v3287_v14 }
 0x5f1   : > { %v1703_v31 = vmul.f32 %v2914_v27, %v3866_v46  ;;  %2703 = vmatprep.subr.bf16.mxu0 %v3287_v14 }
 0x5f3   : > { %v1707_v37 = vpack.c.bf16 %v1703_v31, %v1703_v31 }
 0x5f4   : > { %v2916_v38 = vpop.eup %2915 }
 0x5f5   : > { %v1704_v39 = vmul.f32 %v2916_v38, %v3874_v57 }
 0x5f6   : > { %2686 = vmatmul.mubr.msk.bf16.vlgmr.msra.gmra.mrb[16].mxu1 %vm1476_vm7, %v1707_v37 }
 0x5f7   : > { %v1708_v40 = vpack.c.bf16 %v1704_v39, %v1704_v39  ;;  %2699 = vmatprep.mubr.msk.bf16.mxu1 %vm3288_vm1, %v3287_v14  ;;  %2696 = vmatpush3.bf16.msra.mxu1 %v2885_v41 }
 0x5f8   : > { %2697 = vmatprep.subr.bf16.mxu1 %v3287_v14 }
 0x5f9   : > { %2692 = vmatmul.mubr.msk.bf16.vlgmr.msra.gmra.mrb[20].mxu0 %vm1476_vm7, %v1708_v40  ;;  %v2886_v40 = vld [vmem:[%s4092_s3 + $0x8] sm:$0xff]  }
 0x5fa   : > { %2707 = vmatprep.mubr.msk.bf16.mxu0 %vm3288_vm1, %v3287_v14 }
 0x5fb   : > { %2698 = vmatpush3.bf16.msra.mxu1 %v2886_v40 }
 0x5fc   : > { %2711 = vmatprep.subr.bf16.mxu1 %v3287_v14 }
 0x6c0   : > { %v1800_v42 = vpop.f32.mrb[16].mxu0 }
 0x6c1   : > { %v1754_v43 = vpop.f32.mrb[12].mxu1  ;;  %v2681_v44 = vpop.f32.mrb[17].mxu0  ;;  %v1932_v55 = vpack.c.bf16 %v1800_v42, %v1800_v42 }
 0x6c2   : > { %v2675_v45 = vpop.f32.mrb[13].mxu1  ;;  %v1803_v46 = vpop.f32.mrb[18].mxu0  ;;  %v1898_v51 = vpack.c.bf16 %v1754_v43, %v1754_v43 }
 0x6c3   : > { %v1757_v47 = vpop.f32.mrb[14].mxu1  ;;  %v2682_v48 = vpop.f32.mrb[19].mxu0  ;;  %v1939_v1 = vrot.slane %v1932_v55, %v3781_v9 }
 0x6c4   : > { %v2676_v50 = vpop.f32.mrb[15].mxu1  ;;  %v1905_v57 = vrot.slane %v1898_v51, %v3781_v9 }
 0x6c9   : > { %v1846_v52 = vpop.f32.mrb[16].mxu1 }
 0x6ca   : > { %v1906_v53 = vpack.c.bf16 %v1846_v52, %v1846_v52  ;;  %v2687_v54 = vpop.f32.mrb[17].mxu1 }
 0x6cb   : > { %v1849_v56 = vpop.f32.mrb[18].mxu1 }
 0x6cc   : > { %v1913_v58 = vrot.slane %v1906_v53, %v3781_v9  ;;  %v2688_v59 = vpop.f32.mrb[19].mxu1  ;;  %v1892_v60 = vpop.f32.mrb[20].mxu0 }
 0x6cd   : > { %v1940_v61 = vpack.c.bf16 %v1892_v60, %v1892_v60  ;;  %v2693_v62 = vpop.f32.mrb[21].mxu0 }
 0x6ce   : > { %v1914_v6 = vcombine.low %v1905_v57, %v1913_v58  ;;  %v1915_v63 = vcombine.high %v1905_v57, %v1913_v58  ;;  %v1895_v0 = vpop.f32.mrb[22].mxu0  ;;  %v2567_v62 = vld [vmem:[#allocation15] ss:$0 sm:$0xff] }
 0x6cf   : > { %v1947_v2 = vrot.slane %v1940_v61, %v3781_v9  ;;  %v2694_v3 = vpop.f32.mrb[23].mxu0 }
 0x6d0   : > { %v1922_v4 = vrot.slane %v1914_v6, %v3784_v17  ;;  %v1929_v5 = vrot.slane %v1915_v63, %v3784_v17 }
 0x6d1   : > { %v1948_v7 = vcombine.low %v1939_v1, %v1947_v2  ;;  %v1949_v8 = vcombine.high %v1939_v1, %v1947_v2  ;;  %v2921_v2 = vld [vmem:[%s3728_s18] sm:$0xff] }
 0x6d2   : > { %v1930_v11 = vcombine.high %v1922_v4, %v3294_v10  ;;  %v1931_v15 = vcombine.high %v1929_v5, %v3294_v10  ;;  %v1970_v16 = vshrl.u32 %v1922_v4, 16  ;;  %v1986_v23 = vshrl.u32 %v1929_v5, 16 }
 0x6d3   : > { %v1956_v12 = vrot.slane %v1948_v7, %v3784_v17  ;;  %v1963_v13 = vrot.slane %v1949_v8, %v3784_v17 }
 0x6d4   : > { %v1978_v22 = vshrl.u32 %v1930_v11, 16  ;;  %v1994_v30 = vshrl.u32 %v1931_v15, 16 }
 0x6d5   : > { %v1964_v18 = vcombine.high %v1956_v12, %v3294_v10  ;;  %v1965_v19 = vcombine.high %v1963_v13, %v3294_v10  ;;  %v1968_v20 = vpack.i.b16 %v1956_v12, %v1922_v4  ;;  %v1971_v21 = vshrl.u32 %v1956_v12, 16 }
 0x6d6   : > { %v1984_v24 = vpack.i.b16 %v1963_v13, %v1929_v5  ;;  %v1987_v25 = vshrl.u32 %v1963_v13, 16  ;;  %v2887_v13 = vld [vmem:[%s4093_s15] sm:$0xff]  }
 0x6d7   : > { %v1972_v26 = vpack.i.b16 %v1971_v21, %v1970_v16  ;;  %v1976_v49 = vpack.i.b16 %v1964_v18, %v1930_v11  ;;  %v1979_v28 = vshrl.u32 %v1964_v18, 16  ;;  %v1992_v29 = vpack.i.b16 %v1965_v19, %v1931_v15  ;;  %2704 = vmatpush3.bf16.msra.mxu0 %v2887_v13  ;;  %v2888_v15 = vld [vmem:[%s4093_s15 + $0x8] sm:$0xff]   ;;  %v2889_v16 = vld [vmem:[%s4094_s2] sm:$0xff]  }
 0x6d8   : > { %v1988_v32 = vpack.i.b16 %v1987_v25, %v1986_v23  ;;  %v1995_v33 = vshrl.u32 %v1965_v19, 16  ;;  %v1998_v34 = vcombine.low %v1968_v20, %v1984_v24  ;;  %2705 = vmatprep.subr.bf16.mxu0 %v3287_v14  ;;  %v2890_v18 = vld [vmem:[%s4094_s2 + $0x8] sm:$0xff]  }
 0x6d9   : > { %v1980_v35 = vpack.i.b16 %v1979_v28, %v1978_v22  ;;  %v2006_v36 = vcombine.low %v1976_v49, %v1992_v29  ;;  %v2571_v49 = vld [vmem:[#allocation16] ss:$0 sm:$0xff] }
 0x6da   : > { %v1996_v27 = vpack.i.b16 %v1995_v33, %v1994_v30  ;;  %v2023_v31 = vcombine.low %v1972_v26, %v1988_v32  ;;  %v2005_v37 = vrot.slane %v1998_v34, %v3781_v9  ;;  %v2572_v30 = vld [vmem:[#allocation18] ss:$0 sm:$0xff] }
 0x6db   : > { %v2013_v38 = vrot.slane %v2006_v36, %v3781_v9  ;;  %2706 = vmatpush3.bf16.msra.mxu0 %v2888_v15  ;;  %v2892_v36 = vld [vmem:[%s4094_s2 + $0x18] sm:$0xff]  }
 0x6dc   : > { %v2031_v39 = vcombine.low %v1980_v35, %v1996_v27  ;;  %v2030_v42 = vrot.slane %v2023_v31, %v3781_v9  ;;  %v2891_v35 = vld [vmem:[%s4094_s2 + $0x10] sm:$0xff]   ;;  %v2573_v27 = vld [vmem:[%s4095_s21] ss:$0 sm:$0xff]  ;;  %s4097_s2 = sld [smem:[#allocation38_spill]] }
 0x6dd   : > { %v2014_v41 = vcombine.low %v2005_v37, %v2013_v38 }
 0x6de   : > { %v2038_v43 = vrot.slane %v2031_v39, %v3781_v9 }
 0x6df   : > { %v2021_v44 = vrot.slane %v2014_v41, %v3784_v17 }
 0x6e0   : > { %v2039_v45 = vcombine.low %v2030_v42, %v2038_v43  ;;  %v2582_v43 = vld [vmem:[%s4096_s26] ss:$0 sm:$0xff] }
 0x6e1   : > { %v2022_v47 = vcombine.high %v2021_v44, %v3294_v10  ;;  %v2051_v48 = vshrl.u32 %v2021_v44, 16 }
 0x6e2   : > { %v2046_v46 = vrot.slane %v2039_v45, %v3784_v17  ;;  %s3977_s3 = scalar_lea.hbm %s4097_s2, %s2584_s22 }
 0x6e3   : > { %v2057_v55 = vshrl.u32 %v2022_v47, 16 }
 0x6e4   : > { %v2052_v50 = vshrl.u32 %v2046_v46, 16  ;;  %v2047_v51 = vcombine.high %v2046_v46, %v3294_v10  ;;  %v2050_v52 = vpack.i.b16 %v2046_v46, %v2021_v44 }
 0x6e6   : > { %v2053_v53 = vpack.i.b16 %v2052_v50, %v2051_v48  ;;  %v2056_v54 = vpack.i.b16 %v2047_v51, %v2022_v47  ;;  %v2058_v56 = vshrl.u32 %v2047_v51, 16 }
 0x6e8   : > { %2060 = vrot.lane.b32.xlu1 %v2053_v53, %s3295_s16  ;;  %2062 = vrot.lane.b32.xlu0 %v2056_v54, %s3296_s25  ;;  %v2059_v9 = vpack.i.b16 %v2058_v56, %v2057_v55  ;;  %s2535_s16 = sshll.u32 %s3699_s7, 3  ;;  %s3298_s25 = smov [#allocation19]  }
 0x6e9   : > { %s716_s24 = scalar_lea.vmem [#allocation19], %s2535_s16 }
 0x6ea   : > { %s2347_s17 = sshll.u32 %s716_s24, 4  ;;  %s3979_s17 = int_to_ptr.vmem [resolvable:$true] %s2347_s17 }
 0x6eb   : > { %s3176_s16 = scalar_lea.vmem %s3979_s17, 128 }
 0x6ec   : > { %2064 = vrot.lane.b32.xlu1 %v2059_v9, %s3297_s20  ;;  %p3177_p0 = scmp.ne.s32.totalorder %s3979_s17, %s3176_s16  ;;  %s3180_s20 = sshll.u32 %s3298_s25, 4  ;;  %s3181_s20 = int_to_ptr.vmem [resolvable:$false] %s3180_s20 }
 0x6ed   : > { %s3182_s26 = scalar_lea.vmem %s3181_s20, 256  ;;  %p3183_p13 = scmp.lt.s32.totalorder %s3979_s17, %s3181_s20 }
 0x6ee   : > { %p3178_p7 = pnand %p3177_p0, %p4098_p5  ;;  %p3184_p2 = scmp.lt.s32.totalorder %s3182_s26, %s3176_s16 }
 0x6f0   : > { %p3179_p10 = pneg %p3178_p7  ;;  %p3185_p8 = por %p3184_p2, %p3183_p13 }
 0x6f2   : > { %p3186_p9 = pnand %p3185_p8, %p3179_p10 }
 0x75a   : > { %v2061_v57 = vpop.permute.xlu1 %2060  ;;  %v2063_v58 = vpop.permute.xlu0 %2062 }
 0x75b   : > { %v2068_v17 = vsel %vm1476_vm7, %v2050_v52, %v2061_v57 }
 0x75c   : > { %v2071_v59 = vsel %vm2069_vm10, %v2068_v17, %v2063_v58 }
 0x75e   : > { %v2065_v60 = vpop.permute.xlu1 %2064 }
 0x75f   : > { %v2074_v61 = vsel %vm2072_vm11, %v2071_v59, %v2065_v60 }
 0x760   : > { %2700 = vmatmul.mubr.msk.bf16.vlgmr.msra.gmra.mrb[20].mxu1 %vm729_vm0, %v2074_v61 }
 0x761   : > { %2719 = vmatprep.mubr.msk.bf16.mxu1 %vm3288_vm1, %v3287_v14  ;;  %2712 = vmatpush3.bf16.msra.mxu1 %v2889_v16 }
 0x762   : > { %2713 = vmatprep.subr.bf16.mxu1 %v3287_v14 }
 0x765   : > { %2714 = vmatpush3.bf16.msra.mxu1 %v2890_v18 }
 0x766   : > { %2715 = vmatprep.subr.bf16.mxu1 %v3287_v14 }
 0x769   : > { %2716 = vmatpush3.bf16.msra.mxu1 %v2891_v35 }
 0x76a   : > { %2717 = vmatprep.subr.bf16.mxu1 %v3287_v14 }
 0x76d   : > { %2718 = vmatpush3.bf16.msra.mxu1 %v2892_v36 }
 0x833   : > { %v2134_v6 = vpop.f32.mrb[20].mxu1 }
 0x834   : > { %v2135_v63 = vadd.f32 %v2567_v62, %v2134_v6  ;;  %v2701_v0 = vpop.f32.mrb[21].mxu1 }
 0x835   : > { %v2137_v1 = vpop.f32.mrb[22].mxu1 }
 0x836   : > { %v2140_v3 = vadd.f32 %v2921_v2, %v2135_v63  ;;  %v2702_v4 = vpop.f32.mrb[23].mxu1 }
 0x838   : > { %v2143_v5 = vsel %vm729_vm0, %v2140_v3, 0.0 }
 0x839   : > { %2144 = vadd.xlane.f32.xlu1 %v2143_v5 }
 0x8c6   : > { %v2145_v7 = vpop.xlane.xlu1 %2144 }
 0x8c7   : > { %v2146_v8 = vmul.f32 0.03125, %v2145_v7 }
 0x8c9   : > { %v2147_v10 = vsub.f32 %v2140_v3, %v2146_v8 }
 0x8cb   : > { %v2148_v11 = vmul.f32 %v2147_v10, %v2147_v10  ;;  %v2166_v28 = vmul.f32 %v2571_v49, %v2147_v10 }
 0x8cd   : > { %v2149_v12 = vsel %vm729_vm0, %v2148_v11, 0.0 }
 0x8ce   : > { %2150 = vadd.xlane.f32.xlu0 %v2149_v12 }
 0x95b   : > { %v2151_v19 = vpop.xlane.xlu0 %2150 }
 0x95c   : > { %v2152_v20 = vmul.f32 0.032258064, %v2151_v19 }
 0x95e   : > { %2917 = vrsqrt.f32 %v2152_v20  ;;  %vm2155_vm12 = vcmp.eq.f32.partialorder %v2152_v20, inf  ;;  %v2158_v23 = vand.u32 2147483648, %v2152_v20  ;;  %vm2157_vm13 = vcmp.eq.f32.partialorder %v2152_v20, 0.0 }
 0x968   : > { %v2918_v21 = vpop.eup %2917 }
 0x969   : > { %v2154_v22 = vmul.f32 %v2918_v21, %v2152_v20 }
 0x96b   : > { %v2156_v24 = vsel %vm2155_vm12, %v2152_v20, %v2154_v22 }
 0x96c   : > { %v2159_v25 = vsel %vm2157_vm13, %v2158_v23, %v2156_v24 }
 0x96d   : > { %v2167_v26 = vadd.f32 1e-06, %v2159_v25 }
 0x96f   : > { %2919 = vrcp.f32 %v2167_v26 }
 0x979   : > { %v2920_v29 = vpop.eup %2919 }
 0x97a   : > { %v2169_v32 = vmul.f32 %v2920_v29, %v2166_v28 }
 0x97c   : > { %v2176_v33 = vadd.f32 %v2572_v30, %v2169_v32 }
 0x97e   : > { %v2177_v34 = vpack.c.bf16 %v2176_v33, %v2176_v33 }
 0x980   : > { %2708 = vmatmul.mubr.msk.bf16.vlgmr.msra.gmra.mrb[24].mxu0 %vm729_vm0, %v2177_v34 }
 0xa53   : > { %v2238_v31 = vpop.f32.mrb[24].mxu0 }
 0xa54   : > { %v2239_v37 = vadd.f32 %v2573_v27, %v2238_v31  ;;  %v2709_v38 = vpop.f32.mrb[25].mxu0 }
 0xa55   : > { %v2241_v39 = vpop.f32.mrb[26].mxu0 }
 0xa56   : > { %v2244_v40 = vmax.f32 %v2239_v37, 0.0  ;;  %v2710_v41 = vpop.f32.mrb[27].mxu0 }
 0xa58   : > { %v2245_v42 = vpack.c.bf16 %v2244_v40, %v2244_v40 }
 0xa5a   : > { %2720 = vmatmul.mubr.msk.bf16.vlgmr.msra.gmra.mrb[24].mxu1 %vm2278_vm14, %v2245_v42 }
 0xb2d   : > { %v2316_v14 = vpop.f32.mrb[24].mxu1 }
 0xb2e   : > { %v2322_v44 = vadd.f32 %v2316_v14, %v2140_v3  ;;  %v2721_v45 = vpop.f32.mrb[25].mxu1 }
 0xb2f   : > { %v2319_v46 = vpop.f32.mrb[26].mxu1 }
 0xb30   : > { %v2330_v47 = vadd.f32 %v2582_v43, %v2322_v44  ;;  %v2722_v48 = vpop.f32.mrb[27].mxu1 }
 0xb32   : > { %2331 = vst.msk [vmem:[%s716_s24] sm:$0xff] %vm729_vm0, %v2330_v47 }
 0xb33   : > { %3189 = shalt.err (!%p3186_p9)
}
 0xb34   : > { %s3190_s7 = scalar_lea.hbm %s3977_s3, 128  ;;  %s3194_s18 = scalar_lea.hbm %s4097_s2, 256 }
 0xb35   : > { %p3191_p4 = scmp.ne.s32.totalorder %s3977_s3, %s3190_s7  ;;  %p3195_p1 = scmp.lt.u32.totalorder %s3977_s3, %s4097_s2 }
 0xb36   : > { %p3196_p12 = scmp.lt.u32.totalorder %s3194_s18, %s3190_s7  ;;  %p3198_p0 = scmp.lt.u32.totalorder %s3190_s7, %s3977_s3 }
 0xb37   : > { %p3192_p6 = pnand %p3191_p4, %p4098_p5 }
 0xb38   : > { %p3197_p11 = por %p3196_p12, %p3195_p1 }
 0xb39   : > { %p3193_p3 = pneg %p3192_p6 }
 0xb3a   : > { %p3199_p7 = por %p3198_p0, %p3197_p11 }
 0xb3c   : > { %p3200_p10 = pnand %p3199_p7, %p3193_p3 }
 0xb3e   : > { %3203 = shalt.err (!%p3200_p10)
}
 0xb3f   : > { %2757 = dma.vmem_to_hbm [thread:$0]  (%p4098_p5), %s3979_s17, 128, %s3977_s3, %s2333_s30  }
 0xb40 PF: > { %s2359_s16 = sand.u32 1, %s3254_s27   ;;  %p4099_p13 = scmp.ne.s32.totalorder %s4084_s1, 0 }
 0xb41   : > { %p4100_p2 = scmp.ge.s32.totalorder %s3274_s19, 2  ;;  %s2360_s20 = scalar_lea.sflag [#allocation6], %s2359_s16 }
 0xb43   : > { %p2789_p8 = pnand %p4100_p2, %p4099_p13 }
 0xb45   : > { %3249 = dma.done.wait (!%p2789_p8), %s2360_s20, 128  }
 0xb46   : > { %3251 = vsyncadd (!%p2789_p8), %s2360_s20, 4294967168  ;;  %s38_s19 = sadd.s32 1, %s3274_s19   ;;  %s4101_s27 = smov %s3258_s28 }
 0xb47   : > { %p35_p9 = scmp.ge.s32.totalorder %s38_s19, 4   ;;  %s4102_s28 = smov %s3262_s29 }
 0xb48   : > { %s4103_s29 = smov %s3649_s10  ;;  %s4104_s30 = smov %s3270_s0 }
 0xb49   : > { %s4105_s0 = smov %s4107_s5  ;;  %37 = sbr.rel (!%p35_p9) target bundleno = 24 (0x18), region = 177 }
 0xb50   :  { %2365 = vsyncpa [#allocation5], 1 }
 0xb51   :  { %2367 = vsyncpa [#allocation5 + $0x1], 1 }
 0xb52   :  { %2368 = vsyncpa [#allocation8], 1 }
 0xb53   :  { %2369 = vsyncpa [#allocation11], 1 }
 0xb54   :  { %2370 = vsyncpa [#allocation14], 1 }
 0xb55   :  { %2371 = vsyncpa [#allocation17], 1 }
 0xb56   :  { %2372 = vsyncpa [#allocation6], 1 }
 0xb57   :  { %2374 = vsyncpa [#allocation6 + $0x1], 1 }

</bundles_post_ra>
